<compile_context>
chip_gen: v6e
topology: v6e:2x2x1
jax: 0.10.0
libtpu: 0.0.40
codegen_flags: <defaults>
</compile_context>

<pallas_src>
import functools

import jax
import jax.numpy as jnp
from jax import lax
from jax.experimental import pallas as pl
from jax.experimental.pallas import tpu as pltpu

_INT32_MIN = jnp.iinfo(jnp.int32).min


def _graph_editer_kernel(bk_rows_ref, bk_cols_ref, a_cols_ref, gum_ref,
                         logz_ref, c_ref, lp_ref, *, num_sample, kbits):
    tm, n = bk_rows_ref.shape

    # Row-i sampling logits over candidate columns c:
    #   log w[i, c] = Bk[i, c] - logZ_c   (+ Gumbel noise -> top-k per row
    #   == multinomial without replacement).
    pert = bk_rows_ref[...] - logz_ref[...] + gum_ref[...]            # (tm, n)

    # Order-preserving f32 -> i32 key with the reversed column index packed
    # into the low `kbits` bits: a single max-reduction per sample round gives
    # the argmax with smallest-index tie-breaking, and the selection mask is a
    # single compare because packed values are distinct within a row.
    bits = lax.bitcast_convert_type(pert, jnp.int32)
    key = bits ^ (jnp.right_shift(bits, 31) & jnp.int32(0x7FFFFFFF))
    rev_col = (n - 1) - lax.broadcasted_iota(jnp.int32, (tm, n), 1)
    packed = (key & jnp.int32(-(1 << kbits))) | rev_col

    mt = jnp.zeros((tm, n), jnp.float32)     # mt[i, c] = 1  iff  c in S[i, :]

    def one_round(carry):
        packed, mt = carry
        rmax = jnp.max(packed, axis=-1, keepdims=True)    # 1 XLU reduction
        mask = packed == rmax                             # exactly one hit/row
        mt = jnp.where(mask, 1.0, mt)
        packed = jnp.where(mask, _INT32_MIN, packed)      # w/o replacement
        return packed, mt

    if num_sample <= 8:                       # short fixed trip count: unroll
        for _ in range(num_sample):
            packed, mt = one_round((packed, mt))
    else:                                     # bound vreg live ranges
        packed, mt = lax.fori_loop(0, num_sample,
                                   lambda _, c: one_round(c), (packed, mt))

    # One in-kernel transpose gives M[:, block]; C is written directly as a
    # lane-dense column tile and the log_p gather is a single sum(M * Bk).
    m_cols = jnp.transpose(mt)                                        # (n, tm)
    a_cols = a_cols_ref[...]
    c_ref[...] = a_cols + m_cols * (1.0 - 2.0 * a_cols)

    score = jnp.sum(m_cols * bk_cols_ref[...], keepdims=True)         # (1, 1)
    lp_ref[...] = jnp.broadcast_to(score, lp_ref.shape)


def _pick_tile(n):
    # Row-tile the sampler axis when n allows lane-dense (n, 128) output tiles;
    # otherwise fall back to a single block (block == full array dims).
    if n > 128 and n % 128 == 0:
        return 128
    return n


def graph_editer_forward(B, edge_index, num_sample, k, key):
    """JAX/Pallas equivalent of Graph_Editer.forward -> (edge_index, log_p, C)."""
    K, n, _ = B.shape
    assert 0 <= k < K
    assert num_sample <= n, "num_sample must be <= n (sampling w/o replacement)"

    Bk = B[k].astype(jnp.float32)
    src, dst = edge_index
    A = jnp.zeros((n, n), jnp.float32).at[src, dst].set(1.0)     # to_dense_adj

    # Precompute logsumexp(Bk, dim=0): removes the only cross-row dependency so
    # the grid can be tiled over rows.
    logz = jax.scipy.special.logsumexp(Bk, axis=0).reshape(1, n).astype(
        jnp.float32)

    # Gumbel noise generated with jax.random and streamed into the kernel.
    # TODO(synk): on real TPU this could use the in-kernel PRNG
    # (pltpu.prng_seed / prng_random_bits) to save an n^2 HBM read, but those
    # primitives have no interpret/CPU lowering.
    G = jax.random.gumbel(jax.random.fold_in(key, k), (n, n), dtype=jnp.float32)

    tm = _pick_tile(n)
    num_blocks = n // tm
    kbits = max(1, (n - 1).bit_length())     # bits needed to encode a column id

    kernel = functools.partial(_graph_editer_kernel,
                               num_sample=num_sample, kbits=kbits)

    C, lp_parts = pl.pallas_call(
        kernel,
        out_shape=(jax.ShapeDtypeStruct((n, n), jnp.float32),
                   jax.ShapeDtypeStruct((num_blocks * 8, 128), jnp.float32)),
        grid=(num_blocks,),
        in_specs=[
            pl.BlockSpec((tm, n), lambda i: (i, 0)),   # Bk rows   (pert logits)
            pl.BlockSpec((n, tm), lambda i: (0, i)),   # Bk cols   (log_p gather)
            pl.BlockSpec((n, tm), lambda i: (0, i)),   # A  cols
            pl.BlockSpec((tm, n), lambda i: (i, 0)),   # Gumbel rows
            pl.BlockSpec((1, n), lambda i: (0, 0)),    # logz (resident)
        ],
        out_specs=(
            pl.BlockSpec((n, tm), lambda i: (0, i)),   # C column tile
            pl.BlockSpec((8, 128), lambda i: (i, 0)),  # per-block log_p partial
        ),
        compiler_params=pltpu.CompilerParams(
            dimension_semantics=("parallel",)),        # v7x: shard over 2 TCs
    )(Bk, Bk, A, G, logz)

    log_p = jnp.sum(lp_parts[::8, 0]) - jnp.sum(logz)
    # dense_to_sparse: data-dependent nnz -> eager, outside the kernel.
    new_edge_index = jnp.stack(jnp.nonzero(C > 0.5))
    return new_edge_index, log_p, C


if __name__ == "__main__":
    key = jax.random.PRNGKey(0)
    K, n, num_sample, k_env = 2, 256, 4, 1

    kB, kS, kD, kG = jax.random.split(key, 4)
    # nn.init.uniform_ equivalent for B: U[0, 1), shape (K, n, n)
    B = jax.random.uniform(kB, (K, n, n), dtype=jnp.float32)

    # synthetic edge_index (2, E)
    E = 512
    src = jax.random.randint(kS, (E,), 0, n)
    dst = jax.random.randint(kD, (E,), 0, n)
    edge_index = jnp.stack([src, dst])

    new_edge_index, log_p, C = graph_editer_forward(
        B, edge_index, num_sample, k_env, kG)
    jax.block_until_ready((new_edge_index, log_p, C))

    # ---------------- sanity checks -----------------------------------------
    Bk = B[k_env]
    A = jnp.zeros((n, n), jnp.float32).at[src, dst].set(1.0)
    logz = jax.scipy.special.logsumexp(Bk, axis=0)

    # C stays binary; exactly num_sample entries toggled in every column.
    assert bool(jnp.all((C == 0.0) | (C == 1.0)))
    M_rec = jnp.abs(C - A)
    assert int(jnp.sum(M_rec)) == n * num_sample
    assert bool(jnp.all(jnp.sum(M_rec, axis=0) == num_sample))

    # log_p consistent with the kernel's own edit mask.
    log_p_self = jnp.sum(M_rec * Bk) - jnp.sum(logz)
    assert bool(jnp.isfinite(log_p))
    assert bool(jnp.allclose(log_p, log_p_self, rtol=1e-4, atol=1e-3))

    # Independent pure-JAX reference of the same sampler (identical packed
    # keys, selection via lax.top_k) -> kernel output must match.
    G = jax.random.gumbel(jax.random.fold_in(kG, k_env), (n, n),
                          dtype=jnp.float32)
    kbits = max(1, (n - 1).bit_length())
    pert = Bk - logz[None, :] + G
    bits = lax.bitcast_convert_type(pert, jnp.int32)
    pkey = bits ^ (jnp.right_shift(bits, 31) & jnp.int32(0x7FFFFFFF))
    rev_col = (n - 1) - jnp.arange(n, dtype=jnp.int32)[None, :]
    packed = (pkey & jnp.int32(-(1 << kbits))) | rev_col
    _, S_ref = lax.top_k(packed, num_sample)                  # (n, num_sample)
    M_ref = jnp.zeros((n, n), jnp.float32).at[
        S_ref, jnp.arange(n)[:, None]].set(1.0)
    C_ref = A + M_ref * (1.0 - 2.0 * A)
    log_p_ref = jnp.sum(M_ref * Bk) - jnp.sum(logz)
    assert bool(jnp.array_equal(C, C_ref))
    assert bool(jnp.allclose(log_p, log_p_ref, rtol=1e-4, atol=1e-3))

    print("KERNEL_OK")
</pallas_src>

<mosaic_0001>
module attributes {stable_mosaic.version = 11 : i64} {
  func.func @_graph_editer_kernel(%arg0: i32, %arg1: memref<128x256xf32, #tpu.memory_space<vmem>>, %arg2: memref<256x128xf32, #tpu.memory_space<vmem>>, %arg3: memref<256x128xf32, #tpu.memory_space<vmem>>, %arg4: memref<128x256xf32, #tpu.memory_space<vmem>>, %arg5: memref<1x256xf32, #tpu.memory_space<vmem>>, %arg6: memref<256x128xf32, #tpu.memory_space<vmem>>, %arg7: memref<8x128xf32, #tpu.memory_space<vmem>>) attributes {dimension_semantics = [#tpu.dimension_semantics<parallel>], iteration_bounds = array<i64: 2>, scalar_prefetch = 0 : i64, scratch_operands = 0 : i64, tpu.core_type = #tpu.core_type<tc>, window_params = [{transform_indices = @transform_0, window_bounds = array<i64: 128, 256>}, {transform_indices = @transform_1, window_bounds = array<i64: 256, 128>}, {transform_indices = @transform_2, window_bounds = array<i64: 256, 128>}, {transform_indices = @transform_3, window_bounds = array<i64: 128, 256>}, {pipeline_mode = #tpu.pipeline_mode<synchronous>, transform_indices = @transform_4, window_bounds = array<i64: 1, 256>}, {transform_indices = @transform_5, window_bounds = array<i64: 256, 128>}, {transform_indices = @transform_6, window_bounds = array<i64: 8, 128>}]} {
    %c0 = arith.constant 0 : index
    %c0_0 = arith.constant 0 : index
    %0 = vector.load %arg1[%c0, %c0_0] : memref<128x256xf32, #tpu.memory_space<vmem>>, vector<128x256xf32>
    %c0_1 = arith.constant 0 : index
    %c0_2 = arith.constant 0 : index
    %1 = vector.load %arg5[%c0_1, %c0_2] : memref<1x256xf32, #tpu.memory_space<vmem>>, vector<1x256xf32>
    %2 = vector.broadcast %1 : vector<1x256xf32> to vector<128x256xf32>
    %3 = arith.subf %0, %2 : vector<128x256xf32>
    %c0_3 = arith.constant 0 : index
    %c0_4 = arith.constant 0 : index
    %4 = vector.load %arg4[%c0_3, %c0_4] : memref<128x256xf32, #tpu.memory_space<vmem>>, vector<128x256xf32>
    %5 = arith.addf %3, %4 : vector<128x256xf32>
    %6 = tpu.bitcast %5 : vector<128x256xf32> -> vector<128x256xi32>
    %c31_i32 = arith.constant 31 : i32
    %7 = vector.broadcast %c31_i32 : i32 to vector<128x256xi32>
    %8 = arith.shrsi %6, %7 : vector<128x256xi32>
    %c2147483647_i32 = arith.constant 2147483647 : i32
    %9 = vector.broadcast %c2147483647_i32 : i32 to vector<128x256xi32>
    %10 = arith.andi %8, %9 : vector<128x256xi32>
    %11 = arith.xori %6, %10 : vector<128x256xi32>
    %12 = tpu.iota {dimensions = array<i32: 1>} : vector<128x256xi32>
    %c255_i32 = arith.constant 255 : i32
    %13 = vector.broadcast %c255_i32 : i32 to vector<128x256xi32>
    %14 = arith.subi %13, %12 : vector<128x256xi32>
    %c-256_i32 = arith.constant -256 : i32
    %15 = vector.broadcast %c-256_i32 : i32 to vector<128x256xi32>
    %16 = arith.andi %11, %15 : vector<128x256xi32>
    %17 = arith.ori %16, %14 : vector<128x256xi32>
    %cst = arith.constant 0.000000e+00 : f32
    %18 = vector.broadcast %cst : f32 to vector<128x256xf32>
    %cst_5 = arith.constant dense<-2147483648> : vector<128xi32>
    %19 = vector.multi_reduction <maxsi>, %17, %cst_5 [1] : vector<128x256xi32> to vector<128xi32>
    %20 = vector.shape_cast %19 : vector<128xi32> to vector<128x1xi32>
    %21 = vector.broadcast %20 : vector<128x1xi32> to vector<128x256xi32>
    %22 = arith.cmpi eq, %17, %21 : vector<128x256xi32>
    %cst_6 = arith.constant 1.000000e+00 : f32
    %23 = vector.broadcast %cst_6 : f32 to vector<128x256xf32>
    %24 = arith.select %22, %23, %18 : vector<128x256xi1>, vector<128x256xf32>
    %c-2147483648_i32 = arith.constant -2147483648 : i32
    %25 = vector.broadcast %c-2147483648_i32 : i32 to vector<128x256xi32>
    %26 = arith.select %22, %25, %17 : vector<128x256xi1>, vector<128x256xi32>
    %cst_7 = arith.constant dense<-2147483648> : vector<128xi32>
    %27 = vector.multi_reduction <maxsi>, %26, %cst_7 [1] : vector<128x256xi32> to vector<128xi32>
    %28 = vector.shape_cast %27 : vector<128xi32> to vector<128x1xi32>
    %29 = vector.broadcast %28 : vector<128x1xi32> to vector<128x256xi32>
    %30 = arith.cmpi eq, %26, %29 : vector<128x256xi32>
    %cst_8 = arith.constant 1.000000e+00 : f32
    %31 = vector.broadcast %cst_8 : f32 to vector<128x256xf32>
    %32 = arith.select %30, %31, %24 : vector<128x256xi1>, vector<128x256xf32>
    %c-2147483648_i32_9 = arith.constant -2147483648 : i32
    %33 = vector.broadcast %c-2147483648_i32_9 : i32 to vector<128x256xi32>
    %34 = arith.select %30, %33, %26 : vector<128x256xi1>, vector<128x256xi32>
    %cst_10 = arith.constant dense<-2147483648> : vector<128xi32>
    %35 = vector.multi_reduction <maxsi>, %34, %cst_10 [1] : vector<128x256xi32> to vector<128xi32>
    %36 = vector.shape_cast %35 : vector<128xi32> to vector<128x1xi32>
    %37 = vector.broadcast %36 : vector<128x1xi32> to vector<128x256xi32>
    %38 = arith.cmpi eq, %34, %37 : vector<128x256xi32>
    %cst_11 = arith.constant 1.000000e+00 : f32
    %39 = vector.broadcast %cst_11 : f32 to vector<128x256xf32>
    %40 = arith.select %38, %39, %32 : vector<128x256xi1>, vector<128x256xf32>
    %c-2147483648_i32_12 = arith.constant -2147483648 : i32
    %41 = vector.broadcast %c-2147483648_i32_12 : i32 to vector<128x256xi32>
    %42 = arith.select %38, %41, %34 : vector<128x256xi1>, vector<128x256xi32>
    %cst_13 = arith.constant dense<-2147483648> : vector<128xi32>
    %43 = vector.multi_reduction <maxsi>, %42, %cst_13 [1] : vector<128x256xi32> to vector<128xi32>
    %44 = vector.shape_cast %43 : vector<128xi32> to vector<128x1xi32>
    %45 = vector.broadcast %44 : vector<128x1xi32> to vector<128x256xi32>
    %46 = arith.cmpi eq, %42, %45 : vector<128x256xi32>
    %cst_14 = arith.constant 1.000000e+00 : f32
    %47 = vector.broadcast %cst_14 : f32 to vector<128x256xf32>
    %48 = arith.select %46, %47, %40 : vector<128x256xi1>, vector<128x256xf32>
    %49 = tpu.transpose %48, [1, 0] : vector<128x256xf32> -> vector<256x128xf32>
    %c0_15 = arith.constant 0 : index
    %c0_16 = arith.constant 0 : index
    %50 = vector.load %arg3[%c0_15, %c0_16] : memref<256x128xf32, #tpu.memory_space<vmem>>, vector<256x128xf32>
    %cst_17 = arith.constant 2.000000e+00 : f32
    %51 = vector.broadcast %cst_17 : f32 to vector<256x128xf32>
    %52 = arith.mulf %51, %50 : vector<256x128xf32>
    %cst_18 = arith.constant 1.000000e+00 : f32
    %53 = vector.broadcast %cst_18 : f32 to vector<256x128xf32>
    %54 = arith.subf %53, %52 : vector<256x128xf32>
    %55 = arith.mulf %49, %54 : vector<256x128xf32>
    %56 = arith.addf %50, %55 : vector<256x128xf32>
    %c0_19 = arith.constant 0 : index
    %c0_20 = arith.constant 0 : index
    %57 = vector.load %arg6[%c0_19, %c0_20] : memref<256x128xf32, #tpu.memory_space<vmem>>, vector<256x128xf32>
    tpu.vector_store %arg6[%c0_19, %c0_20], %56 {strides = array<i32>} : memref<256x128xf32, #tpu.memory_space<vmem>>, vector<256x128xf32>,
    %c0_21 = arith.constant 0 : index
    %c0_22 = arith.constant 0 : index
    %58 = vector.load %arg2[%c0_21, %c0_22] : memref<256x128xf32, #tpu.memory_space<vmem>>, vector<256x128xf32>
    %59 = arith.mulf %49, %58 : vector<256x128xf32>
    %60 = vector.shape_cast %59 : vector<256x128xf32> to vector<1x256x128xf32>
    %cst_23 = arith.constant dense<0.000000e+00> : vector<1xf32>
    %61 = vector.multi_reduction <add>, %60, %cst_23 [1, 2] : vector<1x256x128xf32> to vector<1xf32>
    %62 = vector.shape_cast %61 : vector<1xf32> to vector<1x1x1xf32>
    %63 = vector.extract %62[0, 0, 0] : f32 from vector<1x1x1xf32>
    %64 = vector.broadcast %63 : f32 to vector<1x1xf32>
    %65 = vector.shape_cast %64 : vector<1x1xf32> to vector<1x1xf32>
    %66 = vector.broadcast %65 : vector<1x1xf32> to vector<8x128xf32>
    %c0_24 = arith.constant 0 : index
    %c0_25 = arith.constant 0 : index
    %67 = vector.load %arg7[%c0_24, %c0_25] : memref<8x128xf32, #tpu.memory_space<vmem>>, vector<8x128xf32>
    tpu.vector_store %arg7[%c0_24, %c0_25], %66 {strides = array<i32>} : memref<8x128xf32, #tpu.memory_space<vmem>>, vector<8x128xf32>,
    return
  }
  func.func @transform_0(%arg0: i32) -> (i32, i32) {
    %c0_i32 = arith.constant 0 : i32
    %c0_i32_0 = arith.constant 0 : i32
    return %arg0, %c0_i32 : i32, i32
  }
  func.func @transform_1(%arg0: i32) -> (i32, i32) {
    %c0_i32 = arith.constant 0 : i32
    %c0_i32_0 = arith.constant 0 : i32
    return %c0_i32, %arg0 : i32, i32
  }
  func.func @transform_2(%arg0: i32) -> (i32, i32) {
    %c0_i32 = arith.constant 0 : i32
    %c0_i32_0 = arith.constant 0 : i32
    return %c0_i32, %arg0 : i32, i32
  }
  func.func @transform_3(%arg0: i32) -> (i32, i32) {
    %c0_i32 = arith.constant 0 : i32
    %c0_i32_0 = arith.constant 0 : i32
    return %arg0, %c0_i32 : i32, i32
  }
  func.func @transform_4(%arg0: i32) -> (i32, i32) {
    %c0_i32 = arith.constant 0 : i32
    %c0_i32_0 = arith.constant 0 : i32
    %c0_i32_1 = arith.constant 0 : i32
    return %c0_i32, %c0_i32_0 : i32, i32
  }
  func.func @transform_5(%arg0: i32) -> (i32, i32) {
    %c0_i32 = arith.constant 0 : i32
    %c0_i32_0 = arith.constant 0 : i32
    return %c0_i32, %arg0 : i32, i32
  }
  func.func @transform_6(%arg0: i32) -> (i32, i32) {
    %c0_i32 = arith.constant 0 : i32
    %c0_i32_0 = arith.constant 0 : i32
    return %arg0, %c0_i32 : i32, i32
  }
}

</mosaic_0001>

<bundles_post_ra>
// kernel: tpu_custom_call.1
= control target key start
LH: loop header
LB: loop body
LE: loop exit
PB: predicated region body
PF: predicated region fallthrough
CT: control target
= control target key end

     0   :  { %s5868_s0 = inlined_call_operand.hbm [shape: f32[256,256], index: 0, kind: input, shape index: {}]   ;;  %s5869_s1 = inlined_call_operand.hbm [shape: f32[256,256], index: 1, kind: input, shape index: {}]   ;;  %s5870_s2 = inlined_call_operand.hbm [shape: f32[256,256], index: 2, kind: input, shape index: {}]   ;;  %s5871_s3 = inlined_call_operand.hbm [shape: f32[256,256], index: 3, kind: input, shape index: {}]   ;;  %s5872_s4 = inlined_call_operand.vmem [shape: f32[1,256], index: 4, kind: input, shape index: {}]   ;;  %s5873_s5 = inlined_call_operand.hbm [shape: f32[256,256], index: 5, kind: output, shape index: {0}]   ;;  %s5874_s6 = inlined_call_operand.hbm [shape: f32[16,128], index: 6, kind: output, shape index: {1}]  }
   0x1   :  { %6081 = sst [smem:[#allocation80_spill]] %s5868_s0 }
   0x2   :  { %6082 = sst [smem:[#allocation81_spill]] %s5869_s1 }
   0x3   :  { %12 = vsyncpa [#allocation3], 0 }
   0x4   :  { %14 = vsyncpa [#allocation3 + $0x1], 0 }
   0x5   :  { %15 = vsyncpa [#allocation6], 0 }
   0x6   :  { %17 = vsyncpa [#allocation6 + $0x1], 0 }
   0x7   :  { %18 = vsyncpa [#allocation9], 0 }
   0x8   :  { %20 = vsyncpa [#allocation9 + $0x1], 0 }
   0x9   :  { %21 = vsyncpa [#allocation4], 0 }
   0xa   :  { %23 = vsyncpa [#allocation4 + $0x1], 0 }
   0xb   :  { %24 = vsyncpa [#allocation12], 0 }
   0xc   :  { %26 = vsyncpa [#allocation12 + $0x1], 0  ;;  %s3050_s21 = smov 0   ;;  %s3052_s22 = smov 0  }
   0xd   :  { %s3054_s23 = smov 0   ;;  %s3056_s24 = smov 0  }
   0xe LB: > { %6083 = sst [smem:[#allocation18_spill]] %s2995_s23  ;;  %s3071_s25 = sadd.s32 4294967295, %s2999_s24   ;;  %s2999_s24 = sphi %s3056_s24, %s6419_s24   ;;  %s2995_s23 = sphi %s3054_s23, %s6421_s23   ;;  %s2991_s22 = sphi %s3052_s22, %s6423_s22   ;;  %s2987_s21 = sphi %s3050_s21, %s6422_s21  }
   0xf   : > { %s2677_s26 = sadd.s32 4294967294, %s2999_s24   ;;  %s3075_s27 = sadd.s32 1, %s2999_s24  }
  0x10   : > { %6084 = sst [smem:[#allocation19_spill]] %s3075_s27  ;;  %s39_s28 = sadd.s32 1, %s2995_s23 }
  0x11   : > { %s36_s29 = ssub.s32 %s2999_s24, %s3075_s27  ;;  %p46_p0 = scmp.ne.s32.totalorder %s2995_s23, %s2991_s22 }
  0x12   : > { %p37_p1 = scmp.eq.s32.totalorder %s36_s29, 0  ;;  %p47_p2 = scmp.eq.s32.totalorder %s2999_s24, 0 }
  0x13   : > { %p52_p3 = scmp.ne.s32.totalorder %s2991_s22, %s2987_s21  ;;  %p53_p4 = scmp.eq.s32.totalorder %s3071_s25, 0 }
  0x14   : > { %s3087_s30 = scalar_select %p37_p1, %s2995_s23, %s39_s28  }
  0x15   : > { %p48_p5 = por %p47_p2, %p46_p0  ;;  %p3089_p6 = por %p53_p4, %p52_p3 }
  0x16   : > { %6085 = sst [smem:[#allocation20_spill]] %s3087_s30  ;;  %p175_p7 = scmp.eq.s32.totalorder %s3071_s25, 1 }
  0x17   : > { %s6086_s7 = scalar_select %p3089_p6, 1, 0 }
  0x18   : > { %p181_p8 = scmp.eq.s32.totalorder %s2677_s26, 1  ;;  %p2743_p10 = scmp.lt.s32.totalorder %s2999_s24, 2 }
  0x19   : > { %p3096_p11 = por %p175_p7, %p46_p0  ;;  %s3105_s10 = sand.u32 1, %s2995_s23  }
  0x1a   : > { %p3100_p12 = por %p181_p8, %p52_p3  ;;  %p3107_p13 = pnand %p2743_p10, %p48_p5 }
  0x1b   : > { %s6087_s8 = scalar_select %p3096_p11, 1, 0 }
  0x1c   : > { %s6088_s9 = scalar_select %p3100_p12, 1, 0 }
  0x1d   : > { %s3112_s12 = sshll.u32 %s3105_s10, 8  ;;  %s252_s13 = sand.u32 1, %s2999_s24  }
  0x1e   : > { %6089 = sst [smem:[#allocation21_spill]] %s6088_s9  ;;  %s5875_s14 = sshll.u32 %s2999_s24, 7 }
  0x1f   : > { %s256_s15 = scalar_lea.vmem [#allocation5], %s3112_s12  ;;  %s6091_s1 = sld [smem:[#allocation81_spill]] }
  0x20   : > { %s262_s16 = sshll.u32 %s256_s15, 4  ;;  %s3126_s20 = scalar_lea.sflag [#allocation6], %s252_s13  ;;  %s3124_s16 = int_to_ptr.vmem [resolvable:$true] %s262_s16 }
  0x21   : > { %p3132_p1 = pneg %p3107_p13 }
  0x25   : > { %s3122_s19 = scalar_lea.hbm %s6091_s1, %s5875_s14  ;;  %s2790_s17 = scalar_lea.hbm %s6091_s1, 8192 }
  0x26   : > { %s2785_s26 = scalar_lea.hbm %s3122_s19, 4096  ;;  %p2791_p4 = scmp.lt.s32.totalorder %s3122_s19, %s6091_s1 }
  0x27   : > { %p2786_p0 = scmp.ne.s32.totalorder %s3122_s19, %s2785_s26  ;;  %p2792_p5 = scmp.lt.s32.totalorder %s2790_s17, %s2785_s26 }
  0x29   : > { %p2788_p2 = pnand %p3132_p1, %p2786_p0  ;;  %p2793_p7 = por %p2792_p5, %p2791_p4 }
  0x2b   : > { %p2789_p3 = pneg %p2788_p2 }
  0x2d   : > { %p2794_p8 = pnand %p2793_p7, %p2789_p3 }
  0x2f   : > { %2797 = shalt.err (!%p2794_p8)
}
  0x30   : > { %s2798_s13 = scalar_lea.vmem %s3124_s16, 4096  ;;  %s3001_s30 = smov [#allocation5]  }
  0x31   : > { %p2799_p10 = scmp.ne.s32.totalorder %s3124_s16, %s2798_s13  ;;  %s2803_s29 = sshll.u32 %s3001_s30, 4  ;;  %s2804_s29 = int_to_ptr.vmem [resolvable:$false] %s2803_s29 }
  0x32   : > { %s2805_s15 = scalar_lea.vmem %s2804_s29, 8192  ;;  %p2806_p9 = scmp.lt.s32.totalorder %s3124_s16, %s2804_s29 }
  0x33   : > { %p2801_p0 = pnand %p2799_p10, %p3132_p1  ;;  %p2807_p12 = scmp.lt.s32.totalorder %s2805_s15, %s2798_s13 }
  0x35   : > { %p2802_p2 = pneg %p2801_p0  ;;  %p2808_p11 = por %p2807_p12, %p2806_p9 }
  0x37   : > { %p2809_p6 = pnand %p2808_p11, %p2802_p2 }
  0x39   : > { %2812 = shalt.err (!%p2809_p6)
}
  0x3a   : > { %s3002_s14 = smov 256   ;;  %s5882_s30 = smov 128  }
  0x3b   : > { %s5883_s26 = smov 8   ;;  %s6093_s17 = sshll.u32 %s2999_s24, 7 }
  0x3c   : > { %2729 = dma.hbm_to_vmem [thread:$0]  (!%p3107_p13), %s3122_s19, 4096, %s3124_s16, %s3126_s20, %s3002_s14, %s5882_s30, %s5883_s26  }
  0x3d   : > { %s3163_s29 = scalar_lea.hbm %s5870_s2, %s6093_s17  ;;  %p2692_p6 = scmp.ge.s32.totalorder %s2999_s24, 1 }
  0x3e   : > { %p312_p9 = scmp.lt.s32.totalorder %s2999_s24, 3  ;;  %s5884_s15 = sshll.u32 %s2999_s24, 12 }
  0x3f   : > { %s6095_s0 = sld [smem:[#allocation80_spill]]  ;;  %s234_s16 = scalar_lea.vmem [#allocation2], %s3112_s12 }
  0x40   : > { %p3168_p11 = pnand %p2692_p6, %p312_p9  ;;  %s242_s19 = sshll.u32 %s234_s16, 4  ;;  %s3180_s19 = int_to_ptr.vmem [resolvable:$true] %s242_s19 }
  0x41   : > { %s231_s17 = scalar_lea.sflag [#allocation3], %s3105_s10 }
  0x42   : > { %s6094_s1 = scalar_select %p3168_p11, 1, 0 }
  0x45   : > { %s3177_s9 = scalar_lea.hbm %s6095_s0, %s5884_s15  ;;  %s2818_s26 = scalar_lea.hbm %s6095_s0, 8192 }
  0x46   : > { %s2813_s18 = scalar_lea.hbm %s3177_s9, 4096  ;;  %p2819_p5 = scmp.lt.s32.totalorder %s3177_s9, %s6095_s0 }
  0x47   : > { %p2814_p12 = scmp.ne.s32.totalorder %s3177_s9, %s2813_s18  ;;  %p2820_p7 = scmp.lt.s32.totalorder %s2818_s26, %s2813_s18 }
  0x49   : > { %p2816_p3 = pnand %p2814_p12, %p3132_p1  ;;  %p2821_p8 = por %p2820_p7, %p2819_p5 }
  0x4b   : > { %p2817_p4 = pneg %p2816_p3 }
  0x4d   : > { %p2822_p10 = pnand %p2821_p8, %p2817_p4 }
  0x4f   : > { %2825 = shalt.err (!%p2822_p10)
}
  0x50   : > { %s2826_s16 = scalar_lea.vmem %s3180_s19, 4096  ;;  %s3005_s15 = smov [#allocation2]  }
  0x51   : > { %p2827_p0 = scmp.ne.s32.totalorder %s3180_s19, %s2826_s16  ;;  %s2831_s30 = sshll.u32 %s3005_s15, 4  ;;  %s2832_s30 = int_to_ptr.vmem [resolvable:$false] %s2831_s30 }
  0x52   : > { %s2833_s13 = scalar_lea.vmem %s2832_s30, 8192  ;;  %p2834_p9 = scmp.lt.s32.totalorder %s3180_s19, %s2832_s30 }
  0x53   : > { %p2829_p2 = pnand %p2827_p0, %p3132_p1  ;;  %p2835_p12 = scmp.lt.s32.totalorder %s2833_s13, %s2826_s16 }
  0x55   : > { %p2830_p6 = pneg %p2829_p2  ;;  %p2836_p3 = por %p2835_p12, %p2834_p9 }
  0x57   : > { %p2837_p11 = pnand %p2836_p3, %p2830_p6 }
  0x59   : > { %2840 = shalt.err (!%p2837_p11)
}
  0x5a   : > { %s3006_s26 = smov 16   ;;  %s276_s15 = scalar_lea.vmem [#allocation7], %s3112_s12 }
  0x5b   : > { %2726 = dma.hbm_to_vmem [thread:$0]  (!%p3107_p13), %s3177_s9, 4096, %s3180_s19, %s231_s17, %s3002_s14, %s3002_s14, %s3006_s26  }
  0x5c   : > { %s282_s18 = sshll.u32 %s276_s15, 4  ;;  %s2841_s23 = scalar_lea.hbm %s3163_s29, 4096  ;;  %s283_s18 = int_to_ptr.vmem [resolvable:$true] %s282_s18 }
  0x5d   : > { %p2842_p11 = scmp.ne.s32.totalorder %s3163_s29, %s2841_s23  ;;  %s2846_s30 = scalar_lea.hbm %s5870_s2, 8192 }
  0x5e   : > { %p2847_p7 = scmp.lt.s32.totalorder %s3163_s29, %s5870_s2  ;;  %p2848_p8 = scmp.lt.s32.totalorder %s2846_s30, %s2841_s23 }
  0x5f   : > { %p2844_p4 = pnand %p2842_p11, %p3132_p1 }
  0x60   : > { %p2849_p10 = por %p2848_p8, %p2847_p7 }
  0x61   : > { %p2845_p5 = pneg %p2844_p4 }
  0x63   : > { %p2850_p0 = pnand %p2849_p10, %p2845_p5 }
  0x65   : > { %2853 = shalt.err (!%p2850_p0)
}
  0x66   : > { %s2854_s9 = scalar_lea.vmem %s283_s18, 4096  ;;  %s3007_s19 = smov [#allocation7]  }
  0x67   : > { %p2855_p2 = scmp.ne.s32.totalorder %s283_s18, %s2854_s9  ;;  %s2859_s17 = sshll.u32 %s3007_s19, 4  ;;  %s2860_s17 = int_to_ptr.vmem [resolvable:$false] %s2859_s17 }
  0x68   : > { %s2861_s15 = scalar_lea.vmem %s2860_s17, 8192  ;;  %p2862_p12 = scmp.lt.s32.totalorder %s283_s18, %s2860_s17 }
  0x69   : > { %p2857_p6 = pnand %p2855_p2, %p3132_p1  ;;  %p2863_p3 = scmp.lt.s32.totalorder %s2861_s15, %s2854_s9 }
  0x6b   : > { %p2858_p9 = pneg %p2857_p6  ;;  %p2864_p11 = por %p2863_p3, %p2862_p12 }
  0x6d   : > { %p2865_p4 = pnand %p2864_p11, %p2858_p9 }
  0x6f   : > { %2868 = shalt.err (!%p2865_p4)
}
  0x70   : > { %s6096_s0 = smov 8   ;;  %s6097_s23 = smov 128  }
  0x71   : > { %2732 = dma.hbm_to_vmem [thread:$0]  (!%p3107_p13), %s3163_s29, 4096, %s283_s18, %s3126_s20, %s3002_s14, %s6097_s23, %s6096_s0  }
  0x72   : > { %s6098_s27 = sshll.u32 %s2999_s24, 12  ;;  %s296_s9 = scalar_lea.vmem [#allocation8], %s3112_s12 }
  0x73   : > { %s3234_s13 = scalar_lea.hbm %s5871_s3, %s6098_s27  ;;  %s304_s19 = sshll.u32 %s296_s9, 4  ;;  %s3237_s19 = int_to_ptr.vmem [resolvable:$true] %s304_s19 }
  0x74   : > { %s293_s17 = scalar_lea.sflag [#allocation9], %s3105_s10  ;;  %s2869_s15 = scalar_lea.hbm %s3234_s13, 4096 }
  0x75   : > { %p2870_p5 = scmp.ne.s32.totalorder %s3234_s13, %s2869_s15  ;;  %s2874_s18 = scalar_lea.hbm %s5871_s3, 8192 }
  0x76   : > { %p2875_p10 = scmp.lt.s32.totalorder %s3234_s13, %s5871_s3  ;;  %p2876_p0 = scmp.lt.s32.totalorder %s2874_s18, %s2869_s15 }
  0x77   : > { %p2872_p7 = pnand %p2870_p5, %p3132_p1 }
  0x78   : > { %p2877_p2 = por %p2876_p0, %p2875_p10 }
  0x79   : > { %p2873_p8 = pneg %p2872_p7 }
  0x7b   : > { %p2878_p6 = pnand %p2877_p2, %p2873_p8 }
  0x7d   : > { %2881 = shalt.err (!%p2878_p6)
}
  0x7e   : > { %s2882_s10 = scalar_lea.vmem %s3237_s19, 4096  ;;  %s3008_s12 = smov [#allocation8]  }
  0x7f   : > { %p2883_p9 = scmp.ne.s32.totalorder %s3237_s19, %s2882_s10  ;;  %s2887_s27 = sshll.u32 %s3008_s12, 4  ;;  %s2888_s27 = int_to_ptr.vmem [resolvable:$false] %s2887_s27 }
  0x80   : > { %s2889_s16 = scalar_lea.vmem %s2888_s27, 8192  ;;  %p2890_p11 = scmp.lt.s32.totalorder %s3237_s19, %s2888_s27 }
  0x81   : > { %p2885_p12 = pnand %p2883_p9, %p3132_p1  ;;  %p2891_p4 = scmp.lt.s32.totalorder %s2889_s16, %s2882_s10 }
  0x83   : > { %p2886_p3 = pneg %p2885_p12  ;;  %p2892_p5 = por %p2891_p4, %p2890_p11 }
  0x85   : > { %p2893_p7 = pnand %p2892_p5, %p2886_p3 }
  0x87   : > { %2896 = shalt.err (!%p2893_p7)
}
  0x88   : > { %2735 = dma.hbm_to_vmem [thread:$0]  (!%p3107_p13), %s3234_s13, 4096, %s3237_s19, %s293_s17, %s3002_s14, %s3002_s14, %s3006_s26  }
  0x89   : > { %p6099_p1 = scmp.ne.s32.totalorder %s6094_s1, 0 }
  0x8b   : > { %316 = sbr.rel (%p6099_p1) target bundleno = 1775 (0x6ef), region = 40 }
  0x90   : > { %s3266_s28 = sand.u32 1, %s2991_s22   ;;  %p6100_p8 = scmp.ne.s32.totalorder %s6086_s7, 0 }
  0x91   : > { %s3269_s30 = sshll.u32 %s3266_s28, 8  ;;  %s319_s9 = scalar_lea.sflag [#allocation3], %s3266_s28 }
  0x92   : > { %s3273_s11 = scalar_lea.vmem [#allocation2], %s3269_s30 }
  0x93   : > { %2966 = dma.done.wait (%p6100_p8), %s319_s9, 4096  }
  0x94   : > { %2968 = vsyncadd (%p6100_p8), %s319_s9, 4294963200  ;;  %s327_s1 = sand.u32 1, %s3071_s25   ;;  %s3281_s26 = scalar_lea.vmem [#allocation5], %s3269_s30 }
  0x95   : > { %s328_s14 = scalar_lea.sflag [#allocation6], %s327_s1 }
  0x96   : > { %2970 = dma.done.wait (%p6100_p8), %s328_s14, 8192  }
  0x97   : > { %2972 = vsyncadd (%p6100_p8), %s328_s14, 4294959104  ;;  %s3288_s13 = scalar_lea.vmem [#allocation7], %s3269_s30  ;;  %s346_s19 = scalar_lea.sflag [#allocation9], %s3266_s28 }
  0x98   : > { %s3292_s17 = scalar_lea.vmem [#allocation8], %s3269_s30 }
  0x99   : > { %2974 = dma.done.wait (%p6100_p8), %s346_s19, 4096  }
  0x9a   : > { %2976 = vsyncadd (%p6100_p8), %s346_s19, 4294963200  ;;  %v434_v0 = vlaneseq  ;;  %v400_v5 = vld [vmem:[%s3273_s11] sm:$0xff]  ;;  %v401_v6 = vld [vmem:[%s3273_s11 + $0x8] sm:$0xff]  ;;  %s5579_s7 = scalar_lea.vmem [#allocation10], %s3269_s30  ;;  %s2701_s29 = sshll.u32 %s3071_s25, 7 }
  0x9b   : > { %v432_v7 = vld [vmem:[%s5872_s4] sm:$0x3]  ;;  %v477_v12 = vld [vmem:[%s3292_s17 + $0x8] sm:$0xff]  ;;  %v402_v21 = vld [vmem:[%s3273_s11 + $0x10] sm:$0xff]  ;;  %s5797_s23 = scalar_lea.hbm %s5873_s5, %s2701_s29  ;;  %s2493_s10 = sshll.u32 %s5579_s7, 4  ;;  %s5800_s10 = int_to_ptr.vmem [resolvable:$true] %s2493_s10 }
  0x9c   : > { %v435_v1 = vshrl.u32 %v434_v0, 7  ;;  %v669_v2 = vand.u32 127, %v434_v0  ;;  %v476_v11 = vld [vmem:[%s3292_s17] sm:$0xff]  ;;  %v405_v14 = vld [vmem:[%s3273_s11 + $0x28] sm:$0xff]  ;;  %v403_v22 = vld [vmem:[%s3273_s11 + $0x18] sm:$0xff]  ;;  %s2476_s12 = scalar_lea.sflag [#allocation4], %s3266_s28 }
  0x9d   : > { %v404_v13 = vld [vmem:[%s3273_s11 + $0x20] sm:$0xff]  ;;  %v481_v16 = vld [vmem:[%s3292_s17 + $0x28] sm:$0xff]  ;;  %v478_v23 = vld [vmem:[%s3292_s17 + $0x10] sm:$0xff]  ;;  %s2897_s27 = scalar_lea.vmem %s5800_s10, 4096  ;;  %p6415_p10 = scmp.ne.s32.totalorder %s6087_s8, 0 }
  0x9e   : > { %v436_v3 = vsub.s32 0, %v435_v1  ;;  %v440_v4 = vsub.s32 1, %v435_v1  ;;  %v670_v8 = vadd.s32 128, %v669_v2  ;;  %v480_v15 = vld [vmem:[%s3292_s17 + $0x20] sm:$0xff]  ;;  %v3320_v24 = vsub.s32 255, %v669_v2  ;;  %v479_v28 = vld [vmem:[%s3292_s17 + $0x18] sm:$0xff]  ;;  %p2898_p13 = scmp.ne.s32.totalorder %s5800_s10, %s2897_s27 }
  0x9f   : > { %v406_v29 = vld [vmem:[%s3273_s11 + $0x30] sm:$0xff]  ;;  %v407_v30 = vld [vmem:[%s3273_s11 + $0x38] sm:$0xff]  ;;  %v408_v41 = vld [vmem:[%s3273_s11 + $0x40] sm:$0xff]  ;;  %s3010_s16 = smov [#allocation10]  }
  0xa0   : > { %v3303_v9 = vrot.slane %v432_v7, %v436_v3  ;;  %v3305_v10 = vrot.slane %v432_v7, %v440_v4  ;;  %v3322_v25 = vsub.s32 255, %v670_v8  ;;  %v482_v35 = vld [vmem:[%s3292_s17 + $0x30] sm:$0xff]  ;;  %v483_v36 = vld [vmem:[%s3292_s17 + $0x38] sm:$0xff]  ;;  %v409_v46 = vld [vmem:[%s3273_s11 + $0x48] sm:$0xff]  ;;  %p2899_p0 = pnand %p2898_p13, %p6415_p10  ;;  %s2901_s30 = sshll.u32 %s3010_s16, 4  ;;  %s2902_s30 = int_to_ptr.vmem [resolvable:$false] %s2901_s30 }
  0xa1   : > { %v484_v7 = vld [vmem:[%s3292_s17 + $0x40] sm:$0xff]  ;;  %s2903_s9 = scalar_lea.vmem %s2902_s30, 8192  ;;  %p2904_p6 = scmp.lt.s32.totalorder %s5800_s10, %s2902_s30 }
  0xa2   : > { %v444_v17 = vsub.f32 %v400_v5, %v3303_v9  ;;  %v445_v18 = vsub.f32 %v401_v6, %v3305_v10  ;;  %v448_v19 = vsub.f32 %v404_v13, %v3303_v9  ;;  %v449_v20 = vsub.f32 %v405_v14, %v3305_v10  ;;  %v485_v14 = vld [vmem:[%s3292_s17 + $0x48] sm:$0xff]  ;;  %p2900_p2 = pneg %p2899_p0  ;;  %p2905_p9 = scmp.lt.s32.totalorder %s2903_s9, %s2897_s27 }
  0xa3   : > { %v446_v26 = vsub.f32 %v402_v21, %v3303_v9  ;;  %v447_v27 = vsub.f32 %v403_v22, %v3305_v10  ;;  %v450_v39 = vsub.f32 %v406_v29, %v3303_v9  ;;  %v451_v40 = vsub.f32 %v407_v30, %v3305_v10  ;;  %v410_v30 = vld [vmem:[%s3273_s11 + $0x50] sm:$0xff] }
  0xa4   : > { %v508_v31 = vadd.f32 %v476_v11, %v444_v17  ;;  %v509_v32 = vadd.f32 %v477_v12, %v445_v18  ;;  %v512_v33 = vadd.f32 %v480_v15, %v448_v19  ;;  %v513_v34 = vadd.f32 %v481_v16, %v449_v20  ;;  %p2906_p12 = por %p2905_p9, %p2904_p6 }
  0xa5   : > { %v510_v37 = vadd.f32 %v478_v23, %v446_v26  ;;  %v511_v38 = vadd.f32 %v479_v28, %v447_v27  ;;  %v514_v49 = vadd.f32 %v482_v35, %v450_v39  ;;  %v515_v50 = vadd.f32 %v483_v36, %v451_v40  ;;  %v486_v40 = vld [vmem:[%s3292_s17 + $0x50] sm:$0xff] }
  0xa6   : > { %v572_v42 = vshra.s32 %v508_v31, 31  ;;  %v573_v43 = vshra.s32 %v509_v32, 31  ;;  %v576_v44 = vshra.s32 %v512_v33, 31  ;;  %v577_v45 = vshra.s32 %v513_v34, 31  ;;  %p2907_p3 = pnand %p2906_p12, %p2900_p2 }
  0xa7   : > { %v574_v47 = vshra.s32 %v510_v37, 31  ;;  %v575_v48 = vshra.s32 %v511_v38, 31  ;;  %v452_v54 = vsub.f32 %v408_v41, %v3303_v9  ;;  %v453_v58 = vsub.f32 %v409_v46, %v3305_v10  ;;  %v487_v41 = vld [vmem:[%s3292_s17 + $0x58] sm:$0xff]  ;;  %v412_v46 = vld [vmem:[%s3273_s11 + $0x60] sm:$0xff] }
  0xa8   : > { %v604_v51 = vand.u32 2147483647, %v572_v42  ;;  %v605_v52 = vand.u32 2147483647, %v573_v43  ;;  %v608_v53 = vand.u32 2147483647, %v576_v44  ;;  %v454_v44 = vsub.f32 %v410_v30, %v3303_v9 }
  0xa9   : > { %v609_v55 = vand.u32 2147483647, %v577_v45  ;;  %v606_v56 = vand.u32 2147483647, %v574_v47  ;;  %v607_v57 = vand.u32 2147483647, %v575_v48  ;;  %v516_v26 = vadd.f32 %v484_v7, %v452_v54 }
  0xaa   : > { %v636_v59 = vxor.u32 %v604_v51, %v508_v31  ;;  %v637_v60 = vxor.u32 %v605_v52, %v509_v32  ;;  %v640_v61 = vxor.u32 %v608_v53, %v512_v33  ;;  %v578_v62 = vshra.s32 %v514_v49, 31  ;;  %v411_v31 = vld [vmem:[%s3273_s11 + $0x58] sm:$0xff]  ;;  %v413_v47 = vld [vmem:[%s3273_s11 + $0x68] sm:$0xff]  ;;  %v414_v51 = vld [vmem:[%s3273_s11 + $0x70] sm:$0xff] }
  0xab   : > { %v641_v63 = vxor.u32 %v609_v55, %v513_v34  ;;  %v638_v0 = vxor.u32 %v606_v56, %v510_v37  ;;  %v639_v1 = vxor.u32 %v607_v57, %v511_v38  ;;  %v579_v2 = vshra.s32 %v515_v50, 31  ;;  %v488_v56 = vld [vmem:[%s3292_s17 + $0x60] sm:$0xff]  ;;  %v489_v57 = vld [vmem:[%s3292_s17 + $0x68] sm:$0xff] }
  0xac   : > { %v673_v3 = vand.u32 4294967040, %v636_v59  ;;  %v674_v4 = vand.u32 4294967040, %v637_v60  ;;  %v677_v5 = vand.u32 4294967040, %v640_v61  ;;  %v610_v6 = vand.u32 2147483647, %v578_v62  ;;  %v415_v62 = vld [vmem:[%s3273_s11 + $0x78] sm:$0xff] }
  0xad   : > { %v678_v8 = vand.u32 4294967040, %v641_v63  ;;  %v675_v11 = vand.u32 4294967040, %v638_v0  ;;  %v676_v12 = vand.u32 4294967040, %v639_v1  ;;  %v611_v13 = vand.u32 2147483647, %v579_v2 }
  0xae   : > { %v3340_v15 = vor.u32 %v673_v3, %v3320_v24  ;;  %v3343_v16 = vor.u32 %v674_v4, %v3322_v25  ;;  %v3346_v17 = vor.u32 %v677_v5, %v3320_v24  ;;  %v642_v18 = vxor.u32 %v610_v6, %v514_v49  ;;  %v490_v3 = vld [vmem:[%s3292_s17 + $0x70] sm:$0xff] }
  0xaf   : > { %v3349_v19 = vor.u32 %v678_v8, %v3322_v25  ;;  %v3352_v20 = vor.u32 %v675_v11, %v3320_v24  ;;  %v3355_v21 = vor.u32 %v676_v12, %v3322_v25  ;;  %v643_v22 = vxor.u32 %v611_v13, %v515_v50  ;;  %v491_v8 = vld [vmem:[%s3292_s17 + $0x78] sm:$0xff] }
  0xb0   : > { %vm737_vm0 = vcmp.gt.s32.totalorder %v3340_v15, %v3343_v16  ;;  %v679_v23 = vand.u32 4294967040, %v642_v18  ;;  %v517_v27 = vadd.f32 %v485_v14, %v453_v58  ;;  %v580_v39 = vshra.s32 %v516_v26, 31  ;;  %v416_v18 = vld [vmem:[%s3273_s11 + $0x80] sm:$0xff] }
  0xb1   : > { %v3361_v28 = vsel %vm737_vm0, %v3340_v15, %v3343_v16  ;;  %vm769_vm1 = vcmp.gt.s32.totalorder %v3346_v17, %v3349_v19  ;;  %vm753_vm2 = vcmp.gt.s32.totalorder %v3352_v20, %v3355_v21  ;;  %v680_v29 = vand.u32 4294967040, %v643_v22 }
  0xb2   : > { %v740_v32 = vshra.s32 %v3361_v28, 16  ;;  %v3372_v33 = vsel %vm769_vm1, %v3346_v17, %v3349_v19  ;;  %v3376_v34 = vsel %vm753_vm2, %v3352_v20, %v3355_v21  ;;  %v3379_v35 = vor.u32 %v679_v23, %v3320_v24 }
  0xb3   : > { %v772_v36 = vshra.s32 %v3372_v33, 16  ;;  %v756_v37 = vshra.s32 %v3376_v34, 16  ;;  %v3384_v38 = vor.u32 %v680_v29, %v3322_v25  ;;  %v581_v43 = vshra.s32 %v517_v27, 31 }
  0xb4   : > { %v3388_v42 = vcvt.s32.f32 %v740_v32  ;;  %v455_v45 = vsub.f32 %v411_v31, %v3305_v10  ;;  %v612_v50 = vand.u32 2147483647, %v580_v39  ;;  %v518_v54 = vadd.f32 %v486_v40, %v454_v44 }
  0xb5   : > { %v3394_v48 = vcvt.s32.f32 %v772_v36  ;;  %v3396_v49 = vcvt.s32.f32 %v756_v37  ;;  %vm785_vm3 = vcmp.gt.s32.totalorder %v3379_v35, %v3384_v38  ;;  %v613_v53 = vand.u32 2147483647, %v581_v43 }
  0xb6   : > { %743 = vmax.xlane.f32.xlu0 %v3388_v42  ;;  %v3404_v52 = vsel %vm785_vm3, %v3379_v35, %v3384_v38  ;;  %v519_v55 = vadd.f32 %v487_v41, %v455_v45  ;;  %v644_v59 = vxor.u32 %v612_v50, %v516_v26  ;;  %v456_v60 = vsub.f32 %v412_v46, %v3303_v9  ;;  %v417_v45 = vld [vmem:[%s3273_s11 + $0x88] sm:$0xff] }
  0xb7   : > { %775 = vmax.xlane.f32.xlu1 %v3394_v48  ;;  %v788_v58 = vshra.s32 %v3404_v52, 16  ;;  %v457_v61 = vsub.f32 %v413_v47, %v3305_v10  ;;  %v645_v63 = vxor.u32 %v613_v53, %v517_v27  ;;  %v582_v0 = vshra.s32 %v518_v54, 31  ;;  %v492_v53 = vld [vmem:[%s3292_s17 + $0x80] sm:$0xff] }
  0xb8   : > { %v583_v1 = vshra.s32 %v519_v55, 31  ;;  %v458_v2 = vsub.f32 %v414_v51, %v3303_v9  ;;  %v681_v5 = vand.u32 4294967040, %v644_v59  ;;  %v520_v6 = vadd.f32 %v488_v56, %v456_v60 }
  0xb9   : > { %v3415_v4 = vcvt.s32.f32 %v788_v58  ;;  %v521_v7 = vadd.f32 %v489_v57, %v457_v61  ;;  %v682_v11 = vand.u32 4294967040, %v645_v63  ;;  %v614_v12 = vand.u32 2147483647, %v582_v0 }
  0xba   : > { %759 = vmax.xlane.f32.xlu0 %v3396_v49  ;;  %v615_v13 = vand.u32 2147483647, %v583_v1  ;;  %v459_v14 = vsub.f32 %v415_v62, %v3305_v10  ;;  %v3423_v22 = vor.u32 %v681_v5, %v3320_v24  ;;  %v584_v23 = vshra.s32 %v520_v6, 31  ;;  %v493_v62 = vld [vmem:[%s3292_s17 + $0x88] sm:$0xff] }
  0xbb   : > { %791 = vmax.xlane.f32.xlu1 %v3415_v4  ;;  %v585_v26 = vshra.s32 %v521_v7, 31  ;;  %v522_v27 = vadd.f32 %v490_v3, %v458_v2  ;;  %v3426_v29 = vor.u32 %v682_v11, %v3322_v25  ;;  %v646_v30 = vxor.u32 %v614_v12, %v518_v54  ;;  %v418_v2 = vld [vmem:[%s3273_s11 + $0x90] sm:$0xff]  ;;  %v419_v3 = vld [vmem:[%s3273_s11 + $0x98] sm:$0xff] }
  0xbc   : > { %v647_v31 = vxor.u32 %v615_v13, %v519_v55  ;;  %v523_v32 = vadd.f32 %v491_v8, %v459_v14  ;;  %v616_v36 = vand.u32 2147483647, %v584_v23  ;;  %v460_v40 = vsub.f32 %v416_v18, %v3303_v9  ;;  %v494_v18 = vld [vmem:[%s3292_s17 + $0x90] sm:$0xff]  ;;  %v495_v23 = vld [vmem:[%s3292_s17 + $0x98] sm:$0xff] }
  0xbd   : > { %v617_v37 = vand.u32 2147483647, %v585_v26  ;;  %v586_v39 = vshra.s32 %v522_v27, 31  ;;  %vm801_vm4 = vcmp.gt.s32.totalorder %v3423_v22, %v3426_v29  ;;  %v683_v41 = vand.u32 4294967040, %v646_v30 }
  0xbe   : > { %v684_v43 = vand.u32 4294967040, %v647_v31  ;;  %v587_v44 = vshra.s32 %v523_v32, 31  ;;  %v3434_v46 = vsel %vm801_vm4, %v3423_v22, %v3426_v29  ;;  %v648_v47 = vxor.u32 %v616_v36, %v520_v6  ;;  %v420_v31 = vld [vmem:[%s3273_s11 + $0xa0] sm:$0xff] }
  0xbf   : > { %v649_v50 = vxor.u32 %v617_v37, %v521_v7  ;;  %v618_v51 = vand.u32 2147483647, %v586_v39  ;;  %v804_v54 = vshra.s32 %v3434_v46, 16  ;;  %v3439_v55 = vor.u32 %v683_v41, %v3320_v24 }
  0xc0   : > { %v3442_v56 = vor.u32 %v684_v43, %v3322_v25  ;;  %v619_v57 = vand.u32 2147483647, %v587_v44  ;;  %v685_v58 = vand.u32 4294967040, %v648_v47  ;;  %v461_v61 = vsub.f32 %v417_v45, %v3305_v10  ;;  %v496_v47 = vld [vmem:[%s3292_s17 + $0xa0] sm:$0xff] }
  0xc1   : > { %6101 = vst [vmem:[#allocation22_spill] sm:$0xff] %v3439_v55  ;;  %v686_v59 = vand.u32 4294967040, %v649_v50  ;;  %v650_v60 = vxor.u32 %v618_v51, %v522_v27  ;;  %v3446_v63 = vcvt.s32.f32 %v804_v54  ;;  %v524_v1 = vadd.f32 %v492_v53, %v460_v40  ;;  %v497_v54 = vld [vmem:[%s3292_s17 + $0xa8] sm:$0xff] }
  0xc2   : > { %vm817_vm5 = vcmp.gt.s32.totalorder %v3439_v55, %v3442_v56  ;;  %v651_v0 = vxor.u32 %v619_v57, %v523_v32  ;;  %v3457_v6 = vor.u32 %v685_v58, %v3320_v24  ;;  %v525_v13 = vadd.f32 %v493_v62, %v461_v61  ;;  %v421_v32 = vld [vmem:[%s3273_s11 + $0xa8] sm:$0xff]  ;;  %v422_v57 = vld [vmem:[%s3273_s11 + $0xb0] sm:$0xff] }
  0xc3   : > { %v3454_v5 = vsel %vm817_vm5, %v3439_v55, %v3442_v56  ;;  %v3460_v7 = vor.u32 %v686_v59, %v3322_v25  ;;  %v687_v8 = vand.u32 4294967040, %v650_v60  ;;  %807 = vmax.xlane.f32.xlu0 %v3446_v63  ;;  %v588_v14 = vshra.s32 %v524_v1, 31 }
  0xc4   : > { %6102 = vst [vmem:[#allocation23_spill] sm:$0xff] %v3457_v6  ;;  %v820_v11 = vshra.s32 %v3454_v5, 16  ;;  %v688_v12 = vand.u32 4294967040, %v651_v0  ;;  %v462_v27 = vsub.f32 %v418_v2, %v3303_v9  ;;  %v463_v30 = vsub.f32 %v419_v3, %v3305_v10 }
  0xc5   : > { %6103 = vst [vmem:[#allocation24_spill] sm:$0xff] %v3460_v7  ;;  %vm833_vm6 = vcmp.gt.s32.totalorder %v3457_v6, %v3460_v7  ;;  %v3469_v26 = vor.u32 %v687_v8, %v3320_v24  ;;  %v589_v40 = vshra.s32 %v525_v13, 31  ;;  %v620_v43 = vand.u32 2147483647, %v588_v14  ;;  %v423_v8 = vld [vmem:[%s3273_s11 + $0xb8] sm:$0xff] }
  0xc6   : > { %v3475_v36 = vcvt.s32.f32 %v820_v11  ;;  %v3479_v37 = vsel %vm833_vm6, %v3457_v6, %v3460_v7  ;;  %v3482_v39 = vor.u32 %v688_v12, %v3322_v25  ;;  %v526_v44 = vadd.f32 %v494_v18, %v462_v27  ;;  %v507_v6 = vld [vmem:[%s3292_s17 + $0xf8] sm:$0xff] }
  0xc7   : > { %6104 = vst [vmem:[#allocation25_spill] sm:$0xff] %v3469_v26  ;;  %v836_v41 = vshra.s32 %v3479_v37, 16  ;;  %v527_v45 = vadd.f32 %v495_v23, %v463_v30  ;;  %v621_v50 = vand.u32 2147483647, %v589_v40  ;;  %v464_v51 = vsub.f32 %v420_v31, %v3303_v9  ;;  %v498_v23 = vld [vmem:[%s3292_s17 + $0xb0] sm:$0xff]  ;;  %v424_v40 = vld [vmem:[%s3273_s11 + $0xc0] sm:$0xff] }
  0xc8   : > { %6105 = vst [vmem:[#allocation26_spill] sm:$0xff] %v3482_v39  ;;  %823 = vmax.xlane.f32.xlu1 %v3475_v36  ;;  %vm849_vm7 = vcmp.gt.s32.totalorder %v3469_v26, %v3482_v39  ;;  %v465_v53 = vsub.f32 %v421_v32, %v3305_v10  ;;  %v652_v60 = vxor.u32 %v620_v43, %v524_v1  ;;  %v590_v61 = vshra.s32 %v526_v44, 31  ;;  %v499_v32 = vld [vmem:[%s3292_s17 + $0xb8] sm:$0xff] }
  0xc9   : > { %v3493_v58 = vcvt.s32.f32 %v836_v41  ;;  %v3497_v59 = vsel %vm849_vm7, %v3469_v26, %v3482_v39  ;;  %v653_v0 = vxor.u32 %v621_v50, %v525_v13  ;;  %v591_v2 = vshra.s32 %v527_v45, 31  ;;  %v431_v39 = vld [vmem:[%s3273_s11 + $0xf8] sm:$0xff]  ;;  %v506_v26 = vld [vmem:[%s3292_s17 + $0xf0] sm:$0xff] }
  0xca   : > { %v852_v62 = vshra.s32 %v3497_v59, 16  ;;  %v528_v3 = vadd.f32 %v496_v47, %v464_v51  ;;  %v689_v11 = vand.u32 4294967040, %v652_v60  ;;  %v622_v12 = vand.u32 2147483647, %v590_v61 }
  0xcb   : > { %839 = vmax.xlane.f32.xlu0 %v3493_v58  ;;  %v529_v14 = vadd.f32 %v497_v54, %v465_v53  ;;  %v466_v18 = vsub.f32 %v422_v57, %v3303_v9  ;;  %v690_v1 = vand.u32 4294967040, %v653_v0  ;;  %v623_v30 = vand.u32 2147483647, %v591_v2 }
  0xcc   : > { %v3504_v27 = vcvt.s32.f32 %v852_v62  ;;  %v592_v31 = vshra.s32 %v528_v3, 31  ;;  %v3509_v13 = vor.u32 %v689_v11, %v3320_v24  ;;  %v654_v41 = vxor.u32 %v622_v12, %v526_v44  ;;  %v500_v11 = vld [vmem:[%s3292_s17 + $0xc0] sm:$0xff] }
  0xcd   : > { %v593_v43 = vshra.s32 %v529_v14, 31  ;;  %v467_v47 = vsub.f32 %v423_v8, %v3305_v10  ;;  %v3514_v50 = vor.u32 %v690_v1, %v3322_v25  ;;  %v655_v51 = vxor.u32 %v623_v30, %v527_v45  ;;  %v425_v8 = vld [vmem:[%s3273_s11 + $0xc8] sm:$0xff] }
  0xce   : > { %6106 = vst [vmem:[#allocation27_spill] sm:$0xff] %v3509_v13  ;;  %855 = vmax.xlane.f32.xlu1 %v3504_v27  ;;  %v624_v53 = vand.u32 2147483647, %v592_v31  ;;  %v530_v54 = vadd.f32 %v498_v23, %v466_v18  ;;  %v691_v57 = vand.u32 4294967040, %v654_v41  ;;  %v468_v62 = vsub.f32 %v424_v40, %v3303_v9 }
  0xcf   : > { %6107 = vst [vmem:[#allocation28_spill] sm:$0xff] %v3514_v50  ;;  %v625_v60 = vand.u32 2147483647, %v593_v43  ;;  %v531_v61 = vadd.f32 %v499_v32, %v467_v47  ;;  %vm865_vm8 = vcmp.gt.s32.totalorder %v3509_v13, %v3514_v50  ;;  %v692_v44 = vand.u32 4294967040, %v655_v51  ;;  %v501_v32 = vld [vmem:[%s3292_s17 + $0xc8] sm:$0xff]  ;;  %v426_v51 = vld [vmem:[%s3273_s11 + $0xd0] sm:$0xff] }
  0xd0   : > { %v656_v0 = vxor.u32 %v624_v53, %v528_v3  ;;  %v594_v2 = vshra.s32 %v530_v54, 31  ;;  %v3523_v45 = vsel %vm865_vm8, %v3509_v13, %v3514_v50  ;;  %v3526_v12 = vor.u32 %v691_v57, %v3320_v24  ;;  %v504_v50 = vld [vmem:[%s3292_s17 + $0xe0] sm:$0xff] }
  0xd1   : > { %v657_v18 = vxor.u32 %v625_v60, %v529_v14  ;;  %v595_v23 = vshra.s32 %v531_v61, 31  ;;  %v868_v1 = vshra.s32 %v3523_v45, 16  ;;  %v3530_v30 = vor.u32 %v692_v44, %v3322_v25  ;;  %v427_v60 = vld [vmem:[%s3273_s11 + $0xd8] sm:$0xff] }
  0xd2   : > { %6108 = vst [vmem:[#allocation29_spill] sm:$0xff] %v3526_v12  ;;  %v693_v3 = vand.u32 4294967040, %v656_v0  ;;  %v626_v31 = vand.u32 2147483647, %v594_v2  ;;  %v469_v43 = vsub.f32 %v425_v8, %v3305_v10  ;;  %v532_v47 = vadd.f32 %v500_v11, %v468_v62 }
  0xd3   : > { %6109 = vst [vmem:[#allocation30_spill] sm:$0xff] %v3530_v30  ;;  %v694_v40 = vand.u32 4294967040, %v657_v18  ;;  %v627_v41 = vand.u32 2147483647, %v595_v23  ;;  %v3535_v53 = vcvt.s32.f32 %v868_v1  ;;  %vm881_vm9 = vcmp.gt.s32.totalorder %v3526_v12, %v3530_v30  ;;  %v502_v23 = vld [vmem:[%s3292_s17 + $0xd0] sm:$0xff] }
  0xd4   : > { %v3540_v14 = vor.u32 %v693_v3, %v3320_v24  ;;  %v658_v57 = vxor.u32 %v626_v31, %v530_v54  ;;  %v3545_v44 = vsel %vm881_vm9, %v3526_v12, %v3530_v30  ;;  %v533_v2 = vadd.f32 %v501_v32, %v469_v43  ;;  %v429_v32 = vld [vmem:[%s3273_s11 + $0xe8] sm:$0xff] }
  0xd5   : > { %v3548_v62 = vor.u32 %v694_v40, %v3322_v25  ;;  %v659_v0 = vxor.u32 %v627_v41, %v531_v61  ;;  %871 = vmax.xlane.f32.xlu0 %v3535_v53  ;;  %v884_v8 = vshra.s32 %v3545_v44, 16  ;;  %v596_v18 = vshra.s32 %v532_v47, 31  ;;  %v503_v40 = vld [vmem:[%s3292_s17 + $0xd8] sm:$0xff]  ;;  %v428_v61 = vld [vmem:[%s3273_s11 + $0xe0] sm:$0xff] }
  0xd6   : > { %6110 = vst [vmem:[#allocation31_spill] sm:$0xff] %v3540_v14  ;;  %v695_v11 = vand.u32 4294967040, %v658_v57  ;;  %v470_v54 = vsub.f32 %v426_v51, %v3303_v9  ;;  %v597_v3 = vshra.s32 %v533_v2, 31  ;;  %v471_v31 = vsub.f32 %v427_v60, %v3305_v10 }
  0xd7   : > { %6111 = vst [vmem:[#allocation32_spill] sm:$0xff] %v3548_v62  ;;  %vm897_vm10 = vcmp.gt.s32.totalorder %v3540_v14, %v3548_v62  ;;  %v696_v1 = vand.u32 4294967040, %v659_v0  ;;  %v3560_v41 = vcvt.s32.f32 %v884_v8  ;;  %v628_v57 = vand.u32 2147483647, %v596_v18 }
  0xd8   : > { %v3564_v43 = vsel %vm897_vm10, %v3540_v14, %v3548_v62  ;;  %v3567_v51 = vor.u32 %v695_v11, %v3320_v24  ;;  %v629_v60 = vand.u32 2147483647, %v597_v3  ;;  %v534_v12 = vadd.f32 %v502_v23, %v470_v54  ;;  %v505_v11 = vld [vmem:[%s3292_s17 + $0xe8] sm:$0xff]  ;;  %v430_v54 = vld [vmem:[%s3273_s11 + $0xf0] sm:$0xff] }
  0xd9   : > { %v900_v0 = vshra.s32 %v3564_v43, 16  ;;  %v3571_v30 = vor.u32 %v696_v1, %v3322_v25  ;;  %887 = vmax.xlane.f32.xlu1 %v3560_v41  ;;  %v660_v8 = vxor.u32 %v628_v57, %v532_v47  ;;  %v535_v13 = vadd.f32 %v503_v40, %v471_v31 }
  0xda   : > { %6112 = vst [vmem:[#allocation33_spill] sm:$0xff] %v3567_v51  ;;  %v472_v62 = vsub.f32 %v428_v61, %v3303_v9  ;;  %v473_v14 = vsub.f32 %v429_v32, %v3305_v10  ;;  %v661_v1 = vxor.u32 %v629_v60, %v533_v2  ;;  %v598_v3 = vshra.s32 %v534_v12, 31 }
  0xdb   : > { %6113 = vst [vmem:[#allocation34_spill] sm:$0xff] %v3571_v30  ;;  %v3578_v18 = vcvt.s32.f32 %v900_v0  ;;  %vm913_vm11 = vcmp.gt.s32.totalorder %v3567_v51, %v3571_v30  ;;  %v697_v47 = vand.u32 4294967040, %v660_v8  ;;  %v599_v31 = vshra.s32 %v535_v13, 31 }
  0xdc   : > { %v3585_v23 = vsel %vm913_vm11, %v3567_v51, %v3571_v30  ;;  %v536_v40 = vadd.f32 %v504_v50, %v472_v62  ;;  %v698_v32 = vand.u32 4294967040, %v661_v1  ;;  %v630_v57 = vand.u32 2147483647, %v598_v3 }
  0xdd   : > { %903 = vmax.xlane.f32.xlu0 %v3578_v18  ;;  %v916_v61 = vshra.s32 %v3585_v23, 16  ;;  %v537_v0 = vadd.f32 %v505_v11, %v473_v14  ;;  %v3592_v2 = vor.u32 %v697_v47, %v3320_v24  ;;  %v631_v60 = vand.u32 2147483647, %v599_v31 }
  0xde   : > { %v600_v7 = vshra.s32 %v536_v40, 31  ;;  %v474_v30 = vsub.f32 %v430_v54, %v3303_v9  ;;  %v3598_v50 = vor.u32 %v698_v32, %v3322_v25  ;;  %v662_v62 = vxor.u32 %v630_v57, %v534_v12 }
  0xdf   : > { %6114 = vst [vmem:[#allocation35_spill] sm:$0xff] %v3592_v2  ;;  %v3595_v8 = vcvt.s32.f32 %v916_v61  ;;  %v601_v51 = vshra.s32 %v537_v0, 31  ;;  %v663_v1 = vxor.u32 %v631_v60, %v535_v13  ;;  %v475_v14 = vsub.f32 %v431_v39, %v3305_v10 }
  0xe0   : > { %v632_v3 = vand.u32 2147483647, %v600_v7  ;;  %v538_v11 = vadd.f32 %v506_v26, %v474_v30  ;;  %vm929_vm12 = vcmp.gt.s32.totalorder %v3592_v2, %v3598_v50  ;;  %v699_v47 = vand.u32 4294967040, %v662_v62 }
  0xe1   : > { %919 = vmax.xlane.f32.xlu1 %v3595_v8  ;;  %v633_v9 = vand.u32 2147483647, %v601_v51  ;;  %v3607_v54 = vsel %vm929_vm12, %v3592_v2, %v3598_v50  ;;  %v700_v31 = vand.u32 4294967040, %v663_v1  ;;  %v539_v61 = vadd.f32 %v507_v6, %v475_v14 }
  0xe2   : > { %v664_v12 = vxor.u32 %v632_v3, %v536_v40  ;;  %v932_v13 = vshra.s32 %v3607_v54, 16  ;;  %v3611_v7 = vor.u32 %v699_v47, %v3320_v24  ;;  %v602_v26 = vshra.s32 %v538_v11, 31 }
  0xe3   : > { %v665_v10 = vxor.u32 %v633_v9, %v537_v0  ;;  %v3614_v39 = vor.u32 %v700_v31, %v3322_v25  ;;  %v603_v32 = vshra.s32 %v539_v61, 31 }
  0xe4   : > { %6115 = vst [vmem:[#allocation36_spill] sm:$0xff] %v3611_v7  ;;  %v701_v30 = vand.u32 4294967040, %v664_v12  ;;  %v3616_v51 = vcvt.s32.f32 %v932_v13  ;;  %v634_v60 = vand.u32 2147483647, %v602_v26 }
  0xe5   : > { %6116 = vst [vmem:[#allocation37_spill] sm:$0xff] %v3614_v39  ;;  %v702_v57 = vand.u32 4294967040, %v665_v10  ;;  %vm945_vm13 = vcmp.gt.s32.totalorder %v3611_v7, %v3614_v39  ;;  %v635_v40 = vand.u32 2147483647, %v603_v32  ;;  %v771_v32 = vand.u32 65535, %v3372_v33 }
  0xe6   : > { %v3621_v6 = vor.u32 %v701_v30, %v3320_v24  ;;  %935 = vmax.xlane.f32.xlu0 %v3616_v51  ;;  %v3626_v0 = vsel %vm945_vm13, %v3611_v7, %v3614_v39  ;;  %v666_v1 = vxor.u32 %v634_v60, %v538_v11  ;;  %v755_v60 = vand.u32 65535, %v3376_v34 }
  0xe7   : > { %v3629_v62 = vor.u32 %v702_v57, %v3322_v25  ;;  %v948_v3 = vshra.s32 %v3626_v0, 16  ;;  %v667_v14 = vxor.u32 %v635_v40, %v539_v61 }
  0xe8   : > { %6117 = vst [vmem:[#allocation38_spill] sm:$0xff] %v3621_v6  ;;  %v703_v47 = vand.u32 4294967040, %v666_v1  ;;  %v773_v1 = vcvt.s32.f32 %v771_v32 }
  0xe9   : > { %6118 = vst [vmem:[#allocation39_spill] sm:$0xff] %v3629_v62  ;;  %vm961_vm14 = vcmp.gt.s32.totalorder %v3621_v6, %v3629_v62  ;;  %v3634_v9 = vcvt.s32.f32 %v948_v3  ;;  %v704_v12 = vand.u32 4294967040, %v667_v14  ;;  %v787_v3 = vand.u32 65535, %v3404_v52 }
  0xea   : > { %v3638_v31 = vsel %vm961_vm14, %v3621_v6, %v3629_v62  ;;  %v3642_v10 = vor.u32 %v703_v47, %v3320_v24 }
  0xeb   : > { %v964_v13 = vshra.s32 %v3638_v31, 16  ;;  %951 = vmax.xlane.f32.xlu1 %v3634_v9  ;;  %v3646_v11 = vor.u32 %v704_v12, %v3322_v25  ;;  %v739_v25 = vand.u32 65535, %v3361_v28  ;;  %v757_v12 = vcvt.s32.f32 %v755_v60 }
  0xec   : > { %6119 = vst [vmem:[#allocation40_spill] sm:$0xff] %v3642_v10  ;;  %v789_v34 = vcvt.s32.f32 %v787_v3 }
  0xed   : > { %6120 = vst [vmem:[#allocation41_spill] sm:$0xff] %v3646_v11  ;;  %v3648_v61 = vcvt.s32.f32 %v964_v13  ;;  %vm977_vm15 = vcmp.gt.s32.totalorder %v3642_v10, %v3646_v11  ;;  %v741_v57 = vcvt.s32.f32 %v739_v25  ;;  %v819_v25 = vand.u32 65535, %v3454_v5 }
  0xee   : > { %v3655_v26 = vsel %vm977_vm15, %v3642_v10, %v3646_v11 }
  0xef   : > { %967 = vmax.xlane.f32.xlu0 %v3648_v61  ;;  %v980_v30 = vshra.s32 %v3655_v26, 16  ;;  %v821_v60 = vcvt.s32.f32 %v819_v25 }
  0xf1   : > { %v3658_v24 = vcvt.s32.f32 %v980_v30  ;;  %v803_v30 = vand.u32 65535, %v3434_v46 }
  0xf3   : > { %983 = vmax.xlane.f32.xlu1 %v3658_v24 }
 0x13f   : > { %v3664_v40 = vpop.xlane.xlu0 %743 }
 0x140   : > { %vm745_vm0 = vcmp.eq.f32.partialorder %v3388_v42, %v3664_v40  ;;  %v3669_v14 = vpop.xlane.xlu1 %775 }
 0x141   : > { %v746_v47 = vsel %vm745_vm0, %v741_v57, -inf  ;;  %vm777_vm1 = vcmp.eq.f32.partialorder %v3394_v48, %v3669_v14  ;;  %v805_v48 = vcvt.s32.f32 %v803_v30 }
 0x142   : > { %747 = vmax.xlane.f32.xlu0 %v746_v47  ;;  %v778_v33 = vsel %vm777_vm1, %v773_v1, -inf  ;;  %v851_v1 = vand.u32 65535, %v3497_v59 }
 0x143   : > { %v3673_v28 = vpop.xlane.xlu0 %759 }
 0x144   : > { %vm761_vm2 = vcmp.eq.f32.partialorder %v3396_v49, %v3673_v28  ;;  %v3677_v13 = vpop.xlane.xlu1 %791  ;;  %v835_v49 = vand.u32 65535, %v3479_v37 }
 0x145   : > { %v762_v52 = vsel %vm761_vm2, %v757_v12, -inf  ;;  %vm793_vm3 = vcmp.eq.f32.partialorder %v3415_v4, %v3677_v13  ;;  %v867_v12 = vand.u32 65535, %v3523_v45  ;;  %v915_v45 = vand.u32 65535, %v3585_v23 }
 0x146   : > { %763 = vmax.xlane.f32.xlu1 %v762_v52  ;;  %779 = vmax.xlane.f32.xlu0 %v778_v33  ;;  %v794_v42 = vsel %vm793_vm3, %v789_v34, -inf  ;;  %v837_v46 = vcvt.s32.f32 %v835_v49  ;;  %v883_v33 = vand.u32 65535, %v3545_v44  ;;  %v931_v49 = vand.u32 65535, %v3607_v54 }
 0x148   : > { %v933_v23 = vcvt.s32.f32 %v931_v49 }
 0x14a   : > { %795 = vmax.xlane.f32.xlu1 %v794_v42  ;;  %v885_v42 = vcvt.s32.f32 %v883_v33 }
 0x14c   : > { %v3683_v32 = vpop.xlane.xlu0 %807 }
 0x14d   : > { %vm809_vm4 = vcmp.eq.f32.partialorder %v3446_v63, %v3683_v32  ;;  %v853_v63 = vcvt.s32.f32 %v851_v1  ;;  %v963_v1 = vand.u32 65535, %v3638_v31  ;;  %v814_v49 = vcvt.f32.s32 %v3683_v32 }
 0x14e   : > { %v810_v57 = vsel %vm809_vm4, %v805_v48, -inf }
 0x14f   : > { %811 = vmax.xlane.f32.xlu0 %v810_v57  ;;  %v947_v57 = vand.u32 65535, %v3626_v0 }
 0x151   : > { %v3688_v4 = vpop.xlane.xlu1 %823 }
 0x152   : > { %vm825_vm5 = vcmp.eq.f32.partialorder %v3475_v36, %v3688_v4  ;;  %v869_v36 = vcvt.s32.f32 %v867_v12  ;;  %v766_v12 = vcvt.f32.s32 %v3673_v28 }
 0x153   : > { %v826_v3 = vsel %vm825_vm5, %v821_v60, -inf }
 0x154   : > { %v3693_v5 = vpop.xlane.xlu0 %839  ;;  %827 = vmax.xlane.f32.xlu1 %v826_v3 }
 0x155   : > { %vm841_vm6 = vcmp.eq.f32.partialorder %v3493_v58, %v3693_v5  ;;  %v899_v58 = vand.u32 65535, %v3564_v43  ;;  %v917_v43 = vcvt.s32.f32 %v915_v45 }
 0x156   : > { %v842_v37 = vsel %vm841_vm6, %v837_v46, -inf  ;;  %v949_v46 = vcvt.s32.f32 %v947_v57 }
 0x157   : > { %843 = vmax.xlane.f32.xlu0 %v842_v37  ;;  %v3697_v47 = vpop.xlane.xlu1 %855 }
 0x158   : > { %vm857_vm7 = vcmp.eq.f32.partialorder %v3504_v27, %v3697_v47  ;;  %v901_v27 = vcvt.s32.f32 %v899_v58 }
 0x159   : > { %v858_v59 = vsel %vm857_vm7, %v853_v63, -inf  ;;  %v979_v63 = vand.u32 65535, %v3655_v26  ;;  %v782_v26 = vcvt.f32.s32 %v3669_v14 }
 0x15a   : > { %859 = vmax.xlane.f32.xlu1 %v858_v59 }
 0x15b   : > { %v981_v31 = vcvt.s32.f32 %v979_v63 }
 0x15e   : > { %v3703_v34 = vpop.xlane.xlu0 %871 }
 0x15f   : > { %vm873_vm8 = vcmp.eq.f32.partialorder %v3535_v53, %v3703_v34 }
 0x160   : > { %v874_v52 = vsel %vm873_vm8, %v869_v36, -inf }
 0x161   : > { %875 = vmax.xlane.f32.xlu0 %v874_v52  ;;  %v783_v52 = vshll.u32 %v782_v26, 16  ;;  %v815_v26 = vshll.u32 %v814_v49, 16 }
 0x162   : > { %v3708_v30 = vpop.xlane.xlu1 %887 }
 0x163   : > { %vm889_vm9 = vcmp.eq.f32.partialorder %v3560_v41, %v3708_v30 }
 0x164   : > { %v890_v48 = vsel %vm889_vm9, %v885_v42, -inf  ;;  %v767_v42 = vshll.u32 %v766_v12, 16  ;;  %v830_v12 = vcvt.f32.s32 %v3688_v4 }
 0x165   : > { %891 = vmax.xlane.f32.xlu1 %v890_v48 }
 0x166   : > { %v3713_v44 = vpop.xlane.xlu0 %903 }
 0x167   : > { %vm905_vm10 = vcmp.eq.f32.partialorder %v3578_v18, %v3713_v44 }
 0x168   : > { %v906_v53 = vsel %vm905_vm10, %v901_v27, -inf  ;;  %v798_v27 = vcvt.f32.s32 %v3677_v13 }
 0x169   : > { %907 = vmax.xlane.f32.xlu0 %v906_v53 }
 0x16a   : > { %v3717_v25 = vpop.xlane.xlu1 %919 }
 0x16b   : > { %vm921_vm11 = vcmp.eq.f32.partialorder %v3595_v8, %v3717_v25  ;;  %v965_v8 = vcvt.s32.f32 %v963_v1 }
 0x16c   : > { %v922_v41 = vsel %vm921_vm11, %v917_v43, -inf  ;;  %v799_v43 = vshll.u32 %v798_v27, 16 }
 0x16d   : > { %923 = vmax.xlane.f32.xlu1 %v922_v41 }
 0x16f   : > { %v3723_v60 = vpop.xlane.xlu0 %935 }
 0x170   : > { %vm937_vm12 = vcmp.eq.f32.partialorder %v3616_v51, %v3723_v60 }
 0x171   : > { %v938_v18 = vsel %vm937_vm12, %v933_v23, -inf }
 0x172   : > { %939 = vmax.xlane.f32.xlu0 %v938_v18 }
 0x174   : > { %v3728_v3 = vpop.xlane.xlu1 %951 }
 0x175   : > { %vm953_vm13 = vcmp.eq.f32.partialorder %v3634_v9, %v3728_v3  ;;  %v750_v9 = vcvt.f32.s32 %v3664_v40 }
 0x176   : > { %v954_v54 = vsel %vm953_vm13, %v949_v46, -inf }
 0x177   : > { %955 = vmax.xlane.f32.xlu1 %v954_v54  ;;  %v751_v33 = vshll.u32 %v750_v9, 16 }
 0x178   : > { %v3733_v0 = vpop.xlane.xlu0 %967 }
 0x179   : > { %vm969_vm14 = vcmp.eq.f32.partialorder %v3648_v61, %v3733_v0 }
 0x17a   : > { %v970_v51 = vsel %vm969_vm14, %v965_v8, -inf }
 0x17b   : > { %971 = vmax.xlane.f32.xlu0 %v970_v51 }
 0x17c   : > { %v3737_v37 = vpop.xlane.xlu1 %983 }
 0x17d   : > { %vm985_vm15 = vcmp.eq.f32.partialorder %v3658_v24, %v3737_v37 }
 0x17e   : > { %v986_v59 = vsel %vm985_vm15, %v981_v31, -inf }
 0x17f   : > { %987 = vmax.xlane.f32.xlu1 %v986_v59 }
 0x1cb   : > { %v748_v36 = vpop.xlane.xlu0 %747 }
 0x1cc   : > { %v749_v58 = vcvt.f32.s32 %v748_v36 }
 0x1ce   : > { %v3744_v61 = vadd.s32 %v751_v33, %v749_v58 }
 0x1cf   : > { %v764_v45 = vpop.xlane.xlu1 %763  ;;  %v780_v48 = vpop.xlane.xlu0 %779 }
 0x1d0   : > { %vm993_vm0 = vcmp.eq.s32.totalorder %v3340_v15, %v3744_v61  ;;  %vm994_vm1 = vcmp.eq.s32.totalorder %v3343_v16, %v3744_v61  ;;  %v765_v24 = vcvt.f32.s32 %v764_v45  ;;  %v781_v40 = vcvt.f32.s32 %v780_v48 }
 0x1d1   : > { %v3755_v14 = vsel %vm993_vm0, 2147483648, %v3340_v15  ;;  %v3761_v28 = vsel %vm994_vm1, 2147483648, %v3343_v16  ;;  %v831_v45 = vshll.u32 %v830_v12, 16  ;;  %v846_v48 = vcvt.f32.s32 %v3693_v5 }
 0x1d2   : > { %v3763_v13 = vadd.s32 %v767_v42, %v765_v24  ;;  %v3765_v53 = vadd.s32 %v783_v52, %v781_v40  ;;  %vm1089_vm2 = vcmp.gt.s32.totalorder %v3755_v14, %v3761_v28 }
 0x1d3   : > { %v796_v41 = vpop.xlane.xlu1 %795  ;;  %v3772_v23 = vsel %vm1089_vm2, %v3755_v14, %v3761_v28 }
 0x1d4   : > { %vm995_vm3 = vcmp.eq.s32.totalorder %v3352_v20, %v3763_v13  ;;  %vm996_vm4 = vcmp.eq.s32.totalorder %v3355_v21, %v3763_v13  ;;  %vm997_vm5 = vcmp.eq.s32.totalorder %v3346_v17, %v3765_v53  ;;  %vm998_vm6 = vcmp.eq.s32.totalorder %v3349_v19, %v3765_v53 }
 0x1d5   : > { %v3786_v32 = vsel %vm995_vm3, 2147483648, %v3352_v20  ;;  %v3792_v57 = vsel %vm996_vm4, 2147483648, %v3355_v21  ;;  %v3798_v18 = vsel %vm997_vm5, 2147483648, %v3346_v17  ;;  %v3804_v1 = vsel %vm998_vm6, 2147483648, %v3349_v19 }
 0x1d6   : > { %6121 = vst [vmem:[#allocation42_spill] sm:$0xff] %v3786_v32  ;;  %6122 = vst [vmem:[#allocation43_spill] sm:$0xff] %v3792_v57  ;;  %v797_v46 = vcvt.f32.s32 %v796_v41  ;;  %v1092_v8 = vshra.s32 %v3772_v23, 16  ;;  %vm1105_vm7 = vcmp.gt.s32.totalorder %v3786_v32, %v3792_v57  ;;  %vm1121_vm8 = vcmp.gt.s32.totalorder %v3798_v18, %v3804_v1 }
 0x1d7   : > { %6123 = vst [vmem:[#allocation44_spill] sm:$0xff] %v3798_v18  ;;  %6124 = vst [vmem:[#allocation45_spill] sm:$0xff] %v3804_v1  ;;  %v3813_v54 = vsel %vm1105_vm7, %v3786_v32, %v3792_v57  ;;  %v3817_v63 = vsel %vm1121_vm8, %v3798_v18, %v3804_v1  ;;  %v910_v1 = vcvt.f32.s32 %v3713_v44  ;;  %v6142_v57 = vld [vmem:[#allocation27_spill] sm:$0xff] }
 0x1d8   : > { %v3819_v51 = vadd.s32 %v799_v43, %v797_v46  ;;  %v3821_v31 = vcvt.s32.f32 %v1092_v8  ;;  %v1108_v59 = vshra.s32 %v3813_v54, 16  ;;  %v1124_v9 = vshra.s32 %v3817_v63, 16  ;;  %v812_v36 = vpop.xlane.xlu0 %811 }
 0x1d9   : > { %v813_v33 = vcvt.f32.s32 %v812_v36  ;;  %v862_v46 = vcvt.f32.s32 %v3697_v47 }
 0x1da   : > { %vm999_vm9 = vcmp.eq.s32.totalorder %v3379_v35, %v3819_v51  ;;  %vm1000_vm10 = vcmp.eq.s32.totalorder %v3384_v38, %v3819_v51  ;;  %1095 = vmax.xlane.f32.xlu0 %v3821_v31  ;;  %v3831_v58 = vcvt.s32.f32 %v1108_v59  ;;  %v3845_v42 = vcvt.s32.f32 %v1124_v9 }
 0x1db   : > { %v3837_v52 = vsel %vm999_vm9, 2147483648, %v3379_v35  ;;  %v3843_v4 = vsel %vm1000_vm10, 2147483648, %v3384_v38  ;;  %v3847_v27 = vadd.s32 %v815_v26, %v813_v33  ;;  %v847_v26 = vshll.u32 %v846_v48, 16 }
 0x1dc   : > { %6125 = vst [vmem:[#allocation46_spill] sm:$0xff] %v3837_v52  ;;  %6126 = vst [vmem:[#allocation47_spill] sm:$0xff] %v3843_v4  ;;  %1111 = vmax.xlane.f32.xlu1 %v3831_v58  ;;  %vm1137_vm11 = vcmp.gt.s32.totalorder %v3837_v52, %v3843_v4 }
 0x1dd   : > { %v828_v24 = vpop.xlane.xlu1 %827  ;;  %v3855_v40 = vsel %vm1137_vm11, %v3837_v52, %v3843_v4  ;;  %vm1001_vm12 = vcmp.eq.s32.totalorder %v3423_v22, %v3847_v27  ;;  %vm1002_vm13 = vcmp.eq.s32.totalorder %v3426_v29, %v3847_v27 }
 0x1de   : > { %v829_v43 = vcvt.f32.s32 %v828_v24  ;;  %1127 = vmax.xlane.f32.xlu0 %v3845_v42  ;;  %v1140_v49 = vshra.s32 %v3855_v40, 16  ;;  %v3867_v5 = vsel %vm1001_vm12, 2147483648, %v3423_v22  ;;  %v3873_v41 = vsel %vm1002_vm13, 2147483648, %v3426_v29 }
 0x1df   : > { %6127 = vst [vmem:[#allocation48_spill] sm:$0xff] %v3867_v5  ;;  %6128 = vst [vmem:[#allocation49_spill] sm:$0xff] %v3873_v41  ;;  %vm1153_vm14 = vcmp.gt.s32.totalorder %v3867_v5, %v3873_v41 }
 0x1e0   : > { %v3876_v8 = vadd.s32 %v831_v45, %v829_v43  ;;  %v844_v59 = vpop.xlane.xlu0 %843  ;;  %v3878_v9 = vcvt.s32.f32 %v1140_v49  ;;  %v3884_v36 = vsel %vm1153_vm14, %v3867_v5, %v3873_v41  ;;  %v863_v43 = vshll.u32 %v862_v46, 16  ;;  %v6132_v41 = vld [vmem:[#allocation23_spill] sm:$0xff]  ;;  %v6133_v5 = vld [vmem:[#allocation24_spill] sm:$0xff] }
 0x1e1   : > { %v845_v12 = vcvt.f32.s32 %v844_v59  ;;  %v1156_v47 = vshra.s32 %v3884_v36, 16 }
 0x1e2   : > { %vm1003_vm15 = vcmp.eq.s32.totalorder %v3439_v55, %v3876_v8  ;;  %vm1004_vm2 = vcmp.eq.s32.totalorder %v3442_v56, %v3876_v8  ;;  %1143 = vmax.xlane.f32.xlu1 %v3878_v9 }
 0x1e3   : > { %v3896_v33 = vsel %vm1003_vm15, 2147483648, %v3439_v55  ;;  %v3902_v45 = vsel %vm1004_vm2, 2147483648, %v3442_v56  ;;  %v3904_v48 = vadd.s32 %v847_v26, %v845_v12  ;;  %v860_v24 = vpop.xlane.xlu1 %859  ;;  %v3906_v59 = vcvt.s32.f32 %v1156_v47  ;;  %v6172_v56 = vld [vmem:[#allocation43_spill] sm:$0xff] }
 0x1e4   : > { %6129 = vst [vmem:[#allocation50_spill] sm:$0xff] %v3896_v33  ;;  %6130 = vst [vmem:[#allocation51_spill] sm:$0xff] %v3902_v45  ;;  %v861_v49 = vcvt.f32.s32 %v860_v24  ;;  %vm1169_vm7 = vcmp.gt.s32.totalorder %v3896_v33, %v3902_v45  ;;  %v878_v24 = vcvt.f32.s32 %v3703_v34 }
 0x1e5   : > { %6131 = vst [vmem:[#allocation52_spill] sm:$0xff] %v3904_v48  ;;  %vm5918_vm8 = vcmp.eq.s32.totalorder %v6132_v41, %v3904_v48  ;;  %vm5955_vm11 = vcmp.eq.s32.totalorder %v6133_v5, %v3904_v48  ;;  %v3916_v4 = vsel %vm1169_vm7, %v3896_v33, %v3902_v45  ;;  %1159 = vmax.xlane.f32.xlu0 %v3906_v59  ;;  %v6138_v45 = vld [vmem:[#allocation26_spill] sm:$0xff] }
 0x1e6   : > { %v3922_v46 = vsel %vm5918_vm8, 2147483648, %v6132_v41  ;;  %v3928_v26 = vsel %vm5955_vm11, 2147483648, %v6133_v5  ;;  %v3930_v12 = vadd.s32 %v863_v43, %v861_v49  ;;  %v1172_v47 = vshra.s32 %v3916_v4, 16  ;;  %v6137_v41 = vld [vmem:[#allocation25_spill] sm:$0xff] }
 0x1e7   : > { %6134 = vst [vmem:[#allocation53_spill] sm:$0xff] %v3922_v46  ;;  %6135 = vst [vmem:[#allocation54_spill] sm:$0xff] %v3928_v26  ;;  %vm1185_vm14 = vcmp.gt.s32.totalorder %v3922_v46, %v3928_v26  ;;  %v894_v5 = vcvt.f32.s32 %v3708_v30 }
 0x1e8   : > { %6136 = vst [vmem:[#allocation55_spill] sm:$0xff] %v3930_v12  ;;  %vm5941_vm7 = vcmp.eq.s32.totalorder %v6137_v41, %v3930_v12  ;;  %vm5942_vm8 = vcmp.eq.s32.totalorder %v6138_v45, %v3930_v12  ;;  %v3941_v33 = vcvt.s32.f32 %v1172_v47  ;;  %v3945_v43 = vsel %vm1185_vm14, %v3922_v46, %v3928_v26 }
 0x1e9   : > { %v3951_v34 = vsel %vm5941_vm7, 2147483648, %v6137_v41  ;;  %v3957_v49 = vsel %vm5942_vm8, 2147483648, %v6138_v45  ;;  %v1188_v48 = vshra.s32 %v3945_v43, 16  ;;  %v879_v46 = vshll.u32 %v878_v24, 16  ;;  %v6143_v24 = vld [vmem:[#allocation28_spill] sm:$0xff] }
 0x1ea   : > { %6139 = vst [vmem:[#allocation56_spill] sm:$0xff] %v3951_v34  ;;  %6140 = vst [vmem:[#allocation57_spill] sm:$0xff] %v3957_v49  ;;  %1175 = vmax.xlane.f32.xlu1 %v3941_v33  ;;  %vm1201_vm14 = vcmp.gt.s32.totalorder %v3951_v34, %v3957_v49  ;;  %v876_v47 = vpop.xlane.xlu0 %875  ;;  %v895_v18 = vshll.u32 %v894_v5, 16  ;;  %v926_v5 = vcvt.f32.s32 %v3717_v25 }
 0x1eb   : > { %v3963_v26 = vcvt.s32.f32 %v1188_v48  ;;  %v3967_v41 = vsel %vm1201_vm14, %v3951_v34, %v3957_v49  ;;  %v877_v12 = vcvt.f32.s32 %v876_v47  ;;  %v911_v47 = vshll.u32 %v910_v1, 16  ;;  %v6147_v49 = vld [vmem:[#allocation29_spill] sm:$0xff] }
 0x1ec   : > { %v1204_v45 = vshra.s32 %v3967_v41, 16 }
 0x1ed   : > { %1191 = vmax.xlane.f32.xlu0 %v3963_v26  ;;  %v3972_v52 = vadd.s32 %v879_v46, %v877_v12 }
 0x1ee   : > { %v3974_v55 = vcvt.s32.f32 %v1204_v45  ;;  %v892_v48 = vpop.xlane.xlu1 %891 }
 0x1ef   : > { %6141 = vst [vmem:[#allocation58_spill] sm:$0xff] %v3972_v52  ;;  %vm5946_vm14 = vcmp.eq.s32.totalorder %v6142_v57, %v3972_v52  ;;  %vm5949_vm7 = vcmp.eq.s32.totalorder %v6143_v24, %v3972_v52  ;;  %v893_v30 = vcvt.f32.s32 %v892_v48  ;;  %v6148_v52 = vld [vmem:[#allocation30_spill] sm:$0xff] }
 0x1f0   : > { %1207 = vmax.xlane.f32.xlu1 %v3974_v55  ;;  %v3986_v46 = vsel %vm5946_vm14, 2147483648, %v6142_v57  ;;  %v3992_v44 = vsel %vm5949_vm7, 2147483648, %v6143_v24  ;;  %v6152_v24 = vld [vmem:[#allocation31_spill] sm:$0xff] }
 0x1f1   : > { %6144 = vst [vmem:[#allocation59_spill] sm:$0xff] %v3986_v46  ;;  %6145 = vst [vmem:[#allocation60_spill] sm:$0xff] %v3992_v44  ;;  %v3995_v45 = vadd.s32 %v895_v18, %v893_v30  ;;  %vm1217_vm8 = vcmp.gt.s32.totalorder %v3986_v46, %v3992_v44 }
 0x1f2   : > { %v908_v12 = vpop.xlane.xlu0 %907  ;;  %v4001_v57 = vsel %vm1217_vm8, %v3986_v46, %v3992_v44 }
 0x1f3   : > { %6146 = vst [vmem:[#allocation61_spill] sm:$0xff] %v3995_v45  ;;  %v909_v48 = vcvt.f32.s32 %v908_v12  ;;  %vm5957_vm14 = vcmp.eq.s32.totalorder %v6147_v49, %v3995_v45  ;;  %vm5994_vm7 = vcmp.eq.s32.totalorder %v6148_v52, %v3995_v45  ;;  %v1220_v25 = vshra.s32 %v4001_v57, 16 }
 0x1f4   : > { %v4012_v18 = vsel %vm5957_vm14, 2147483648, %v6147_v49  ;;  %v4018_v1 = vsel %vm5994_vm7, 2147483648, %v6148_v52  ;;  %v927_v12 = vshll.u32 %v926_v5, 16  ;;  %v6153_v49 = vld [vmem:[#allocation32_spill] sm:$0xff]  ;;  %v958_v52 = vcvt.f32.s32 %v3728_v3 }
 0x1f5   : > { %6149 = vst [vmem:[#allocation62_spill] sm:$0xff] %v4012_v18  ;;  %6150 = vst [vmem:[#allocation63_spill] sm:$0xff] %v4018_v1  ;;  %v4020_v30 = vadd.s32 %v911_v47, %v909_v48  ;;  %v4022_v46 = vcvt.s32.f32 %v1220_v25  ;;  %vm1233_vm8 = vcmp.gt.s32.totalorder %v4012_v18, %v4018_v1  ;;  %v942_v48 = vcvt.f32.s32 %v3723_v60 }
 0x1f6   : > { %v924_v44 = vpop.xlane.xlu1 %923  ;;  %v4032_v45 = vsel %vm1233_vm8, %v4012_v18, %v4018_v1  ;;  %v6157_v18 = vld [vmem:[#allocation33_spill] sm:$0xff] }
 0x1f7   : > { %6151 = vst [vmem:[#allocation64_spill] sm:$0xff] %v4020_v30  ;;  %vm5967_vm11 = vcmp.eq.s32.totalorder %v6152_v24, %v4020_v30  ;;  %vm5970_vm14 = vcmp.eq.s32.totalorder %v6153_v49, %v4020_v30  ;;  %v925_v34 = vcvt.f32.s32 %v924_v44  ;;  %1223 = vmax.xlane.f32.xlu0 %v4022_v46  ;;  %v1236_v44 = vshra.s32 %v4032_v45, 16  ;;  %v6158_v30 = vld [vmem:[#allocation34_spill] sm:$0xff] }
 0x1f8   : > { %v4038_v5 = vsel %vm5967_vm11, 2147483648, %v6152_v24  ;;  %v4044_v47 = vsel %vm5970_vm14, 2147483648, %v6153_v49 }
 0x1f9   : > { %6154 = vst [vmem:[#allocation65_spill] sm:$0xff] %v4038_v5  ;;  %6155 = vst [vmem:[#allocation66_spill] sm:$0xff] %v4044_v47  ;;  %v4049_v25 = vadd.s32 %v927_v12, %v925_v34  ;;  %vm1249_vm8 = vcmp.gt.s32.totalorder %v4038_v5, %v4044_v47  ;;  %v4053_v1 = vcvt.s32.f32 %v1236_v44  ;;  %v943_v44 = vshll.u32 %v942_v48, 16 }
 0x1fa   : > { %v4057_v24 = vsel %vm1249_vm8, %v4038_v5, %v4044_v47  ;;  %v974_v48 = vcvt.f32.s32 %v3733_v0 }
 0x1fb   : > { %6156 = vst [vmem:[#allocation67_spill] sm:$0xff] %v4049_v25  ;;  %vm5982_vm11 = vcmp.eq.s32.totalorder %v6157_v18, %v4049_v25  ;;  %vm5983_vm14 = vcmp.eq.s32.totalorder %v6158_v30, %v4049_v25  ;;  %v1252_v49 = vshra.s32 %v4057_v24, 16  ;;  %v940_v12 = vpop.xlane.xlu0 %939  ;;  %1239 = vmax.xlane.f32.xlu1 %v4053_v1 }
 0x1fc   : > { %v4068_v60 = vsel %vm5982_vm11, 2147483648, %v6157_v18  ;;  %v4074_v34 = vsel %vm5983_vm14, 2147483648, %v6158_v30  ;;  %v941_v47 = vcvt.f32.s32 %v940_v12  ;;  %v959_v12 = vshll.u32 %v958_v52, 16 }
 0x1fd   : > { %6159 = vst [vmem:[#allocation68_spill] sm:$0xff] %v4068_v60  ;;  %6160 = vst [vmem:[#allocation69_spill] sm:$0xff] %v4074_v34  ;;  %v4077_v5 = vcvt.s32.f32 %v1252_v49  ;;  %vm1265_vm8 = vcmp.gt.s32.totalorder %v4068_v60, %v4074_v34 }
 0x1fe   : > { %v4084_v18 = vsel %vm1265_vm8, %v4068_v60, %v4074_v34  ;;  %v4086_v32 = vadd.s32 %v943_v44, %v941_v47  ;;  %v990_v60 = vcvt.f32.s32 %v3737_v37 }
 0x1ff   : > { %1255 = vmax.xlane.f32.xlu0 %v4077_v5  ;;  %v1268_v25 = vshra.s32 %v4084_v18, 16 }
 0x200   : > { %6161 = vst [vmem:[#allocation70_spill] sm:$0xff] %v4086_v32  ;;  %vm5992_vm11 = vcmp.eq.s32.totalorder %v3592_v2, %v4086_v32  ;;  %vm5993_vm14 = vcmp.eq.s32.totalorder %v3598_v50, %v4086_v32  ;;  %v956_v49 = vpop.xlane.xlu1 %955 }
 0x201   : > { %v4095_v3 = vcvt.s32.f32 %v1268_v25  ;;  %v4101_v47 = vsel %vm5992_vm11, 2147483648, %v3592_v2  ;;  %v4107_v0 = vsel %vm5993_vm14, 2147483648, %v3598_v50  ;;  %v957_v44 = vcvt.f32.s32 %v956_v49 }
 0x202   : > { %vm1281_vm8 = vcmp.gt.s32.totalorder %v4101_v47, %v4107_v0  ;;  %v975_v2 = vshll.u32 %v974_v48, 16 }
 0x203   : > { %1271 = vmax.xlane.f32.xlu1 %v4095_v3  ;;  %v4112_v25 = vadd.s32 %v959_v12, %v957_v44  ;;  %v4116_v34 = vsel %vm1281_vm8, %v4101_v47, %v4107_v0  ;;  %v991_v44 = vshll.u32 %v990_v60, 16 }
 0x204   : > { %v972_v52 = vpop.xlane.xlu0 %971  ;;  %v1284_v32 = vshra.s32 %v4116_v34, 16 }
 0x205   : > { %6162 = vst [vmem:[#allocation71_spill] sm:$0xff] %v4112_v25  ;;  %v973_v30 = vcvt.f32.s32 %v972_v52  ;;  %vm5995_vm11 = vcmp.eq.s32.totalorder %v3611_v7, %v4112_v25  ;;  %vm5997_vm14 = vcmp.eq.s32.totalorder %v3614_v39, %v4112_v25 }
 0x206   : > { %v4128_v49 = vsel %vm5995_vm11, 2147483648, %v3611_v7  ;;  %v4134_v37 = vsel %vm5997_vm14, 2147483648, %v3614_v39  ;;  %v4138_v12 = vcvt.s32.f32 %v1284_v32  ;;  %v1139_v39 = vand.u32 65535, %v3855_v40 }
 0x207   : > { %6163 = vst [vmem:[#allocation72_spill] sm:$0xff] %v4128_v49  ;;  %6164 = vst [vmem:[#allocation73_spill] sm:$0xff] %v4134_v37  ;;  %v4136_v48 = vadd.s32 %v975_v2, %v973_v30  ;;  %vm1297_vm8 = vcmp.gt.s32.totalorder %v4128_v49, %v4134_v37  ;;  %v1171_v40 = vand.u32 65535, %v3916_v4 }
 0x208   : > { %v988_v52 = vpop.xlane.xlu1 %987  ;;  %1287 = vmax.xlane.f32.xlu0 %v4138_v12  ;;  %v4149_v7 = vsel %vm1297_vm8, %v4128_v49, %v4134_v37 }
 0x209   : > { %6165 = vst [vmem:[#allocation74_spill] sm:$0xff] %v4136_v48  ;;  %vm6005_vm7 = vcmp.eq.s32.totalorder %v3621_v6, %v4136_v48  ;;  %vm1022_vm11 = vcmp.eq.s32.totalorder %v3629_v62, %v4136_v48  ;;  %v989_v30 = vcvt.f32.s32 %v988_v52  ;;  %v1300_v60 = vshra.s32 %v4149_v7, 16 }
 0x20a   : > { %v4155_v2 = vsel %vm6005_vm7, 2147483648, %v3621_v6  ;;  %v4161_v32 = vsel %vm1022_vm11, 2147483648, %v3629_v62  ;;  %v1123_v48 = vand.u32 65535, %v3817_v63 }
 0x20b   : > { %6166 = vst [vmem:[#allocation75_spill] sm:$0xff] %v4155_v2  ;;  %6167 = vst [vmem:[#allocation76_spill] sm:$0xff] %v4161_v32  ;;  %vm1313_vm14 = vcmp.gt.s32.totalorder %v4155_v2, %v4161_v32  ;;  %v4166_v37 = vadd.s32 %v991_v44, %v989_v30  ;;  %v4168_v49 = vcvt.s32.f32 %v1300_v60 }
 0x20c   : > { %v4172_v6 = vsel %vm1313_vm14, %v4155_v2, %v4161_v32 }
 0x20d   : > { %6168 = vst [vmem:[#allocation77_spill] sm:$0xff] %v4166_v37  ;;  %v1316_v25 = vshra.s32 %v4172_v6, 16  ;;  %vm6016_vm8 = vcmp.eq.s32.totalorder %v3642_v10, %v4166_v37  ;;  %vm6023_vm7 = vcmp.eq.s32.totalorder %v3646_v11, %v4166_v37  ;;  %1303 = vmax.xlane.f32.xlu1 %v4168_v49  ;;  %v1091_v37 = vand.u32 65535, %v3772_v23 }
 0x20e   : > { %v4184_v44 = vsel %vm6016_vm8, 2147483648, %v3642_v10  ;;  %v4190_v52 = vsel %vm6023_vm7, 2147483648, %v3646_v11 }
 0x20f   : > { %6169 = vst [vmem:[#allocation78_spill] sm:$0xff] %v4184_v44  ;;  %6170 = vst [vmem:[#allocation79_spill] sm:$0xff] %v4190_v52  ;;  %v4192_v30 = vcvt.s32.f32 %v1316_v25  ;;  %vm1329_vm14 = vcmp.gt.s32.totalorder %v4184_v44, %v4190_v52  ;;  %v1107_v25 = vand.u32 65535, %v3813_v54  ;;  %v1093_v2 = vcvt.s32.f32 %v1091_v37 }
 0x210   : > { %v4199_v60 = vsel %vm1329_vm14, %v4184_v44, %v4190_v52  ;;  %v1125_v54 = vcvt.s32.f32 %v1123_v48  ;;  %v1141_v37 = vcvt.s32.f32 %v1139_v39 }
 0x211   : > { %1319 = vmax.xlane.f32.xlu0 %v4192_v30  ;;  %v1332_v10 = vshra.s32 %v4199_v60, 16  ;;  %v1109_v62 = vcvt.s32.f32 %v1107_v25  ;;  %v1203_v25 = vand.u32 65535, %v3967_v41 }
 0x213   : > { %v4202_v32 = vcvt.s32.f32 %v1332_v10 }
 0x215   : > { %1335 = vmax.xlane.f32.xlu1 %v4202_v32 }
 0x263   : > { %v4207_v11 = vpop.xlane.xlu0 %1095 }
 0x264   : > { %vm1097_vm8 = vcmp.eq.f32.partialorder %v3821_v31, %v4207_v11 }
 0x265   : > { %v1098_v52 = vsel %vm1097_vm8, %v1093_v2, -inf  ;;  %v4212_v44 = vpop.xlane.xlu1 %1111  ;;  %v1155_v2 = vand.u32 65535, %v3884_v36  ;;  %v1173_v36 = vcvt.s32.f32 %v1171_v40 }
 0x266   : > { %1099 = vmax.xlane.f32.xlu0 %v1098_v52  ;;  %vm1113_vm14 = vcmp.eq.f32.partialorder %v3831_v58, %v4212_v44  ;;  %v1187_v52 = vand.u32 65535, %v3945_v43  ;;  %v1205_v43 = vcvt.s32.f32 %v1203_v25 }
 0x267   : > { %v4216_v10 = vpop.xlane.xlu0 %1127  ;;  %v1114_v23 = vsel %vm1113_vm14, %v1109_v62, -inf  ;;  %v1157_v48 = vcvt.s32.f32 %v1155_v2  ;;  %v1235_v2 = vand.u32 65535, %v4032_v45  ;;  %v1267_v45 = vand.u32 65535, %v4084_v18 }
 0x268   : > { %1115 = vmax.xlane.f32.xlu1 %v1114_v23  ;;  %vm1129_vm7 = vcmp.eq.f32.partialorder %v3845_v42, %v4216_v10  ;;  %v1189_v4 = vcvt.s32.f32 %v1187_v52  ;;  %v1299_v18 = vand.u32 65535, %v4149_v7  ;;  %v1331_v7 = vand.u32 65535, %v4199_v60 }
 0x269   : > { %v1130_v63 = vsel %vm1129_vm7, %v1125_v54, -inf  ;;  %v1237_v40 = vcvt.s32.f32 %v1235_v2  ;;  %v1118_v2 = vcvt.f32.s32 %v4212_v44  ;;  %v1134_v60 = vcvt.f32.s32 %v4216_v10 }
 0x26a   : > { %1131 = vmax.xlane.f32.xlu0 %v1130_v63 }
 0x26b   : > { %v4221_v31 = vpop.xlane.xlu1 %1143  ;;  %v1119_v17 = vshll.u32 %v1118_v2, 16 }
 0x26c   : > { %vm1145_vm8 = vcmp.eq.f32.partialorder %v3878_v9, %v4221_v31 }
 0x26d   : > { %v1146_v58 = vsel %vm1145_vm8, %v1141_v37, -inf }
 0x26e   : > { %1147 = vmax.xlane.f32.xlu1 %v1146_v58  ;;  %v4226_v62 = vpop.xlane.xlu0 %1159  ;;  %v1251_v58 = vand.u32 65535, %v4057_v24  ;;  %v1269_v24 = vcvt.s32.f32 %v1267_v45 }
 0x26f   : > { %vm1161_vm14 = vcmp.eq.f32.partialorder %v3906_v59, %v4226_v62  ;;  %v1166_v35 = vcvt.f32.s32 %v4226_v62 }
 0x270   : > { %v1162_v42 = vsel %vm1161_vm14, %v1157_v48, -inf }
 0x271   : > { %1163 = vmax.xlane.f32.xlu0 %v1162_v42  ;;  %v1253_v42 = vcvt.s32.f32 %v1251_v58  ;;  %v1150_v58 = vcvt.f32.s32 %v4221_v31  ;;  %v1135_v31 = vshll.u32 %v1134_v60, 16 }
 0x273   : > { %v4232_v39 = vpop.xlane.xlu1 %1175 }
 0x274   : > { %vm1177_vm7 = vcmp.eq.f32.partialorder %v3941_v33, %v4232_v39  ;;  %v1219_v33 = vand.u32 65535, %v4001_v57 }
 0x275   : > { %v1178_v9 = vsel %vm1177_vm7, %v1173_v36, -inf }
 0x276   : > { %v4237_v23 = vpop.xlane.xlu0 %1191  ;;  %1179 = vmax.xlane.f32.xlu1 %v1178_v9  ;;  %v1221_v37 = vcvt.s32.f32 %v1219_v33 }
 0x277   : > { %vm1193_vm8 = vcmp.eq.f32.partialorder %v3963_v26, %v4237_v23 }
 0x278   : > { %v1194_v59 = vsel %vm1193_vm8, %v1189_v4, -inf  ;;  %v1315_v4 = vand.u32 65535, %v4172_v6  ;;  %v1333_v6 = vcvt.s32.f32 %v1331_v7  ;;  %v1182_v7 = vcvt.f32.s32 %v4232_v39 }
 0x279   : > { %1195 = vmax.xlane.f32.xlu0 %v1194_v59  ;;  %v4241_v54 = vpop.xlane.xlu1 %1207  ;;  %v1167_v39 = vshll.u32 %v1166_v35, 16 }
 0x27a   : > { %vm1209_vm14 = vcmp.eq.f32.partialorder %v3974_v55, %v4241_v54 }
 0x27b   : > { %v1210_v63 = vsel %vm1209_vm14, %v1205_v43, -inf  ;;  %v1301_v43 = vcvt.s32.f32 %v1299_v18 }
 0x27c   : > { %1211 = vmax.xlane.f32.xlu1 %v1210_v63  ;;  %v1317_v63 = vcvt.s32.f32 %v1315_v4  ;;  %v6173_v4 = vld [vmem:[#allocation44_spill] sm:$0xff] }
 0x280   : > { %v4246_v41 = vpop.xlane.xlu0 %1223 }
 0x281   : > { %vm1225_vm7 = vcmp.eq.f32.partialorder %v4022_v46, %v4246_v41 }
 0x282   : > { %v1226_v26 = vsel %vm1225_vm7, %v1221_v37, -inf }
 0x283   : > { %1227 = vmax.xlane.f32.xlu0 %v1226_v26  ;;  %v6024_v26 = vmov 0.0  }
 0x284   : > { %v4252_v48 = vpop.xlane.xlu1 %1239  ;;  %v4305_v16 = vsel %vm995_vm3, 1.0, %v6024_v26  ;;  %v4311_v10 = vsel %vm998_vm6, 1.0, %v6024_v26  ;;  %v4317_v21 = vsel %vm997_vm5, 1.0, %v6024_v26  ;;  %v4323_v20 = vsel %vm1000_vm10, 1.0, %v6024_v26 }
 0x285   : > { %vm1241_vm8 = vcmp.eq.f32.partialorder %v4053_v1, %v4252_v48  ;;  %v1283_v1 = vand.u32 65535, %v4116_v34  ;;  %v4329_v19 = vsel %vm999_vm9, 1.0, %v6024_v26  ;;  %v4335_v61 = vsel %vm1002_vm13, 1.0, %v6024_v26 }
 0x286   : > { %v1242_v55 = vsel %vm1241_vm8, %v1237_v40, -inf  ;;  %v4341_v38 = vsel %vm1001_vm12, 1.0, %v6024_v26  ;;  %v4348_v29 = vsel %vm1004_vm2, 1.0, %v6024_v26 }
 0x287   : > { %1243 = vmax.xlane.f32.xlu1 %v1242_v55  ;;  %v1285_v25 = vcvt.s32.f32 %v1283_v1 }
 0x288   : > { %v4256_v57 = vpop.xlane.xlu0 %1255 }
 0x289   : > { %vm1257_vm14 = vcmp.eq.f32.partialorder %v4077_v5, %v4256_v57 }
 0x28a   : > { %v1258_v46 = vsel %vm1257_vm14, %v1253_v42, -inf  ;;  %v1151_v42 = vshll.u32 %v1150_v58, 16 }
 0x28b   : > { %1259 = vmax.xlane.f32.xlu0 %v1258_v46 }
 0x28c   : > { %v4261_v52 = vpop.xlane.xlu1 %1271 }
 0x28d   : > { %vm1273_vm7 = vcmp.eq.f32.partialorder %v4095_v3, %v4261_v52 }
 0x28e   : > { %v1274_v36 = vsel %vm1273_vm7, %v1269_v24, -inf }
 0x28f   : > { %1275 = vmax.xlane.f32.xlu1 %v1274_v36  ;;  %v6171_v36 = vld [vmem:[#allocation42_spill] sm:$0xff] }
 0x291   : > { %v4266_v9 = vpop.xlane.xlu0 %1287 }
 0x292   : > { %vm1289_vm8 = vcmp.eq.f32.partialorder %v4138_v12, %v4266_v9 }
 0x293   : > { %v1290_v5 = vsel %vm1289_vm8, %v1285_v25, -inf }
 0x294   : > { %1291 = vmax.xlane.f32.xlu0 %v1290_v5 }
 0x296   : > { %v4272_v59 = vpop.xlane.xlu1 %1303 }
 0x297   : > { %vm1305_vm14 = vcmp.eq.f32.partialorder %v4168_v49, %v4272_v59  ;;  %v1102_v49 = vcvt.f32.s32 %v4207_v11  ;;  %v1028_v11 = vsel %vm996_vm4, 1.0, %v6024_v26 }
 0x298   : > { %v1306_v34 = vsel %vm1305_vm14, %v1301_v43, -inf  ;;  %v6174_v43 = vld [vmem:[#allocation45_spill] sm:$0xff] }
 0x299   : > { %1307 = vmax.xlane.f32.xlu1 %v1306_v34  ;;  %v1103_v44 = vshll.u32 %v1102_v49, 16 }
 0x29a   : > { %v4276_v3 = vpop.xlane.xlu0 %1319 }
 0x29b   : > { %vm1321_vm7 = vcmp.eq.f32.partialorder %v4192_v30, %v4276_v3  ;;  %v1026_v30 = vsel %vm994_vm1, 1.0, %v6024_v26 }
 0x29c   : > { %v1322_v12 = vsel %vm1321_vm7, %v1317_v63, -inf }
 0x29d   : > { %1323 = vmax.xlane.f32.xlu0 %v1322_v12 }
 0x29e   : > { %v4281_v33 = vpop.xlane.xlu1 %1335 }
 0x29f   : > { %vm1337_vm8 = vcmp.eq.f32.partialorder %v4202_v32, %v4281_v33  ;;  %v1025_v32 = vsel %vm993_vm0, 1.0, %v6024_v26 }
 0x2a0   : > { %v1338_v37 = vsel %vm1337_vm8, %v1333_v6, -inf }
 0x2a1   : > { %1339 = vmax.xlane.f32.xlu1 %v1338_v37 }
 0x2ef   : > { %v1100_v40 = vpop.xlane.xlu0 %1099 }
 0x2f0   : > { %v1101_v55 = vcvt.f32.s32 %v1100_v40 }
 0x2f1   : > { %v1116_v15 = vpop.xlane.xlu1 %1115 }
 0x2f2   : > { %v1104_v13 = vadd.s32 %v1103_v44, %v1101_v55  ;;  %v1117_v53 = vcvt.f32.s32 %v1116_v15  ;;  %v6177_v44 = vld [vmem:[#allocation47_spill] sm:$0xff] }
 0x2f3   : > { %v1132_v51 = vpop.xlane.xlu0 %1131 }
 0x2f4   : > { %vm1345_vm0 = vcmp.eq.s32.totalorder %v3755_v14, %v1104_v13  ;;  %vm1346_vm1 = vcmp.eq.s32.totalorder %v3761_v28, %v1104_v13  ;;  %v1120_v45 = vadd.s32 %v1119_v17, %v1117_v53  ;;  %v1133_v46 = vcvt.f32.s32 %v1132_v51 }
 0x2f5   : > { %v4353_v22 = vsel %vm1345_vm0, 2147483648, %v3755_v14  ;;  %v4356_v27 = vsel %vm1346_vm1, 2147483648, %v3761_v28  ;;  %v4358_v62 = vsel %vm1346_vm1, 1.0, %v1026_v30  ;;  %v4360_v24 = vsel %vm1345_vm0, 1.0, %v1025_v32 }
 0x2f6   : > { %vm1347_vm3 = vcmp.eq.s32.totalorder %v6171_v36, %v1120_v45  ;;  %vm1348_vm4 = vcmp.eq.s32.totalorder %v6172_v56, %v1120_v45  ;;  %v1136_v1 = vadd.s32 %v1135_v31, %v1133_v46  ;;  %vm1441_vm5 = vcmp.gt.s32.totalorder %v4353_v22, %v4356_v27 }
 0x2f7   : > { %v4369_v14 = vsel %vm1347_vm3, 2147483648, %v6171_v36  ;;  %v4372_v28 = vsel %vm1348_vm4, 2147483648, %v6172_v56  ;;  %v1148_v25 = vpop.xlane.xlu1 %1147  ;;  %v4376_v18 = vsel %vm1441_vm5, %v4353_v22, %v4356_v27  ;;  %v4378_v5 = vsel %vm1348_vm4, 1.0, %v1028_v11  ;;  %v6176_v11 = vld [vmem:[#allocation46_spill] sm:$0xff]  ;;  %v6180_v36 = vld [vmem:[#allocation24_spill] sm:$0xff] }
 0x2f8   : > { %vm1349_vm6 = vcmp.eq.s32.totalorder %v6173_v4, %v1136_v1  ;;  %vm1350_vm9 = vcmp.eq.s32.totalorder %v6174_v43, %v1136_v1  ;;  %v1149_v34 = vcvt.f32.s32 %v1148_v25  ;;  %v1444_v63 = vshra.s32 %v4376_v18, 16  ;;  %v6181_v1 = vld [vmem:[#allocation52_spill] sm:$0xff] }
 0x2f9   : > { %v4387_v12 = vsel %vm1349_vm6, 2147483648, %v6173_v4  ;;  %v4392_v6 = vsel %vm1350_vm9, 2147483648, %v6174_v43  ;;  %vm1457_vm10 = vcmp.gt.s32.totalorder %v4369_v14, %v4372_v28  ;;  %v4413_v32 = vsel %vm1003_vm15, 1.0, %v6024_v26 }
 0x2fa   : > { %v1152_v37 = vadd.s32 %v1151_v42, %v1149_v34  ;;  %v4396_v49 = vcvt.s32.f32 %v1444_v63  ;;  %v4400_v2 = vsel %vm1457_vm10, %v4369_v14, %v4372_v28  ;;  %vm1473_vm12 = vcmp.gt.s32.totalorder %v4387_v12, %v4392_v6  ;;  %v1164_v30 = vpop.xlane.xlu0 %1163  ;;  %v6178_v34 = vld [vmem:[#allocation48_spill] sm:$0xff]  ;;  %v6179_v63 = vld [vmem:[#allocation49_spill] sm:$0xff] }
 0x2fb   : > { %v1460_v60 = vshra.s32 %v4400_v2, 16  ;;  %v4407_v58 = vsel %vm1473_vm12, %v4387_v12, %v4392_v6  ;;  %v1165_v55 = vcvt.f32.s32 %v1164_v30  ;;  %v1183_v17 = vshll.u32 %v1182_v7, 16 }
 0x2fc   : > { %vm1351_vm13 = vcmp.eq.s32.totalorder %v6176_v11, %v1152_v37  ;;  %vm1352_vm2 = vcmp.eq.s32.totalorder %v6177_v44, %v1152_v37  ;;  %1447 = vmax.xlane.f32.xlu0 %v4396_v49  ;;  %v1476_v15 = vshra.s32 %v4407_v58, 16  ;;  %v1198_v31 = vcvt.f32.s32 %v4237_v23 }
 0x2fd   : > { %v4422_v13 = vsel %vm1351_vm13, 2147483648, %v6176_v11  ;;  %v4427_v8 = vsel %vm1352_vm2, 2147483648, %v6177_v44  ;;  %v4429_v53 = vcvt.s32.f32 %v1460_v60  ;;  %v1168_v42 = vadd.s32 %v1167_v39, %v1165_v55  ;;  %v6186_v44 = vld [vmem:[#allocation23_spill] sm:$0xff] }
 0x2fe   : > { %v4432_v35 = vcvt.s32.f32 %v1476_v15  ;;  %vm1489_vm15 = vcmp.gt.s32.totalorder %v4422_v13, %v4427_v8  ;;  %v4444_v56 = vsel %vm1347_vm3, 1.0, %v4305_v16  ;;  %v4449_v23 = vsel %vm1350_vm9, 1.0, %v4311_v10 }
 0x2ff   : > { %v1180_v51 = vpop.xlane.xlu1 %1179  ;;  %1463 = vmax.xlane.f32.xlu1 %v4429_v53  ;;  %v4439_v46 = vsel %vm1489_vm15, %v4422_v13, %v4427_v8  ;;  %v4454_v25 = vsel %vm1349_vm6, 1.0, %v4317_v21  ;;  %vm1353_vm14 = vcmp.eq.s32.totalorder %v6178_v34, %v1168_v42  ;;  %vm1354_vm7 = vcmp.eq.s32.totalorder %v6179_v63, %v1168_v42 }
 0x300   : > { %v1181_v7 = vcvt.f32.s32 %v1180_v51  ;;  %1479 = vmax.xlane.f32.xlu0 %v4432_v35  ;;  %v1492_v16 = vshra.s32 %v4439_v46, 16  ;;  %v1214_v45 = vcvt.f32.s32 %v4241_v54  ;;  %v4464_v10 = vsel %vm1353_vm14, 2147483648, %v6178_v34  ;;  %v6185_v51 = vld [vmem:[#allocation51_spill] sm:$0xff]  ;;  %v6196_v34 = vld [vmem:[#allocation56_spill] sm:$0xff] }
 0x301   : > { %v4469_v21 = vsel %vm1354_vm7, 2147483648, %v6179_v63  ;;  %vm6182_vm8 = vcmp.eq.s32.totalorder %v6180_v36, %v6181_v1  ;;  %v4482_v54 = vsel %vm1352_vm2, 1.0, %v4323_v20  ;;  %v1199_v60 = vshll.u32 %v1198_v31, 16 }
 0x302   : > { %v1038_v4 = vsel %vm6182_vm8, 1.0, %v6024_v26  ;;  %v1184_v43 = vadd.s32 %v1183_v17, %v1181_v7  ;;  %v1196_v39 = vpop.xlane.xlu0 %1195  ;;  %v4475_v30 = vcvt.s32.f32 %v1492_v16  ;;  %vm1505_vm0 = vcmp.gt.s32.totalorder %v4464_v10, %v4469_v21  ;;  %v6184_v17 = vld [vmem:[#allocation50_spill] sm:$0xff] }
 0x303   : > { %v1197_v40 = vcvt.f32.s32 %v1196_v39  ;;  %v4486_v55 = vsel %vm1505_vm0, %v4464_v10, %v4469_v21  ;;  %v4491_v15 = vsel %vm1351_vm13, 1.0, %v4329_v19  ;;  %vm6187_vm4 = vcmp.eq.s32.totalorder %v6186_v44, %v6181_v1  ;;  %v6189_v44 = vld [vmem:[#allocation53_spill] sm:$0xff] }
 0x304   : > { %6183 = vst [vmem:[#allocation42_spill] sm:$0xff] %v4491_v15  ;;  %vm1355_vm1 = vcmp.eq.s32.totalorder %v6184_v17, %v1184_v43  ;;  %vm1356_vm3 = vcmp.eq.s32.totalorder %v6185_v51, %v1184_v43  ;;  %1495 = vmax.xlane.f32.xlu1 %v4475_v30  ;;  %v1508_v20 = vshra.s32 %v4486_v55, 16  ;;  %v1037_v31 = vsel %vm6187_vm4, 1.0, %v6024_v26  ;;  %v6190_v26 = vld [vmem:[#allocation54_spill] sm:$0xff] }
 0x305   : > { %v4504_v7 = vsel %vm1355_vm1, 2147483648, %v6184_v17  ;;  %v4509_v19 = vsel %vm1356_vm3, 2147483648, %v6185_v51  ;;  %v1200_v37 = vadd.s32 %v1199_v60, %v1197_v40  ;;  %v1212_v11 = vpop.xlane.xlu1 %1211  ;;  %v4514_v16 = vsel %vm1354_vm7, 1.0, %v4335_v61  ;;  %v6201_v17 = vld [vmem:[#allocation26_spill] sm:$0xff] }
 0x306   : > { %6188 = vst [vmem:[#allocation43_spill] sm:$0xff] %v4514_v16  ;;  %v1215_v36 = vshll.u32 %v1214_v45, 16  ;;  %v1213_v1 = vcvt.f32.s32 %v1212_v11  ;;  %v4516_v39 = vcvt.s32.f32 %v1508_v20  ;;  %vm1521_vm5 = vcmp.gt.s32.totalorder %v4504_v7, %v4509_v19 }
 0x307   : > { %vm1357_vm6 = vcmp.eq.s32.totalorder %v6189_v44, %v1200_v37  ;;  %vm1358_vm9 = vcmp.eq.s32.totalorder %v6190_v26, %v1200_v37  ;;  %v4524_v60 = vsel %vm1521_vm5, %v4504_v7, %v4509_v19  ;;  %v4529_v61 = vsel %vm1353_vm14, 1.0, %v4341_v38 }
 0x308   : > { %6191 = vst [vmem:[#allocation44_spill] sm:$0xff] %v4529_v61  ;;  %v4534_v63 = vsel %vm1357_vm6, 2147483648, %v6189_v44  ;;  %v4539_v45 = vsel %vm1358_vm9, 2147483648, %v6190_v26  ;;  %v1216_v40 = vadd.s32 %v1215_v36, %v1213_v1  ;;  %1511 = vmax.xlane.f32.xlu0 %v4516_v39  ;;  %v1524_v20 = vshra.s32 %v4524_v60, 16  ;;  %v6197_v36 = vld [vmem:[#allocation57_spill] sm:$0xff] }
 0x309   : > { %6192 = vst [vmem:[#allocation45_spill] sm:$0xff] %v4534_v63  ;;  %6193 = vst [vmem:[#allocation22_spill] sm:$0xff] %v4539_v45  ;;  %v1230_v11 = vcvt.f32.s32 %v4246_v41  ;;  %vm1537_vm10 = vcmp.gt.s32.totalorder %v4534_v63, %v4539_v45  ;;  %v4549_v38 = vsel %vm1356_vm3, 1.0, %v4348_v29  ;;  %v4554_v42 = vsel %vm1355_vm1, 1.0, %v4413_v32  ;;  %v6206_v61 = vld [vmem:[#allocation25_spill] sm:$0xff] }
 0x30a   : > { %6194 = vst [vmem:[#allocation46_spill] sm:$0xff] %v4549_v38  ;;  %6195 = vst [vmem:[#allocation47_spill] sm:$0xff] %v4554_v42  ;;  %vm1359_vm12 = vcmp.eq.s32.totalorder %v6196_v34, %v1216_v40  ;;  %vm1360_vm13 = vcmp.eq.s32.totalorder %v6197_v36, %v1216_v40  ;;  %v4558_v1 = vcvt.s32.f32 %v1524_v20  ;;  %v4562_v41 = vsel %vm1537_vm10, %v4534_v63, %v4539_v45  ;;  %v6202_v42 = vld [vmem:[#allocation55_spill] sm:$0xff] }
 0x30b   : > { %v4567_v29 = vsel %vm1359_vm12, 2147483648, %v6196_v34  ;;  %v4570_v51 = vsel %vm1360_vm13, 2147483648, %v6197_v36  ;;  %v1540_v32 = vshra.s32 %v4562_v41, 16  ;;  %v6200_v43 = vmov 0.0   ;;  %v6213_v40 = vld [vmem:[#allocation27_spill] sm:$0xff]  ;;  %v6216_v34 = vld [vmem:[#allocation61_spill] sm:$0xff] }
 0x30c   : > { %6198 = vst [vmem:[#allocation48_spill] sm:$0xff] %v4567_v29  ;;  %6199 = vst [vmem:[#allocation49_spill] sm:$0xff] %v4570_v51  ;;  %vm6203_vm2 = vcmp.eq.s32.totalorder %v6201_v17, %v6202_v42  ;;  %1527 = vmax.xlane.f32.xlu1 %v4558_v1  ;;  %vm1553_vm15 = vcmp.gt.s32.totalorder %v4567_v29, %v4570_v51  ;;  %v4582_v38 = vsel %vm1358_vm9, 1.0, %v1038_v4  ;;  %v4586_v36 = vsel %vm1357_vm6, 1.0, %v1037_v31  ;;  %v1228_v17 = vpop.xlane.xlu0 %1227 }
 0x30d   : > { %v1040_v20 = vsel %vm6203_vm2, 1.0, %v6200_v43  ;;  %6204 = vst [vmem:[#allocation24_spill] sm:$0xff] %v4582_v38  ;;  %6205 = vst [vmem:[#allocation52_spill] sm:$0xff] %v4586_v36  ;;  %vm6207_vm14 = vcmp.eq.s32.totalorder %v6206_v61, %v6202_v42  ;;  %v4592_v15 = vcvt.s32.f32 %v1540_v32  ;;  %v4596_v45 = vsel %vm1553_vm15, %v4567_v29, %v4570_v51 }
 0x30e   : > { %v1039_v16 = vsel %vm6207_vm14, 1.0, %v6200_v43  ;;  %v4598_v63 = vsel %vm1360_vm13, 1.0, %v1040_v20  ;;  %v1231_v4 = vshll.u32 %v1230_v11, 16  ;;  %v1246_v31 = vcvt.f32.s32 %v4252_v48  ;;  %v6210_v20 = vld [vmem:[#allocation28_spill] sm:$0xff]  ;;  %v6215_v11 = vld [vmem:[#allocation30_spill] sm:$0xff] }
 0x30f   : > { %6208 = vst [vmem:[#allocation50_spill] sm:$0xff] %v4598_v63  ;;  %v4602_v26 = vsel %vm1359_vm12, 1.0, %v1039_v16  ;;  %v1229_v37 = vcvt.f32.s32 %v1228_v17  ;;  %v1556_v44 = vshra.s32 %v4596_v45, 16  ;;  %1543 = vmax.xlane.f32.xlu0 %v4592_v15  ;;  %v1262_v32 = vcvt.f32.s32 %v4256_v57  ;;  %v6211_v63 = vld [vmem:[#allocation58_spill] sm:$0xff]  ;;  %v6219_v57 = vld [vmem:[#allocation60_spill] sm:$0xff] }
 0x310   : > { %6209 = vst [vmem:[#allocation51_spill] sm:$0xff] %v4602_v26  ;;  %v1244_v36 = vpop.xlane.xlu1 %1243  ;;  %vm6212_vm7 = vcmp.eq.s32.totalorder %v6210_v20, %v6211_v63  ;;  %vm6214_vm8 = vcmp.eq.s32.totalorder %v6213_v40, %v6211_v63  ;;  %vm6217_vm0 = vcmp.eq.s32.totalorder %v6215_v11, %v6216_v34  ;;  %v1278_v11 = vcvt.f32.s32 %v4261_v52 }
 0x311   : > { %v1232_v61 = vadd.s32 %v1231_v4, %v1229_v37  ;;  %v4607_v42 = vcvt.s32.f32 %v1556_v44  ;;  %v1042_v16 = vsel %vm6212_vm7, 1.0, %v6200_v43  ;;  %v1041_v48 = vsel %vm6214_vm8, 1.0, %v6200_v43  ;;  %v6218_v37 = vld [vmem:[#allocation59_spill] sm:$0xff] }
 0x312   : > { %v1044_v17 = vsel %vm6217_vm0, 1.0, %v6200_v43  ;;  %v1247_v4 = vshll.u32 %v1246_v31, 16  ;;  %v1245_v44 = vcvt.f32.s32 %v1244_v36  ;;  %v6224_v36 = vld [vmem:[#allocation29_spill] sm:$0xff] }
 0x313   : > { %vm1361_vm1 = vcmp.eq.s32.totalorder %v6218_v37, %v1232_v61  ;;  %vm1362_vm3 = vcmp.eq.s32.totalorder %v6219_v57, %v1232_v61  ;;  %1559 = vmax.xlane.f32.xlu1 %v4607_v42  ;;  %vm6225_vm5 = vcmp.eq.s32.totalorder %v6224_v36, %v6216_v34  ;;  %v6231_v34 = vld [vmem:[#allocation31_spill] sm:$0xff] }
 0x314   : > { %v4626_v20 = vsel %vm1361_vm1, 2147483648, %v6218_v37  ;;  %v4629_v26 = vsel %vm1362_vm3, 2147483648, %v6219_v57  ;;  %v4631_v63 = vsel %vm1362_vm3, 1.0, %v1042_v16  ;;  %v4633_v40 = vsel %vm1361_vm1, 1.0, %v1041_v48  ;;  %v1260_v38 = vpop.xlane.xlu0 %1259  ;;  %v6226_v48 = vld [vmem:[#allocation32_spill] sm:$0xff] }
 0x315   : > { %6220 = vst [vmem:[#allocation23_spill] sm:$0xff] %v4626_v20  ;;  %6221 = vst [vmem:[#allocation53_spill] sm:$0xff] %v4629_v26  ;;  %v1248_v31 = vadd.s32 %v1247_v4, %v1245_v44  ;;  %vm1569_vm4 = vcmp.gt.s32.totalorder %v4626_v20, %v4629_v26  ;;  %v1043_v61 = vsel %vm6225_vm5, 1.0, %v6200_v43  ;;  %v1263_v37 = vshll.u32 %v1262_v32, 16  ;;  %v6227_v57 = vld [vmem:[#allocation64_spill] sm:$0xff]  ;;  %v6229_v4 = vld [vmem:[#allocation62_spill] sm:$0xff] }
 0x316   : > { %6222 = vst [vmem:[#allocation54_spill] sm:$0xff] %v4631_v63  ;;  %6223 = vst [vmem:[#allocation56_spill] sm:$0xff] %v4633_v40  ;;  %v1261_v51 = vcvt.f32.s32 %v1260_v38  ;;  %v4644_v16 = vsel %vm1569_vm4, %v4626_v20, %v4629_v26  ;;  %vm6228_vm6 = vcmp.eq.s32.totalorder %v6226_v48, %v6227_v57  ;;  %v6230_v44 = vld [vmem:[#allocation63_spill] sm:$0xff]  ;;  %vm6232_vm12 = vcmp.eq.s32.totalorder %v6231_v34, %v6227_v57  ;;  %v6237_v57 = vld [vmem:[#allocation65_spill] sm:$0xff] }
 0x317   : > { %v1046_v52 = vsel %vm6228_vm6, 1.0, %v6200_v43  ;;  %vm1363_vm9 = vcmp.eq.s32.totalorder %v6229_v4, %v1248_v31  ;;  %vm1364_vm10 = vcmp.eq.s32.totalorder %v6230_v44, %v1248_v31  ;;  %v1572_v40 = vshra.s32 %v4644_v16, 16  ;;  %v6238_v34 = vld [vmem:[#allocation66_spill] sm:$0xff] }
 0x318   : > { %v1045_v38 = vsel %vm6232_vm12, 1.0, %v6200_v43  ;;  %v4658_v32 = vsel %vm1363_vm9, 2147483648, %v6229_v4  ;;  %v4661_v36 = vsel %vm1364_vm10, 2147483648, %v6230_v44  ;;  %v1264_v63 = vadd.s32 %v1263_v37, %v1261_v51  ;;  %v1276_v20 = vpop.xlane.xlu1 %1275 }
 0x319   : > { %6233 = vst [vmem:[#allocation57_spill] sm:$0xff] %v4658_v32  ;;  %6234 = vst [vmem:[#allocation26_spill] sm:$0xff] %v4661_v36  ;;  %v4663_v48 = vsel %vm1364_vm10, 1.0, %v1044_v17  ;;  %v1279_v26 = vshll.u32 %v1278_v11, 16  ;;  %v4665_v29 = vcvt.s32.f32 %v1572_v40  ;;  %vm1585_vm13 = vcmp.gt.s32.totalorder %v4658_v32, %v4661_v36 }
 0x31a   : > { %6235 = vst [vmem:[#allocation55_spill] sm:$0xff] %v4663_v48  ;;  %v4669_v31 = vsel %vm1363_vm9, 1.0, %v1043_v61  ;;  %vm1365_vm2 = vcmp.eq.s32.totalorder %v6237_v57, %v1264_v63  ;;  %vm1366_vm15 = vcmp.eq.s32.totalorder %v6238_v34, %v1264_v63  ;;  %v1277_v4 = vcvt.f32.s32 %v1276_v20 }
 0x31b   : > { %6236 = vst [vmem:[#allocation25_spill] sm:$0xff] %v4669_v31  ;;  %v4675_v44 = vsel %vm1585_vm13, %v4658_v32, %v4661_v36  ;;  %v1294_v51 = vcvt.f32.s32 %v4266_v9  ;;  %v4679_v17 = vsel %vm1365_vm2, 2147483648, %v6237_v57  ;;  %v4682_v40 = vsel %vm1366_vm15, 2147483648, %v6238_v34  ;;  %1575 = vmax.xlane.f32.xlu0 %v4665_v29  ;;  %v6243_v57 = vld [vmem:[#allocation34_spill] sm:$0xff]  ;;  %v6244_v34 = vld [vmem:[#allocation67_spill] sm:$0xff]  ;;  %v6265_v36 = vld [vmem:[#allocation72_spill] sm:$0xff] }
 0x31c   : > { %6239 = vst [vmem:[#allocation28_spill] sm:$0xff] %v4679_v17  ;;  %6240 = vst [vmem:[#allocation58_spill] sm:$0xff] %v4682_v40  ;;  %v1588_v11 = vshra.s32 %v4675_v44, 16  ;;  %v1280_v61 = vadd.s32 %v1279_v26, %v1277_v4  ;;  %vm1601_vm14 = vcmp.gt.s32.totalorder %v4679_v17, %v4682_v40  ;;  %v4688_v20 = vsel %vm1366_vm15, 1.0, %v1046_v52  ;;  %v6246_v26 = vld [vmem:[#allocation33_spill] sm:$0xff]  ;;  %v6275_v32 = vld [vmem:[#allocation75_spill] sm:$0xff] }
 0x31d   : > { %6241 = vst [vmem:[#allocation27_spill] sm:$0xff] %v4688_v20  ;;  %v4690_v63 = vsel %vm1365_vm2, 1.0, %v1045_v38  ;;  %v4696_v9 = vsel %vm1601_vm14, %v4679_v17, %v4682_v40  ;;  %vm6245_vm7 = vcmp.eq.s32.totalorder %v6243_v57, %v6244_v34  ;;  %vm6247_vm8 = vcmp.eq.s32.totalorder %v6246_v26, %v6244_v34  ;;  %v6248_v38 = vld [vmem:[#allocation68_spill] sm:$0xff]  ;;  %v1292_v57 = vpop.xlane.xlu0 %1291 }
 0x31e   : > { %6242 = vst [vmem:[#allocation30_spill] sm:$0xff] %v4690_v63  ;;  %v4692_v37 = vcvt.s32.f32 %v1588_v11  ;;  %v1048_v31 = vsel %vm6245_vm7, 1.0, %v6200_v43  ;;  %v1047_v4 = vsel %vm6247_vm8, 1.0, %v6200_v43  ;;  %v1310_v52 = vcvt.f32.s32 %v4272_v59  ;;  %v6249_v11 = vld [vmem:[#allocation69_spill] sm:$0xff] }
 0x31f   : > { %vm1367_vm0 = vcmp.eq.s32.totalorder %v6248_v38, %v1280_v61  ;;  %vm1368_vm1 = vcmp.eq.s32.totalorder %v6249_v11, %v1280_v61  ;;  %v1604_v63 = vshra.s32 %v4696_v9, 16  ;;  %v1295_v59 = vshll.u32 %v1294_v51, 16 }
 0x320   : > { %v4711_v20 = vsel %vm1367_vm0, 2147483648, %v6248_v38  ;;  %v4714_v40 = vsel %vm1368_vm1, 2147483648, %v6249_v11  ;;  %1591 = vmax.xlane.f32.xlu1 %v4692_v37  ;;  %v4717_v17 = vsel %vm1368_vm1, 1.0, %v1048_v31  ;;  %v4719_v34 = vsel %vm1367_vm0, 1.0, %v1047_v4  ;;  %v6254_v4 = vld [vmem:[#allocation70_spill] sm:$0xff] }
 0x321   : > { %6250 = vst [vmem:[#allocation61_spill] sm:$0xff] %v4711_v20  ;;  %6251 = vst [vmem:[#allocation59_spill] sm:$0xff] %v4714_v40  ;;  %v1293_v26 = vcvt.f32.s32 %v1292_v57  ;;  %v4721_v48 = vcvt.s32.f32 %v1604_v63  ;;  %vm1617_vm3 = vcmp.gt.s32.totalorder %v4711_v20, %v4714_v40  ;;  %v1311_v31 = vshll.u32 %v1310_v52, 16  ;;  %v6256_v63 = vld [vmem:[#allocation35_spill] sm:$0xff] }
 0x322   : > { %6252 = vst [vmem:[#allocation60_spill] sm:$0xff] %v4717_v17  ;;  %6253 = vst [vmem:[#allocation29_spill] sm:$0xff] %v4719_v34  ;;  %v4727_v61 = vsel %vm1617_vm3, %v4711_v20, %v4714_v40  ;;  %vm6255_vm4 = vcmp.eq.s32.totalorder %v3598_v50, %v6254_v4  ;;  %vm6257_vm5 = vcmp.eq.s32.totalorder %v6256_v63, %v6254_v4  ;;  %v1326_v34 = vcvt.f32.s32 %v4276_v3 }
 0x323   : > { %v1296_v38 = vadd.s32 %v1295_v59, %v1293_v26  ;;  %1607 = vmax.xlane.f32.xlu0 %v4721_v48  ;;  %v1620_v11 = vshra.s32 %v4727_v61, 16  ;;  %v1050_v51 = vsel %vm6255_vm4, 1.0, %v6200_v43  ;;  %v1049_v57 = vsel %vm6257_vm5, 1.0, %v6200_v43  ;;  %v1308_v59 = vpop.xlane.xlu1 %1307 }
 0x324   : > { %v1309_v17 = vcvt.f32.s32 %v1308_v59  ;;  %v1342_v59 = vcvt.f32.s32 %v4281_v33 }
 0x325   : > { %vm1369_vm6 = vcmp.eq.s32.totalorder %v4101_v47, %v1296_v38  ;;  %vm1370_vm9 = vcmp.eq.s32.totalorder %v4107_v0, %v1296_v38  ;;  %v4742_v26 = vcvt.s32.f32 %v1620_v11 }
 0x326   : > { %v4745_v52 = vsel %vm1369_vm6, 2147483648, %v4101_v47  ;;  %v4748_v50 = vsel %vm1370_vm9, 2147483648, %v4107_v0  ;;  %v4750_v40 = vsel %vm1370_vm9, 1.0, %v1050_v51  ;;  %v4755_v3 = vsel %vm1369_vm6, 1.0, %v1049_v57  ;;  %v1324_v4 = vpop.xlane.xlu0 %1323  ;;  %v6262_v47 = vld [vmem:[#allocation37_spill] sm:$0xff]  ;;  %v6263_v0 = vld [vmem:[#allocation71_spill] sm:$0xff] }
 0x327   : > { %6258 = vst [vmem:[#allocation32_spill] sm:$0xff] %v4745_v52  ;;  %6259 = vst [vmem:[#allocation64_spill] sm:$0xff] %v4748_v50  ;;  %1623 = vmax.xlane.f32.xlu1 %v4742_v26  ;;  %vm1633_vm10 = vcmp.gt.s32.totalorder %v4745_v52, %v4748_v50  ;;  %v1312_v38 = vadd.s32 %v1311_v31, %v1309_v17  ;;  %vm6264_vm12 = vcmp.eq.s32.totalorder %v6262_v47, %v6263_v0  ;;  %v6266_v57 = vld [vmem:[#allocation73_spill] sm:$0xff]  ;;  %v6267_v17 = vld [vmem:[#allocation36_spill] sm:$0xff] }
 0x328   : > { %6260 = vst [vmem:[#allocation62_spill] sm:$0xff] %v4750_v40  ;;  %6261 = vst [vmem:[#allocation63_spill] sm:$0xff] %v4755_v3  ;;  %v4759_v11 = vsel %vm1633_vm10, %v4745_v52, %v4748_v50  ;;  %v1052_v63 = vsel %vm6264_vm12, 1.0, %v6200_v43  ;;  %v1327_v51 = vshll.u32 %v1326_v34, 16  ;;  %v1325_v40 = vcvt.f32.s32 %v1324_v4  ;;  %v6270_v50 = vld [vmem:[#allocation74_spill] sm:$0xff] }
 0x329   : > { %v1636_v20 = vshra.s32 %v4759_v11, 16  ;;  %vm1371_vm13 = vcmp.eq.s32.totalorder %v6265_v36, %v1312_v38  ;;  %vm1372_vm2 = vcmp.eq.s32.totalorder %v6266_v57, %v1312_v38  ;;  %vm6268_vm15 = vcmp.eq.s32.totalorder %v6267_v17, %v6263_v0  ;;  %v6273_v17 = vld [vmem:[#allocation38_spill] sm:$0xff] }
 0x32a   : > { %v1051_v31 = vsel %vm6268_vm15, 1.0, %v6200_v43  ;;  %v1054_v47 = vsel %vm1022_vm11, 1.0, %v6200_v43  ;;  %v4778_v34 = vsel %vm1371_vm13, 2147483648, %v6265_v36  ;;  %v4781_v33 = vsel %vm1372_vm2, 2147483648, %v6266_v57  ;;  %v6276_v57 = vld [vmem:[#allocation76_spill] sm:$0xff] }
 0x32b   : > { %v1328_v4 = vadd.s32 %v1327_v51, %v1325_v40  ;;  %v4783_v52 = vcvt.s32.f32 %v1636_v20  ;;  %vm1649_vm14 = vcmp.gt.s32.totalorder %v4778_v34, %v4781_v33  ;;  %v4787_v38 = vsel %vm1372_vm2, 1.0, %v1052_v63  ;;  %v1340_v40 = vpop.xlane.xlu1 %1339 }
 0x32c   : > { %6271 = vst [vmem:[#allocation31_spill] sm:$0xff] %v4787_v38  ;;  %v4789_v0 = vsel %vm1371_vm13, 1.0, %v1051_v31  ;;  %vm6274_vm11 = vcmp.eq.s32.totalorder %v6273_v17, %v6270_v50  ;;  %v1343_v36 = vshll.u32 %v1342_v59, 16  ;;  %v4800_v20 = vsel %vm1649_vm14, %v4778_v34, %v4781_v33  ;;  %v6280_v38 = vld [vmem:[#allocation78_spill] sm:$0xff] }
 0x32d   : > { %6272 = vst [vmem:[#allocation65_spill] sm:$0xff] %v4789_v0  ;;  %v1053_v3 = vsel %vm6274_vm11, 1.0, %v6200_v43  ;;  %vm1373_vm7 = vcmp.eq.s32.totalorder %v6275_v32, %v1328_v4  ;;  %vm1374_vm8 = vcmp.eq.s32.totalorder %v6276_v57, %v1328_v4  ;;  %1639 = vmax.xlane.f32.xlu0 %v4783_v52  ;;  %v1341_v50 = vcvt.f32.s32 %v1340_v40  ;;  %v6281_v40 = vld [vmem:[#allocation79_spill] sm:$0xff] }
 0x32e   : > { %v4803_v63 = vsel %vm1373_vm7, 2147483648, %v6275_v32  ;;  %v4806_v51 = vsel %vm1374_vm8, 2147483648, %v6276_v57  ;;  %v1652_v59 = vshra.s32 %v4800_v20, 16  ;;  %v4811_v31 = vsel %vm1374_vm8, 1.0, %v1054_v47  ;;  %v6282_v47 = vld [vmem:[#allocation41_spill] sm:$0xff] }
 0x32f   : > { %6277 = vst [vmem:[#allocation66_spill] sm:$0xff] %v4806_v51  ;;  %vm1665_vm0 = vcmp.gt.s32.totalorder %v4803_v63, %v4806_v51  ;;  %6278 = vst [vmem:[#allocation34_spill] sm:$0xff] %v4811_v31  ;;  %v4813_v4 = vsel %vm1373_vm7, 1.0, %v1053_v3  ;;  %v1344_v17 = vadd.s32 %v1343_v36, %v1341_v50  ;;  %v6283_v31 = vld [vmem:[#allocation77_spill] sm:$0xff] }
 0x330   : > { %6279 = vst [vmem:[#allocation67_spill] sm:$0xff] %v4813_v4  ;;  %v4815_v0 = vcvt.s32.f32 %v1652_v59  ;;  %v4819_v32 = vsel %vm1665_vm0, %v4803_v63, %v4806_v51  ;;  %vm6284_vm4 = vcmp.eq.s32.totalorder %v6282_v47, %v6283_v31  ;;  %v6287_v4 = vld [vmem:[#allocation40_spill] sm:$0xff] }
 0x331   : > { %v1668_v57 = vshra.s32 %v4819_v32, 16  ;;  %vm1375_vm1 = vcmp.eq.s32.totalorder %v6280_v38, %v1344_v17  ;;  %vm1376_vm3 = vcmp.eq.s32.totalorder %v6281_v40, %v1344_v17  ;;  %v1056_v3 = vsel %vm6284_vm4, 1.0, %v6200_v43 }
 0x332   : > { %1655 = vmax.xlane.f32.xlu1 %v4815_v0  ;;  %v4830_v36 = vsel %vm1375_vm1, 2147483648, %v6280_v38  ;;  %v4833_v50 = vsel %vm1376_vm3, 2147483648, %v6281_v40  ;;  %vm6288_vm5 = vcmp.eq.s32.totalorder %v6287_v4, %v6283_v31  ;;  %v4843_v51 = vsel %vm1376_vm3, 1.0, %v1056_v3 }
 0x333   : > { %6285 = vst [vmem:[#allocation33_spill] sm:$0xff] %v4830_v36  ;;  %6286 = vst [vmem:[#allocation68_spill] sm:$0xff] %v4833_v50  ;;  %v4835_v59 = vcvt.s32.f32 %v1668_v57  ;;  %v1055_v17 = vsel %vm6288_vm5, 1.0, %v6200_v43  ;;  %vm1681_vm6 = vcmp.gt.s32.totalorder %v4830_v36, %v4833_v50  ;;  %v1443_v43 = vand.u32 65535, %v4376_v18 }
 0x334   : > { %6289 = vst [vmem:[#allocation69_spill] sm:$0xff] %v4843_v51  ;;  %v4845_v47 = vsel %vm1375_vm1, 1.0, %v1055_v17  ;;  %v4850_v38 = vsel %vm1681_vm6, %v4830_v36, %v4833_v50  ;;  %v1459_v31 = vand.u32 65535, %v4400_v2  ;;  %v1475_v17 = vand.u32 65535, %v4407_v58 }
 0x335   : > { %6290 = vst [vmem:[#allocation70_spill] sm:$0xff] %v4845_v47  ;;  %1671 = vmax.xlane.f32.xlu0 %v4835_v59  ;;  %v1684_v57 = vshra.s32 %v4850_v38, 16  ;;  %v1445_v3 = vcvt.s32.f32 %v1443_v43  ;;  %v1491_v2 = vand.u32 65535, %v4439_v46  ;;  %v1507_v43 = vand.u32 65535, %v4486_v55 }
 0x336   : > { %v1477_v18 = vcvt.s32.f32 %v1475_v17 }
 0x337   : > { %v4853_v40 = vcvt.s32.f32 %v1684_v57  ;;  %v1461_v57 = vcvt.s32.f32 %v1459_v31  ;;  %v1509_v46 = vcvt.s32.f32 %v1507_v43  ;;  %v1587_v43 = vand.u32 65535, %v4675_v44 }
 0x338   : > { %v1619_v44 = vand.u32 65535, %v4727_v61 }
 0x339   : > { %1687 = vmax.xlane.f32.xlu1 %v4853_v40 }
 0x385   : > { %v4858_v4 = vpop.xlane.xlu0 %1447 }
 0x386   : > { %vm1449_vm9 = vcmp.eq.f32.partialorder %v4396_v49, %v4858_v4 }
 0x387   : > { %v1450_v47 = vsel %vm1449_vm9, %v1445_v3, -inf  ;;  %v1523_v3 = vand.u32 65535, %v4524_v60 }
 0x388   : > { %1451 = vmax.xlane.f32.xlu0 %v1450_v47  ;;  %v4863_v51 = vpop.xlane.xlu1 %1463  ;;  %v1493_v47 = vcvt.s32.f32 %v1491_v2 }
 0x389   : > { %v4865_v50 = vpop.xlane.xlu0 %1479  ;;  %vm1465_vm10 = vcmp.eq.f32.partialorder %v4429_v53, %v4863_v51  ;;  %v1525_v55 = vcvt.s32.f32 %v1523_v3  ;;  %v1589_v3 = vcvt.s32.f32 %v1587_v43  ;;  %v1470_v43 = vcvt.f32.s32 %v4863_v51 }
 0x38a   : > { %v1466_v36 = vsel %vm1465_vm10, %v1461_v57, -inf  ;;  %vm1481_vm12 = vcmp.eq.f32.partialorder %v4432_v35, %v4865_v50  ;;  %v1555_v57 = vand.u32 65535, %v4596_v45 }
 0x38b   : > { %1467 = vmax.xlane.f32.xlu1 %v1466_v36  ;;  %v1482_v58 = vsel %vm1481_vm12, %v1477_v18, -inf  ;;  %v1539_v36 = vand.u32 65535, %v4562_v41 }
 0x38c   : > { %1483 = vmax.xlane.f32.xlu0 %v1482_v58  ;;  %v1557_v41 = vcvt.s32.f32 %v1555_v57 }
 0x38d   : > { %v4872_v49 = vpop.xlane.xlu1 %1495  ;;  %v1541_v60 = vcvt.s32.f32 %v1539_v36 }
 0x38e   : > { %vm1497_vm13 = vcmp.eq.f32.partialorder %v4475_v30, %v4872_v49 }
 0x38f   : > { %v1498_v31 = vsel %vm1497_vm13, %v1493_v47, -inf }
 0x390   : > { %1499 = vmax.xlane.f32.xlu1 %v1498_v31  ;;  %v1603_v31 = vand.u32 65535, %v4696_v9  ;;  %v1621_v9 = vcvt.s32.f32 %v1619_v44 }
 0x391   : > { %v4877_v53 = vpop.xlane.xlu0 %1511 }
 0x392   : > { %vm1513_vm2 = vcmp.eq.f32.partialorder %v4516_v39, %v4877_v53 }
 0x393   : > { %v1514_v35 = vsel %vm1513_vm2, %v1509_v46, -inf }
 0x394   : > { %1515 = vmax.xlane.f32.xlu0 %v1514_v35  ;;  %v1605_v35 = vcvt.s32.f32 %v1603_v31 }
 0x395   : > { %v4883_v17 = vpop.xlane.xlu1 %1527 }
 0x396   : > { %vm1529_vm15 = vcmp.eq.f32.partialorder %v4558_v1, %v4883_v17  ;;  %v1571_v1 = vand.u32 65535, %v4644_v16 }
 0x397   : > { %v1530_v30 = vsel %vm1529_vm15, %v1525_v55, -inf }
 0x398   : > { %v4888_v18 = vpop.xlane.xlu0 %1543  ;;  %1531 = vmax.xlane.f32.xlu1 %v1530_v30  ;;  %v1573_v47 = vcvt.s32.f32 %v1571_v1 }
 0x399   : > { %vm1545_vm14 = vcmp.eq.f32.partialorder %v4592_v15, %v4888_v18 }
 0x39a   : > { %v1546_v39 = vsel %vm1545_vm14, %v1541_v60, -inf  ;;  %v1667_v60 = vand.u32 65535, %v4819_v32 }
 0x39b   : > { %1547 = vmax.xlane.f32.xlu0 %v1546_v39 }
 0x39c   : > { %v4892_v2 = vpop.xlane.xlu1 %1559 }
 0x39d   : > { %vm1561_vm11 = vcmp.eq.f32.partialorder %v4607_v42, %v4892_v2 }
 0x39e   : > { %v1562_v58 = vsel %vm1561_vm11, %v1557_v41, -inf }
 0x39f   : > { %1563 = vmax.xlane.f32.xlu1 %v1562_v58  ;;  %v1669_v58 = vcvt.s32.f32 %v1667_v60 }
 0x3a4   : > { %v4897_v45 = vpop.xlane.xlu0 %1575 }
 0x3a5   : > { %vm1577_vm7 = vcmp.eq.f32.partialorder %v4665_v29, %v4897_v45 }
 0x3a6   : > { %v1578_v15 = vsel %vm1577_vm7, %v1573_v47, -inf }
 0x3a7   : > { %1579 = vmax.xlane.f32.xlu0 %v1578_v15  ;;  %v1486_v15 = vcvt.f32.s32 %v4865_v50 }
 0x3a9   : > { %v4903_v46 = vpop.xlane.xlu1 %1591  ;;  %v1487_v44 = vshll.u32 %v1486_v15, 16 }
 0x3aa   : > { %vm1593_vm8 = vcmp.eq.f32.partialorder %v4692_v37, %v4903_v46  ;;  %v1635_v37 = vand.u32 65535, %v4759_v11 }
 0x3ab   : > { %v1594_v42 = vsel %vm1593_vm8, %v1589_v3, -inf }
 0x3ac   : > { %v4907_v16 = vpop.xlane.xlu0 %1607  ;;  %1595 = vmax.xlane.f32.xlu1 %v1594_v42  ;;  %v1637_v57 = vcvt.s32.f32 %v1635_v37 }
 0x3ad   : > { %vm1609_vm0 = vcmp.eq.f32.partialorder %v4721_v48, %v4907_v16  ;;  %v1651_v48 = vand.u32 65535, %v4800_v20 }
 0x3ae   : > { %v1610_v29 = vsel %vm1609_vm0, %v1605_v35, -inf  ;;  %v1471_v35 = vshll.u32 %v1470_v43, 16 }
 0x3af   : > { %1611 = vmax.xlane.f32.xlu0 %v1610_v29  ;;  %v1653_v41 = vcvt.s32.f32 %v1651_v48  ;;  %v1502_v29 = vcvt.f32.s32 %v4872_v49 }
 0x3b0   : > { %v4912_v36 = vpop.xlane.xlu1 %1623 }
 0x3b1   : > { %vm1625_vm1 = vcmp.eq.f32.partialorder %v4742_v26, %v4912_v36  ;;  %v1503_v48 = vshll.u32 %v1502_v29, 16 }
 0x3b2   : > { %v1626_v55 = vsel %vm1625_vm1, %v1621_v9, -inf }
 0x3b3   : > { %1627 = vmax.xlane.f32.xlu1 %v1626_v55 }
 0x3b6   : > { %v4917_v30 = vpop.xlane.xlu0 %1639 }
 0x3b7   : > { %vm1641_vm3 = vcmp.eq.f32.partialorder %v4783_v52, %v4917_v30  ;;  %v1683_v52 = vand.u32 65535, %v4850_v38 }
 0x3b8   : > { %v1642_v61 = vsel %vm1641_vm3, %v1637_v57, -inf }
 0x3b9   : > { %1643 = vmax.xlane.f32.xlu0 %v1642_v61  ;;  %v1685_v32 = vcvt.s32.f32 %v1683_v52 }
 0x3bb   : > { %v4923_v39 = vpop.xlane.xlu1 %1655 }
 0x3bc   : > { %vm1657_vm4 = vcmp.eq.f32.partialorder %v4815_v0, %v4923_v39  ;;  %v1454_v0 = vcvt.f32.s32 %v4858_v4 }
 0x3bd   : > { %v1658_v26 = vsel %vm1657_vm4, %v1653_v41, -inf }
 0x3be   : > { %v4927_v11 = vpop.xlane.xlu0 %1671  ;;  %1659 = vmax.xlane.f32.xlu1 %v1658_v26 }
 0x3bf   : > { %vm1673_vm5 = vcmp.eq.f32.partialorder %v4835_v59, %v4927_v11  ;;  %v1455_v59 = vshll.u32 %v1454_v0, 16 }
 0x3c0   : > { %v1674_v20 = vsel %vm1673_vm5, %v1669_v58, -inf }
 0x3c1   : > { %1675 = vmax.xlane.f32.xlu0 %v1674_v20 }
 0x3c2   : > { %v4932_v1 = vpop.xlane.xlu1 %1687 }
 0x3c3   : > { %vm1689_vm6 = vcmp.eq.f32.partialorder %v4853_v40, %v4932_v1  ;;  %v1518_v40 = vcvt.f32.s32 %v4877_v53 }
 0x3c4   : > { %v1690_v47 = vsel %vm1689_vm6, %v1685_v32, -inf  ;;  %v1534_v32 = vcvt.f32.s32 %v4883_v17 }
 0x3c5   : > { %1691 = vmax.xlane.f32.xlu1 %v1690_v47  ;;  %v1519_v60 = vshll.u32 %v1518_v40, 16  ;;  %v1566_v40 = vcvt.f32.s32 %v4892_v2 }
 0x411   : > { %v1452_v31 = vpop.xlane.xlu0 %1451 }
 0x412   : > { %v1453_v3 = vcvt.f32.s32 %v1452_v31 }
 0x414   : > { %v1456_v38 = vadd.s32 %v1455_v59, %v1453_v3  ;;  %v1468_v42 = vpop.xlane.xlu1 %1467  ;;  %v1550_v59 = vcvt.f32.s32 %v4888_v18 }
 0x415   : > { %v1469_v9 = vcvt.f32.s32 %v1468_v42  ;;  %v1484_v55 = vpop.xlane.xlu0 %1483  ;;  %v1535_v42 = vshll.u32 %v1534_v32, 16 }
 0x416   : > { %vm1697_vm9 = vcmp.eq.s32.totalorder %v4353_v22, %v1456_v38  ;;  %vm1698_vm10 = vcmp.eq.s32.totalorder %v4356_v27, %v1456_v38  ;;  %v1485_v51 = vcvt.f32.s32 %v1484_v55 }
 0x417   : > { %v1472_v4 = vadd.s32 %v1471_v35, %v1469_v9  ;;  %v4944_v50 = vsel %vm1697_vm9, 2147483648, %v4353_v22  ;;  %v4947_v37 = vsel %vm1698_vm10, 2147483648, %v4356_v27  ;;  %v4950_v57 = vsel %vm1698_vm10, 1.0, %v4358_v62 }
 0x418   : > { %v1488_v49 = vadd.s32 %v1487_v44, %v1485_v51  ;;  %vm1793_vm12 = vcmp.gt.s32.totalorder %v4944_v50, %v4947_v37  ;;  %v4955_v53 = vsel %vm1697_vm9, 1.0, %v4360_v24 }
 0x419   : > { %vm1699_vm13 = vcmp.eq.s32.totalorder %v4369_v14, %v1472_v4  ;;  %vm1700_vm2 = vcmp.eq.s32.totalorder %v4372_v28, %v1472_v4  ;;  %v1500_v22 = vpop.xlane.xlu1 %1499  ;;  %v4961_v27 = vsel %vm1793_vm12, %v4944_v50, %v4947_v37  ;;  %v1551_v4 = vshll.u32 %v1550_v59, 16 }
 0x41a   : > { %vm1701_vm15 = vcmp.eq.s32.totalorder %v4387_v12, %v1488_v49  ;;  %vm1702_vm14 = vcmp.eq.s32.totalorder %v4392_v6, %v1488_v49  ;;  %v1501_v62 = vcvt.f32.s32 %v1500_v22  ;;  %v1796_v61 = vshra.s32 %v4961_v27, 16 }
 0x41b   : > { %v4969_v24 = vsel %vm1701_vm15, 2147483648, %v4387_v12  ;;  %v4974_v41 = vsel %vm1702_vm14, 2147483648, %v4392_v6  ;;  %v4979_v26 = vsel %vm1699_vm13, 2147483648, %v4369_v14  ;;  %v4988_v20 = vsel %vm1700_vm2, 2147483648, %v4372_v28 }
 0x41c   : > { %v4981_v58 = vadd.s32 %v1503_v48, %v1501_v62  ;;  %v4983_v52 = vcvt.s32.f32 %v1796_v61  ;;  %vm1825_vm11 = vcmp.gt.s32.totalorder %v4969_v24, %v4974_v41  ;;  %vm1809_vm7 = vcmp.gt.s32.totalorder %v4979_v26, %v4988_v20 }
 0x41d   : > { %v1516_v47 = vpop.xlane.xlu0 %1515  ;;  %v4997_v0 = vsel %vm1825_vm11, %v4969_v24, %v4974_v41  ;;  %v5002_v43 = vsel %vm1700_vm2, 1.0, %v4378_v5  ;;  %v5011_v15 = vsel %vm1809_vm7, %v4979_v26, %v4988_v20  ;;  %v5039_v9 = vsel %vm1699_vm13, 1.0, %v4444_v56 }
 0x41e   : > { %vm1703_vm8 = vcmp.eq.s32.totalorder %v4422_v13, %v4981_v58  ;;  %vm1704_vm0 = vcmp.eq.s32.totalorder %v4427_v8, %v4981_v58  ;;  %v1517_v17 = vcvt.f32.s32 %v1516_v47  ;;  %1799 = vmax.xlane.f32.xlu0 %v4983_v52  ;;  %v1812_v31 = vshra.s32 %v5011_v15, 16 }
 0x41f   : > { %v5017_v28 = vsel %vm1703_vm8, 2147483648, %v4422_v13  ;;  %v5023_v5 = vsel %vm1704_vm0, 2147483648, %v4427_v8  ;;  %v1828_v38 = vshra.s32 %v4997_v0, 16  ;;  %v5064_v2 = vsel %vm1702_vm14, 1.0, %v4449_v23 }
 0x420   : > { %v1520_v3 = vadd.s32 %v1519_v60, %v1517_v17  ;;  %vm1841_vm1 = vcmp.gt.s32.totalorder %v5017_v28, %v5023_v5  ;;  %v5030_v44 = vcvt.s32.f32 %v1812_v31  ;;  %v5075_v32 = vsel %vm1701_vm15, 1.0, %v4454_v25 }
 0x421   : > { %v1532_v35 = vpop.xlane.xlu1 %1531  ;;  %v5034_v29 = vsel %vm1841_vm1, %v5017_v28, %v5023_v5  ;;  %v5043_v55 = vcvt.s32.f32 %v1828_v38  ;;  %v1567_v23 = vshll.u32 %v1566_v40, 16  ;;  %v5099_v59 = vsel %vm1704_vm0, 1.0, %v4482_v54  ;;  %v6294_v38 = vld [vmem:[#allocation45_spill] sm:$0xff] }
 0x422   : > { %vm1705_vm3 = vcmp.eq.s32.totalorder %v4464_v10, %v1520_v3  ;;  %vm1706_vm4 = vcmp.eq.s32.totalorder %v4469_v21, %v1520_v3  ;;  %v1533_v18 = vcvt.f32.s32 %v1532_v35  ;;  %1815 = vmax.xlane.f32.xlu1 %v5030_v44  ;;  %v1844_v56 = vshra.s32 %v5034_v29, 16 }
 0x423   : > { %v5049_v51 = vsel %vm1705_vm3, 2147483648, %v4464_v10  ;;  %v5054_v14 = vsel %vm1706_vm4, 2147483648, %v4469_v21  ;;  %1831 = vmax.xlane.f32.xlu0 %v5043_v55  ;;  %v6308_v10 = vld [vmem:[#allocation24_spill] sm:$0xff] }
 0x424   : > { %6291 = vst [vmem:[#allocation35_spill] sm:$0xff] %v5049_v51  ;;  %v1536_v48 = vadd.s32 %v1535_v42, %v1533_v18  ;;  %v1548_v22 = vpop.xlane.xlu0 %1547  ;;  %vm1857_vm5 = vcmp.gt.s32.totalorder %v5049_v51, %v5054_v14  ;;  %v5066_v61 = vcvt.s32.f32 %v1844_v56  ;;  %v6295_v42 = vld [vmem:[#allocation22_spill] sm:$0xff]  ;;  %v1582_v56 = vcvt.f32.s32 %v4897_v45 }
 0x425   : > { %v1549_v62 = vcvt.f32.s32 %v1548_v22  ;;  %v5070_v60 = vsel %vm1857_vm5, %v5049_v51, %v5054_v14 }
 0x426   : > { %vm1707_vm6 = vcmp.eq.s32.totalorder %v4504_v7, %v1536_v48  ;;  %vm1708_vm9 = vcmp.eq.s32.totalorder %v4509_v19, %v1536_v48  ;;  %v1860_v6 = vshra.s32 %v5070_v60, 16  ;;  %1847 = vmax.xlane.f32.xlu1 %v5066_v61 }
 0x427   : > { %v5083_v47 = vsel %vm1707_vm6, 2147483648, %v4504_v7  ;;  %v5088_v17 = vsel %vm1708_vm9, 2147483648, %v4509_v19  ;;  %v1552_v12 = vadd.s32 %v1551_v4, %v1549_v62  ;;  %v6298_v4 = vld [vmem:[#allocation42_spill] sm:$0xff]  ;;  %v6299_v62 = vld [vmem:[#allocation43_spill] sm:$0xff]  ;;  %v1583_v19 = vshll.u32 %v1582_v56, 16 }
 0x428   : > { %6292 = vst [vmem:[#allocation37_spill] sm:$0xff] %v5083_v47  ;;  %6293 = vst [vmem:[#allocation71_spill] sm:$0xff] %v5088_v17  ;;  %v1564_v25 = vpop.xlane.xlu1 %1563  ;;  %v5091_v31 = vcvt.s32.f32 %v1860_v6  ;;  %vm1873_vm10 = vcmp.gt.s32.totalorder %v5083_v47, %v5088_v17  ;;  %v5126_v22 = vsel %vm1703_vm8, 1.0, %v6298_v4  ;;  %v5131_v6 = vsel %vm1706_vm4, 1.0, %v6299_v62  ;;  %v6306_v62 = vld [vmem:[#allocation46_spill] sm:$0xff] }
 0x429   : > { %v1565_v49 = vcvt.f32.s32 %v1564_v25  ;;  %vm1709_vm12 = vcmp.eq.s32.totalorder %v6294_v38, %v1552_v12  ;;  %vm1710_vm13 = vcmp.eq.s32.totalorder %v6295_v42, %v1552_v12  ;;  %v5105_v35 = vsel %vm1873_vm10, %v5083_v47, %v5088_v17  ;;  %6300 = vst [vmem:[#allocation36_spill] sm:$0xff] %v5131_v6  ;;  %v6302_v25 = vld [vmem:[#allocation49_spill] sm:$0xff]  ;;  %v6307_v6 = vld [vmem:[#allocation47_spill] sm:$0xff]  ;;  %v6311_v7 = vld [vmem:[#allocation50_spill] sm:$0xff] }
 0x42a   : > { %v5110_v18 = vsel %vm1709_vm12, 2147483648, %v6294_v38  ;;  %v5115_v40 = vsel %vm1710_vm13, 2147483648, %v6295_v42  ;;  %1863 = vmax.xlane.f32.xlu0 %v5091_v31  ;;  %v1876_v54 = vshra.s32 %v5105_v35, 16  ;;  %v5174_v51 = vsel %vm1707_vm6, 1.0, %v6307_v6  ;;  %v6313_v42 = vld [vmem:[#allocation51_spill] sm:$0xff]  ;;  %v6316_v38 = vld [vmem:[#allocation53_spill] sm:$0xff] }
 0x42b   : > { %6296 = vst [vmem:[#allocation72_spill] sm:$0xff] %v5110_v18  ;;  %6297 = vst [vmem:[#allocation73_spill] sm:$0xff] %v5115_v40  ;;  %v1568_v8 = vadd.s32 %v1567_v23, %v1565_v49  ;;  %vm1889_vm2 = vcmp.gt.s32.totalorder %v5110_v18, %v5115_v40  ;;  %v6301_v23 = vld [vmem:[#allocation48_spill] sm:$0xff]  ;;  %v5179_v3 = vsel %vm1710_vm13, 1.0, %v6308_v10  ;;  %v1614_v6 = vcvt.f32.s32 %v4907_v16  ;;  %v6315_v12 = vld [vmem:[#allocation23_spill] sm:$0xff] }
 0x42c   : > { %v5135_v49 = vcvt.s32.f32 %v1876_v54  ;;  %v5139_v45 = vsel %vm1889_vm2, %v5110_v18, %v5115_v40  ;;  %v6305_v54 = vld [vmem:[#allocation44_spill] sm:$0xff]  ;;  %v5163_v18 = vsel %vm1708_vm9, 1.0, %v6306_v62  ;;  %6309 = vst [vmem:[#allocation38_spill] sm:$0xff] %v5179_v3 }
 0x42d   : > { %vm1711_vm15 = vcmp.eq.s32.totalorder %v6301_v23, %v1568_v8  ;;  %vm1712_vm14 = vcmp.eq.s32.totalorder %v6302_v25, %v1568_v8  ;;  %v1892_v58 = vshra.s32 %v5139_v45, 16  ;;  %v5158_v4 = vsel %vm1705_vm3, 1.0, %v6305_v54 }
 0x42e   : > { %v5144_v13 = vsel %vm1711_vm15, 2147483648, %v6301_v23  ;;  %v5149_v21 = vsel %vm1712_vm14, 2147483648, %v6302_v25  ;;  %1879 = vmax.xlane.f32.xlu1 %v5135_v49  ;;  %v1598_v54 = vcvt.f32.s32 %v4903_v46  ;;  %v5192_v48 = vsel %vm1712_vm14, 1.0, %v6311_v7  ;;  %v6319_v23 = vld [vmem:[#allocation54_spill] sm:$0xff] }
 0x42f   : > { %6303 = vst [vmem:[#allocation39_spill] sm:$0xff] %v5144_v13  ;;  %6304 = vst [vmem:[#allocation74_spill] sm:$0xff] %v5149_v21  ;;  %vm1905_vm11 = vcmp.gt.s32.totalorder %v5144_v13, %v5149_v21  ;;  %v5165_v47 = vcvt.s32.f32 %v1892_v58  ;;  %v5197_v56 = vsel %vm1711_vm15, 1.0, %v6313_v42  ;;  %v1615_v42 = vshll.u32 %v1614_v6, 16 }
 0x430   : > { %v1580_v40 = vpop.xlane.xlu0 %1579  ;;  %v5169_v17 = vsel %vm1905_vm11, %v5144_v13, %v5149_v21  ;;  %v6310_v13 = vld [vmem:[#allocation52_spill] sm:$0xff]  ;;  %6312 = vst [vmem:[#allocation75_spill] sm:$0xff] %v5192_v48  ;;  %6314 = vst [vmem:[#allocation76_spill] sm:$0xff] %v5197_v56  ;;  %v1599_v3 = vshll.u32 %v1598_v54, 16  ;;  %v1630_v54 = vcvt.f32.s32 %v4912_v36 }
 0x431   : > { %v1581_v62 = vcvt.f32.s32 %v1580_v40  ;;  %v1908_v58 = vshra.s32 %v5169_v17, 16  ;;  %1895 = vmax.xlane.f32.xlu0 %v5165_v47  ;;  %v5187_v21 = vsel %vm1709_vm12, 1.0, %v6310_v13 }
 0x433   : > { %v1584_v46 = vadd.s32 %v1583_v19, %v1581_v62  ;;  %v5199_v40 = vcvt.s32.f32 %v1908_v58  ;;  %v6321_v62 = vld [vmem:[#allocation56_spill] sm:$0xff] }
 0x435   : > { %v1596_v10 = vpop.xlane.xlu1 %1595  ;;  %vm1713_vm7 = vcmp.eq.s32.totalorder %v6315_v12, %v1584_v46  ;;  %vm1714_vm8 = vcmp.eq.s32.totalorder %v6316_v38, %v1584_v46  ;;  %1911 = vmax.xlane.f32.xlu1 %v5199_v40 }
 0x436   : > { %v1597_v13 = vcvt.f32.s32 %v1596_v10  ;;  %v5206_v25 = vsel %vm1713_vm7, 2147483648, %v6315_v12  ;;  %v5209_v8 = vsel %vm1714_vm8, 2147483648, %v6316_v38  ;;  %v5212_v19 = vsel %vm1714_vm8, 1.0, %v6319_v23  ;;  %v6323_v12 = vld [vmem:[#allocation57_spill] sm:$0xff]  ;;  %v6324_v38 = vld [vmem:[#allocation26_spill] sm:$0xff] }
 0x437   : > { %6317 = vst [vmem:[#allocation78_spill] sm:$0xff] %v5206_v25  ;;  %6318 = vst [vmem:[#allocation79_spill] sm:$0xff] %v5209_v8  ;;  %v5215_v16 = vsel %vm1713_vm7, 1.0, %v6321_v62  ;;  %vm1921_vm0 = vcmp.gt.s32.totalorder %v5206_v25, %v5209_v8 }
 0x438   : > { %6320 = vst [vmem:[#allocation41_spill] sm:$0xff] %v5212_v19  ;;  %6322 = vst [vmem:[#allocation77_spill] sm:$0xff] %v5215_v16  ;;  %v1600_v58 = vadd.s32 %v1599_v3, %v1597_v13  ;;  %v1612_v7 = vpop.xlane.xlu0 %1611  ;;  %v5222_v10 = vsel %vm1921_vm0, %v5206_v25, %v5209_v8  ;;  %v6327_v13 = vld [vmem:[#allocation55_spill] sm:$0xff]  ;;  %v6331_v8 = vld [vmem:[#allocation28_spill] sm:$0xff] }
 0x439   : > { %v1613_v46 = vcvt.f32.s32 %v1612_v7  ;;  %v1924_v23 = vshra.s32 %v5222_v10, 16  ;;  %v1631_v7 = vshll.u32 %v1630_v54, 16  ;;  %v1646_v54 = vcvt.f32.s32 %v4917_v30 }
 0x43a   : > { %vm1715_vm1 = vcmp.eq.s32.totalorder %v6323_v12, %v1600_v58  ;;  %vm1716_vm3 = vcmp.eq.s32.totalorder %v6324_v38, %v1600_v58  ;;  %v6329_v58 = vld [vmem:[#allocation25_spill] sm:$0xff] }
 0x43b   : > { %v5228_v62 = vsel %vm1715_vm1, 2147483648, %v6323_v12  ;;  %v5231_v36 = vsel %vm1716_vm3, 2147483648, %v6324_v38  ;;  %v1616_v3 = vadd.s32 %v1615_v42, %v1613_v46  ;;  %v5234_v6 = vsel %vm1716_vm3, 1.0, %v6327_v13  ;;  %v6332_v12 = vld [vmem:[#allocation58_spill] sm:$0xff] }
 0x43c   : > { %6325 = vst [vmem:[#allocation40_spill] sm:$0xff] %v5228_v62  ;;  %6326 = vst [vmem:[#allocation45_spill] sm:$0xff] %v5231_v36  ;;  %v1628_v16 = vpop.xlane.xlu1 %1627  ;;  %v5236_v19 = vcvt.s32.f32 %v1924_v23  ;;  %vm1937_vm4 = vcmp.gt.s32.totalorder %v5228_v62, %v5231_v36  ;;  %v5241_v25 = vsel %vm1715_vm1, 1.0, %v6329_v58 }
 0x43d   : > { %6328 = vst [vmem:[#allocation22_spill] sm:$0xff] %v5234_v6  ;;  %6330 = vst [vmem:[#allocation42_spill] sm:$0xff] %v5241_v25  ;;  %vm1717_vm5 = vcmp.eq.s32.totalorder %v6331_v8, %v1616_v3  ;;  %vm1718_vm6 = vcmp.eq.s32.totalorder %v6332_v12, %v1616_v3  ;;  %v1629_v38 = vcvt.f32.s32 %v1628_v16  ;;  %v5247_v42 = vsel %vm1937_vm4, %v5228_v62, %v5231_v36  ;;  %v6335_v16 = vld [vmem:[#allocation27_spill] sm:$0xff]  ;;  %v6337_v25 = vld [vmem:[#allocation30_spill] sm:$0xff] }
 0x43e   : > { %v5251_v46 = vsel %vm1717_vm5, 2147483648, %v6331_v8  ;;  %v5254_v23 = vsel %vm1718_vm6, 2147483648, %v6332_v12  ;;  %1927 = vmax.xlane.f32.xlu0 %v5236_v19  ;;  %v1940_v13 = vshra.s32 %v5247_v42, 16  ;;  %v5261_v3 = vsel %vm1718_vm6, 1.0, %v6335_v16  ;;  %v6339_v62 = vld [vmem:[#allocation61_spill] sm:$0xff] }
 0x43f   : > { %6333 = vst [vmem:[#allocation43_spill] sm:$0xff] %v5251_v46  ;;  %6334 = vst [vmem:[#allocation48_spill] sm:$0xff] %v5254_v23  ;;  %v1632_v58 = vadd.s32 %v1631_v7, %v1629_v38  ;;  %vm1953_vm9 = vcmp.gt.s32.totalorder %v5251_v46, %v5254_v23  ;;  %v5264_v6 = vsel %vm1717_vm5, 1.0, %v6337_v25  ;;  %v1662_v12 = vcvt.f32.s32 %v4923_v39  ;;  %v6340_v7 = vld [vmem:[#allocation59_spill] sm:$0xff] }
 0x440   : > { %6336 = vst [vmem:[#allocation49_spill] sm:$0xff] %v5261_v3  ;;  %6338 = vst [vmem:[#allocation44_spill] sm:$0xff] %v5264_v6  ;;  %v5266_v30 = vcvt.s32.f32 %v1940_v13  ;;  %v5270_v8 = vsel %vm1953_vm9, %v5251_v46, %v5254_v23  ;;  %v6343_v6 = vld [vmem:[#allocation60_spill] sm:$0xff]  ;;  %v6345_v46 = vld [vmem:[#allocation29_spill] sm:$0xff]  ;;  %v1647_v23 = vshll.u32 %v1646_v54, 16 }
 0x441   : > { %vm1719_vm10 = vcmp.eq.s32.totalorder %v6339_v62, %v1632_v58  ;;  %vm1720_vm12 = vcmp.eq.s32.totalorder %v6340_v7, %v1632_v58  ;;  %v1956_v38 = vshra.s32 %v5270_v8, 16  ;;  %v6348_v54 = vld [vmem:[#allocation64_spill] sm:$0xff] }
 0x442   : > { %v5277_v16 = vsel %vm1719_vm10, 2147483648, %v6339_v62  ;;  %v5280_v25 = vsel %vm1720_vm12, 2147483648, %v6340_v7  ;;  %v1644_v13 = vpop.xlane.xlu0 %1643  ;;  %1943 = vmax.xlane.f32.xlu1 %v5266_v30  ;;  %v5284_v3 = vsel %vm1720_vm12, 1.0, %v6343_v6  ;;  %v5287_v39 = vsel %vm1719_vm10, 1.0, %v6345_v46 }
 0x443   : > { %6341 = vst [vmem:[#allocation46_spill] sm:$0xff] %v5277_v16  ;;  %6342 = vst [vmem:[#allocation47_spill] sm:$0xff] %v5280_v25  ;;  %v1645_v36 = vcvt.f32.s32 %v1644_v13  ;;  %v5289_v58 = vcvt.s32.f32 %v1956_v38  ;;  %vm1969_vm13 = vcmp.gt.s32.totalorder %v5277_v16, %v5280_v25  ;;  %v1678_v46 = vcvt.f32.s32 %v4927_v11  ;;  %v6352_v11 = vld [vmem:[#allocation63_spill] sm:$0xff] }
 0x444   : > { %6344 = vst [vmem:[#allocation24_spill] sm:$0xff] %v5284_v3  ;;  %6346 = vst [vmem:[#allocation52_spill] sm:$0xff] %v5287_v39  ;;  %v5295_v62 = vsel %vm1969_vm13, %v5277_v16, %v5280_v25  ;;  %v1663_v3 = vshll.u32 %v1662_v12, 16  ;;  %v6347_v39 = vld [vmem:[#allocation32_spill] sm:$0xff] }
 0x445   : > { %v1648_v7 = vadd.s32 %v1647_v23, %v1645_v36  ;;  %1959 = vmax.xlane.f32.xlu0 %v5289_v58  ;;  %v1972_v6 = vshra.s32 %v5295_v62, 16  ;;  %v6350_v23 = vld [vmem:[#allocation62_spill] sm:$0xff] }
 0x447   : > { %vm1721_vm2 = vcmp.eq.s32.totalorder %v6347_v39, %v1648_v7  ;;  %vm1722_vm15 = vcmp.eq.s32.totalorder %v6348_v54, %v1648_v7  ;;  %v1660_v38 = vpop.xlane.xlu1 %1659  ;;  %v5302_v13 = vcvt.s32.f32 %v1972_v6 }
 0x448   : > { %v5305_v56 = vsel %vm1721_vm2, 2147483648, %v6347_v39  ;;  %v5308_v16 = vsel %vm1722_vm15, 2147483648, %v6348_v54  ;;  %v1661_v36 = vcvt.f32.s32 %v1660_v38  ;;  %v5311_v25 = vsel %vm1722_vm15, 1.0, %v6350_v23 }
 0x449   : > { %6349 = vst [vmem:[#allocation50_spill] sm:$0xff] %v5305_v56  ;;  %6351 = vst [vmem:[#allocation51_spill] sm:$0xff] %v5311_v25  ;;  %1975 = vmax.xlane.f32.xlu1 %v5302_v13  ;;  %vm1985_vm14 = vcmp.gt.s32.totalorder %v5305_v56, %v5308_v16  ;;  %v5317_v12 = vsel %vm1721_vm2, 1.0, %v6352_v11  ;;  %v1679_v54 = vshll.u32 %v1678_v46, 16  ;;  %v1694_v38 = vcvt.f32.s32 %v4932_v1  ;;  %v6356_v1 = vld [vmem:[#allocation31_spill] sm:$0xff] }
 0x44a   : > { %6353 = vst [vmem:[#allocation23_spill] sm:$0xff] %v5317_v12  ;;  %v1664_v7 = vadd.s32 %v1663_v3, %v1661_v36  ;;  %v1676_v6 = vpop.xlane.xlu0 %1675  ;;  %v5321_v39 = vsel %vm1985_vm14, %v5305_v56, %v5308_v16 }
 0x44b   : > { %v1677_v48 = vcvt.f32.s32 %v1676_v6  ;;  %v1988_v23 = vshra.s32 %v5321_v39, 16  ;;  %v6358_v6 = vld [vmem:[#allocation65_spill] sm:$0xff]  ;;  %v1695_v56 = vshll.u32 %v1694_v38, 16 }
 0x44c   : > { %vm1723_vm11 = vcmp.eq.s32.totalorder %v4778_v34, %v1664_v7  ;;  %vm1724_vm7 = vcmp.eq.s32.totalorder %v4781_v33, %v1664_v7 }
 0x44d   : > { %v5328_v25 = vsel %vm1723_vm11, 2147483648, %v4778_v34  ;;  %v5331_v3 = vsel %vm1724_vm7, 2147483648, %v4781_v33  ;;  %v1680_v36 = vadd.s32 %v1679_v54, %v1677_v48  ;;  %v5333_v11 = vcvt.s32.f32 %v1988_v23  ;;  %v6360_v34 = vld [vmem:[#allocation66_spill] sm:$0xff] }
 0x44e   : > { %6354 = vst [vmem:[#allocation53_spill] sm:$0xff] %v5328_v25  ;;  %6355 = vst [vmem:[#allocation54_spill] sm:$0xff] %v5331_v3  ;;  %vm2001_vm8 = vcmp.gt.s32.totalorder %v5328_v25, %v5331_v3  ;;  %v5338_v46 = vsel %vm1724_vm7, 1.0, %v6356_v1  ;;  %v5341_v12 = vsel %vm1723_vm11, 1.0, %v6358_v6  ;;  %v1692_v7 = vpop.xlane.xlu1 %1691  ;;  %v6364_v6 = vld [vmem:[#allocation67_spill] sm:$0xff] }
 0x44f   : > { %6357 = vst [vmem:[#allocation56_spill] sm:$0xff] %v5338_v46  ;;  %6359 = vst [vmem:[#allocation57_spill] sm:$0xff] %v5341_v12  ;;  %vm1725_vm0 = vcmp.eq.s32.totalorder %v4803_v63, %v1680_v36  ;;  %vm1726_vm1 = vcmp.eq.s32.totalorder %v6360_v34, %v1680_v36  ;;  %1991 = vmax.xlane.f32.xlu0 %v5333_v11  ;;  %v5348_v33 = vsel %vm2001_vm8, %v5328_v25, %v5331_v3  ;;  %v6362_v36 = vld [vmem:[#allocation34_spill] sm:$0xff]  ;;  %v6367_v3 = vld [vmem:[#allocation68_spill] sm:$0xff] }
 0x450   : > { %v5351_v48 = vsel %vm1725_vm0, 2147483648, %v4803_v63  ;;  %v5354_v54 = vsel %vm1726_vm1, 2147483648, %v6360_v34  ;;  %v1693_v23 = vcvt.f32.s32 %v1692_v7  ;;  %v2004_v38 = vshra.s32 %v5348_v33, 16  ;;  %v6366_v7 = vld [vmem:[#allocation33_spill] sm:$0xff] }
 0x451   : > { %6361 = vst [vmem:[#allocation26_spill] sm:$0xff] %v5351_v48  ;;  %vm2017_vm3 = vcmp.gt.s32.totalorder %v5351_v48, %v5354_v54  ;;  %v5360_v1 = vsel %vm1726_vm1, 1.0, %v6362_v36  ;;  %v5363_v12 = vsel %vm1725_vm0, 1.0, %v6364_v6 }
 0x452   : > { %6363 = vst [vmem:[#allocation55_spill] sm:$0xff] %v5360_v1  ;;  %6365 = vst [vmem:[#allocation25_spill] sm:$0xff] %v5363_v12  ;;  %v1696_v46 = vadd.s32 %v1695_v56, %v1693_v23  ;;  %v5365_v25 = vcvt.s32.f32 %v2004_v38  ;;  %v5369_v63 = vsel %vm2017_vm3, %v5351_v48, %v5354_v54  ;;  %v6370_v23 = vld [vmem:[#allocation69_spill] sm:$0xff]  ;;  %v6372_v12 = vld [vmem:[#allocation70_spill] sm:$0xff] }
 0x453   : > { %v2020_v34 = vshra.s32 %v5369_v63, 16 }
 0x454   : > { %vm1727_vm4 = vcmp.eq.s32.totalorder %v6366_v7, %v1696_v46  ;;  %vm1728_vm5 = vcmp.eq.s32.totalorder %v6367_v3, %v1696_v46  ;;  %2007 = vmax.xlane.f32.xlu1 %v5365_v25 }
 0x455   : > { %v5376_v36 = vsel %vm1727_vm4, 2147483648, %v6366_v7  ;;  %v5379_v6 = vsel %vm1728_vm5, 2147483648, %v6367_v3  ;;  %v5381_v56 = vcvt.s32.f32 %v2020_v34  ;;  %v5386_v38 = vsel %vm1728_vm5, 1.0, %v6370_v23 }
 0x456   : > { %6368 = vst [vmem:[#allocation28_spill] sm:$0xff] %v5376_v36  ;;  %6369 = vst [vmem:[#allocation58_spill] sm:$0xff] %v5379_v6  ;;  %vm2033_vm6 = vcmp.gt.s32.totalorder %v5376_v36, %v5379_v6  ;;  %v5389_v1 = vsel %vm1727_vm4, 1.0, %v6372_v12  ;;  %v1795_v34 = vand.u32 65535, %v4961_v27  ;;  %v1811_v12 = vand.u32 65535, %v5011_v15 }
 0x457   : > { %6371 = vst [vmem:[#allocation27_spill] sm:$0xff] %v5386_v38  ;;  %6373 = vst [vmem:[#allocation30_spill] sm:$0xff] %v5389_v1  ;;  %2023 = vmax.xlane.f32.xlu0 %v5381_v56  ;;  %v5394_v46 = vsel %vm2033_vm6, %v5376_v36, %v5379_v6  ;;  %v1827_v38 = vand.u32 65535, %v4997_v0  ;;  %v1843_v6 = vand.u32 65535, %v5034_v29  ;;  %v1859_v0 = vand.u32 65535, %v5070_v60 }
 0x458   : > { %v2036_v3 = vshra.s32 %v5394_v46, 16  ;;  %v1797_v23 = vcvt.s32.f32 %v1795_v34  ;;  %v1891_v60 = vand.u32 65535, %v5139_v45 }
 0x459   : > { %v1829_v34 = vcvt.s32.f32 %v1827_v38  ;;  %v1861_v38 = vcvt.s32.f32 %v1859_v0 }
 0x45a   : > { %v5397_v7 = vcvt.s32.f32 %v2036_v3  ;;  %v1813_v3 = vcvt.s32.f32 %v1811_v12  ;;  %v1875_v12 = vand.u32 65535, %v5105_v35  ;;  %v1893_v35 = vcvt.s32.f32 %v1891_v60 }
 0x45c   : > { %2039 = vmax.xlane.f32.xlu1 %v5397_v7 }
 0x4a7   : > { %v5401_v48 = vpop.xlane.xlu0 %1799 }
 0x4a8   : > { %vm1801_vm9 = vcmp.eq.f32.partialorder %v4983_v52, %v5401_v48 }
 0x4a9   : > { %v1802_v1 = vsel %vm1801_vm9, %v1797_v23, -inf  ;;  %v1845_v23 = vcvt.s32.f32 %v1843_v6  ;;  %v1877_v6 = vcvt.s32.f32 %v1875_v12 }
 0x4aa   : > { %1803 = vmax.xlane.f32.xlu0 %v1802_v1 }
 0x4ab   : > { %v5407_v36 = vpop.xlane.xlu1 %1815 }
 0x4ac   : > { %vm1817_vm10 = vcmp.eq.f32.partialorder %v5030_v44, %v5407_v36  ;;  %v5412_v27 = vpop.xlane.xlu0 %1831 }
 0x4ad   : > { %vm1833_vm12 = vcmp.eq.f32.partialorder %v5043_v55, %v5412_v27  ;;  %v1818_v15 = vsel %vm1817_vm10, %v1813_v3, -inf }
 0x4ae   : > { %1819 = vmax.xlane.f32.xlu1 %v1818_v15  ;;  %v1834_v52 = vsel %vm1833_vm12, %v1829_v34, -inf  ;;  %v1907_v34 = vand.u32 65535, %v5169_v17 }
 0x4af   : > { %1835 = vmax.xlane.f32.xlu0 %v1834_v52  ;;  %v5417_v1 = vpop.xlane.xlu1 %1847 }
 0x4b0   : > { %vm1849_vm13 = vcmp.eq.f32.partialorder %v5066_v61, %v5417_v1  ;;  %v1909_v45 = vcvt.s32.f32 %v1907_v34 }
 0x4b1   : > { %v1850_v29 = vsel %vm1849_vm13, %v1845_v23, -inf }
 0x4b2   : > { %1851 = vmax.xlane.f32.xlu1 %v1850_v29  ;;  %v1939_v29 = vand.u32 65535, %v5247_v42  ;;  %v1971_v42 = vand.u32 65535, %v5295_v62 }
 0x4b3   : > { %v5421_v44 = vpop.xlane.xlu0 %1863 }
 0x4b4   : > { %vm1865_vm2 = vcmp.eq.f32.partialorder %v5091_v31, %v5421_v44 }
 0x4b5   : > { %v1866_v55 = vsel %vm1865_vm2, %v1861_v38, -inf  ;;  %v1955_v38 = vand.u32 65535, %v5270_v8  ;;  %v1973_v8 = vcvt.s32.f32 %v1971_v42 }
 0x4b6   : > { %1867 = vmax.xlane.f32.xlu0 %v1866_v55  ;;  %v1941_v55 = vcvt.s32.f32 %v1939_v29 }
 0x4b7   : > { %v5427_v3 = vpop.xlane.xlu1 %1879  ;;  %v1957_v60 = vcvt.s32.f32 %v1955_v38 }
 0x4b8   : > { %vm1881_vm15 = vcmp.eq.f32.partialorder %v5135_v49, %v5427_v3  ;;  %v1923_v49 = vand.u32 65535, %v5222_v10 }
 0x4b9   : > { %v1882_v61 = vsel %vm1881_vm15, %v1877_v6, -inf }
 0x4ba   : > { %v5432_v15 = vpop.xlane.xlu0 %1895  ;;  %1883 = vmax.xlane.f32.xlu1 %v1882_v61  ;;  %v1925_v23 = vcvt.s32.f32 %v1923_v49 }
 0x4bb   : > { %vm1897_vm14 = vcmp.eq.f32.partialorder %v5165_v47, %v5432_v15 }
 0x4bc   : > { %v1898_v31 = vsel %vm1897_vm14, %v1893_v35, -inf }
 0x4bd   : > { %1899 = vmax.xlane.f32.xlu0 %v1898_v31  ;;  %v2019_v31 = vand.u32 65535, %v5369_v63 }
 0x4be   : > { %v5436_v52 = vpop.xlane.xlu1 %1911 }
 0x4bf   : > { %vm1913_vm11 = vcmp.eq.f32.partialorder %v5199_v40, %v5436_v52  ;;  %v2021_v49 = vcvt.s32.f32 %v2019_v31 }
 0x4c0   : > { %v1914_v0 = vsel %vm1913_vm11, %v1909_v45, -inf }
 0x4c1   : > { %1915 = vmax.xlane.f32.xlu1 %v1914_v0 }
 0x4c7   : > { %v5441_v17 = vpop.xlane.xlu0 %1927 }
 0x4c8   : > { %vm1929_vm7 = vcmp.eq.f32.partialorder %v5236_v19, %v5441_v17 }
 0x4c9   : > { %v1930_v47 = vsel %vm1929_vm7, %v1925_v23, -inf }
 0x4ca   : > { %1931 = vmax.xlane.f32.xlu0 %v1930_v47 }
 0x4cb   : > { %v5447_v12 = vpop.xlane.xlu1 %1943 }
 0x4cc   : > { %vm1945_vm8 = vcmp.eq.f32.partialorder %v5266_v30, %v5447_v12  ;;  %v1987_v30 = vand.u32 65535, %v5321_v39 }
 0x4cd   : > { %v1946_v40 = vsel %vm1945_vm8, %v1941_v55, -inf  ;;  %v1822_v55 = vcvt.f32.s32 %v5407_v36 }
 0x4ce   : > { %v5451_v10 = vpop.xlane.xlu0 %1959  ;;  %1947 = vmax.xlane.f32.xlu1 %v1946_v40  ;;  %v1989_v35 = vcvt.s32.f32 %v1987_v30 }
 0x4cf   : > { %vm1961_vm0 = vcmp.eq.f32.partialorder %v5289_v58, %v5451_v10  ;;  %v2003_v58 = vand.u32 65535, %v5348_v33 }
 0x4d0   : > { %v1962_v19 = vsel %vm1961_vm0, %v1957_v60, -inf  ;;  %v1823_v60 = vshll.u32 %v1822_v55, 16 }
 0x4d1   : > { %1963 = vmax.xlane.f32.xlu0 %v1962_v19  ;;  %v2005_v0 = vcvt.s32.f32 %v2003_v58 }
 0x4d2   : > { %v5456_v6 = vpop.xlane.xlu1 %1975 }
 0x4d3   : > { %vm1977_vm1 = vcmp.eq.f32.partialorder %v5302_v13, %v5456_v6 }
 0x4d4   : > { %v1978_v61 = vsel %vm1977_vm1, %v1973_v8, -inf }
 0x4d5   : > { %1979 = vmax.xlane.f32.xlu1 %v1978_v61 }
 0x4d8   : > { %v5461_v34 = vpop.xlane.xlu0 %1991 }
 0x4d9   : > { %vm1993_vm3 = vcmp.eq.f32.partialorder %v5333_v11, %v5461_v34  ;;  %v2035_v11 = vand.u32 65535, %v5394_v46 }
 0x4da   : > { %v1994_v62 = vsel %vm1993_vm3, %v1989_v35, -inf  ;;  %v1870_v35 = vcvt.f32.s32 %v5421_v44 }
 0x4db   : > { %1995 = vmax.xlane.f32.xlu0 %v1994_v62  ;;  %v2037_v63 = vcvt.s32.f32 %v2035_v11  ;;  %v6375_v11 = vld [vmem:[#allocation36_spill] sm:$0xff] }
 0x4dd   : > { %v5467_v45 = vpop.xlane.xlu1 %2007 }
 0x4de   : > { %vm2009_vm4 = vcmp.eq.f32.partialorder %v5365_v25, %v5467_v45  ;;  %v1806_v25 = vcvt.f32.s32 %v5401_v48 }
 0x4df   : > { %v2010_v13 = vsel %vm2009_vm4, %v2005_v0, -inf }
 0x4e0   : > { %v5471_v39 = vpop.xlane.xlu0 %2023  ;;  %2011 = vmax.xlane.f32.xlu1 %v2010_v13  ;;  %v1807_v38 = vshll.u32 %v1806_v25, 16  ;;  %v1871_v13 = vshll.u32 %v1870_v35, 16  ;;  %v6377_v25 = vld [vmem:[#allocation37_spill] sm:$0xff]  ;;  %v1950_v35 = vcvt.f32.s32 %v5447_v12 }
 0x4e1   : > { %vm2025_vm5 = vcmp.eq.f32.partialorder %v5381_v56, %v5471_v39  ;;  %v1838_v56 = vcvt.f32.s32 %v5412_v27 }
 0x4e2   : > { %v2026_v33 = vsel %vm2025_vm5, %v2021_v49, -inf }
 0x4e3   : > { %2027 = vmax.xlane.f32.xlu0 %v2026_v33  ;;  %v1839_v30 = vshll.u32 %v1838_v56, 16  ;;  %v1918_v33 = vcvt.f32.s32 %v5436_v52  ;;  %v6378_v52 = vld [vmem:[#allocation73_spill] sm:$0xff]  ;;  %v6379_v56 = vld [vmem:[#allocation72_spill] sm:$0xff] }
 0x4e5   : > { %v5476_v23 = vpop.xlane.xlu1 %2039 }
 0x4e6   : > { %vm2041_vm6 = vcmp.eq.f32.partialorder %v5397_v7, %v5476_v23  ;;  %v1854_v7 = vcvt.f32.s32 %v5417_v1 }
 0x4e7   : > { %v2042_v29 = vsel %vm2041_vm6, %v2037_v63, -inf }
 0x4e8   : > { %2043 = vmax.xlane.f32.xlu1 %v2042_v29 }
 0x533   : > { %v1804_v47 = vpop.xlane.xlu0 %1803 }
 0x534   : > { %v1805_v40 = vcvt.f32.s32 %v1804_v47 }
 0x536   : > { %v1808_v46 = vadd.s32 %v1807_v38, %v1805_v40  ;;  %v1919_v40 = vshll.u32 %v1918_v33, 16  ;;  %v6394_v33 = vld [vmem:[#allocation43_spill] sm:$0xff] }
 0x537   : > { %v1820_v42 = vpop.xlane.xlu1 %1819 }
 0x538   : > { %vm2050_vm9 = vcmp.eq.s32.totalorder %v4947_v37, %v1808_v46  ;;  %vm2049_vm10 = vcmp.eq.s32.totalorder %v4944_v50, %v1808_v46  ;;  %v1821_v19 = vcvt.f32.s32 %v1820_v42  ;;  %v1836_v8 = vpop.xlane.xlu0 %1835  ;;  %v1855_v37 = vshll.u32 %v1854_v7, 16 }
 0x539   : > { %v2082_v48 = vsel %vm2050_vm9, 1.0, %v4950_v57  ;;  %v2081_v61 = vsel %vm2049_vm10, 1.0, %v4955_v53  ;;  %v1837_v36 = vcvt.f32.s32 %v1836_v8  ;;  %v6381_v8 = vld [vmem:[#allocation74_spill] sm:$0xff] }
 0x53a   : > { %2145 = vxpose.xlu1.b32.start [1/16] %v2082_v48, 128  ;;  %2113 = vxpose.xlu0.b32.start [1/16] %v2081_v61, 128  ;;  %v1824_v27 = vadd.s32 %v1823_v60, %v1821_v19  ;;  %v6380_v60 = vld [vmem:[#allocation38_spill] sm:$0xff]  ;;  %v1934_v19 = vcvt.f32.s32 %v5441_v17  ;;  %v6384_v61 = vld [vmem:[#allocation76_spill] sm:$0xff]  ;;  %v1966_v17 = vcvt.f32.s32 %v5451_v10  ;;  %v6389_v10 = vld [vmem:[#allocation45_spill] sm:$0xff] }
 0x53b   : > { %v1840_v58 = vadd.s32 %v1839_v30, %v1837_v36  ;;  %v1852_v62 = vpop.xlane.xlu1 %1851 }
 0x53c   : > { %v1853_v31 = vcvt.f32.s32 %v1852_v62  ;;  %vm2052_vm12 = vcmp.eq.s32.totalorder %v4988_v20, %v1824_v27  ;;  %vm2051_vm13 = vcmp.eq.s32.totalorder %v4979_v26, %v1824_v27  ;;  %v1886_v20 = vcvt.f32.s32 %v5427_v3  ;;  %v6374_v3 = vld [vmem:[#allocation35_spill] sm:$0xff] }
 0x53d   : > { %v2084_v50 = vsel %vm2052_vm12, 1.0, %v5002_v43  ;;  %v2083_v57 = vsel %vm2051_vm13, 1.0, %v5039_v9  ;;  %vm2054_vm2 = vcmp.eq.s32.totalorder %v4974_v41, %v1840_v58  ;;  %vm2053_vm15 = vcmp.eq.s32.totalorder %v4969_v24, %v1840_v58 }
 0x53e   : > { %v1856_v53 = vadd.s32 %v1855_v37, %v1853_v31  ;;  %2146 = vxpose.xlu1.b32.cont [2/16] %v2084_v50, 128  ;;  %2114 = vxpose.xlu0.b32.cont [2/16] %v2083_v57, 128  ;;  %v2086_v44 = vsel %vm2054_vm2, 1.0, %v5064_v2  ;;  %v2085_v0 = vsel %vm2053_vm15, 1.0, %v5075_v32  ;;  %v1902_v9 = vcvt.f32.s32 %v5432_v15  ;;  %v6376_v15 = vld [vmem:[#allocation71_spill] sm:$0xff]  ;;  %v6386_v57 = vld [vmem:[#allocation78_spill] sm:$0xff] }
 0x53f   : > { %v1868_v1 = vpop.xlane.xlu0 %1867  ;;  %v1887_v2 = vshll.u32 %v1886_v20, 16  ;;  %v1935_v27 = vshll.u32 %v1934_v19, 16  ;;  %v1951_v37 = vshll.u32 %v1950_v35, 16  ;;  %v6385_v50 = vld [vmem:[#allocation79_spill] sm:$0xff]  ;;  %v1967_v20 = vshll.u32 %v1966_v17, 16  ;;  %v6404_v35 = vld [vmem:[#allocation54_spill] sm:$0xff] }
 0x540   : > { %v1869_v26 = vcvt.f32.s32 %v1868_v1  ;;  %vm2056_vm14 = vcmp.eq.s32.totalorder %v5023_v5, %v1856_v53  ;;  %vm2055_vm11 = vcmp.eq.s32.totalorder %v5017_v28, %v1856_v53  ;;  %v6387_v53 = vld [vmem:[#allocation41_spill] sm:$0xff] }
 0x541   : > { %v2088_v41 = vsel %vm2056_vm14, 1.0, %v5099_v59  ;;  %v2087_v24 = vsel %vm2055_vm11, 1.0, %v5126_v22  ;;  %v1903_v22 = vshll.u32 %v1902_v9, 16  ;;  %v6391_v9 = vld [vmem:[#allocation22_spill] sm:$0xff] }
 0x542   : > { %v1872_v43 = vadd.s32 %v1871_v13, %v1869_v26  ;;  %2147 = vxpose.xlu1.b32.cont [3/16] %v2086_v44, 128  ;;  %2115 = vxpose.xlu0.b32.cont [3/16] %v2085_v0, 128  ;;  %v6388_v44 = vld [vmem:[#allocation77_spill] sm:$0xff]  ;;  %v1982_v26 = vcvt.f32.s32 %v5456_v6 }
 0x543   : > { %v1884_v49 = vpop.xlane.xlu1 %1883  ;;  %v6395_v6 = vld [vmem:[#allocation49_spill] sm:$0xff] }
 0x544   : > { %v1885_v32 = vcvt.f32.s32 %v1884_v49  ;;  %vm2058_vm7 = vcmp.eq.s32.totalorder %v5054_v14, %v1872_v43  ;;  %vm2057_vm8 = vcmp.eq.s32.totalorder %v6374_v3, %v1872_v43 }
 0x545   : > { %v2090_v5 = vsel %vm2058_vm7, 1.0, %v6375_v11  ;;  %v2089_v28 = vsel %vm2057_vm8, 1.0, %v5158_v4  ;;  %v1983_v11 = vshll.u32 %v1982_v26, 16 }
 0x546   : > { %v1888_v59 = vadd.s32 %v1887_v2, %v1885_v32  ;;  %v1900_v63 = vpop.xlane.xlu0 %1899  ;;  %2148 = vxpose.xlu1.b32.cont [4/16] %v2088_v41, 128  ;;  %2116 = vxpose.xlu0.b32.cont [4/16] %v2087_v24, 128  ;;  %v6390_v41 = vld [vmem:[#allocation40_spill] sm:$0xff]  ;;  %v6392_v2 = vld [vmem:[#allocation42_spill] sm:$0xff] }
 0x547   : > { %v1901_v29 = vcvt.f32.s32 %v1900_v63  ;;  %v6396_v63 = vld [vmem:[#allocation44_spill] sm:$0xff] }
 0x548   : > { %vm2060_vm0 = vcmp.eq.s32.totalorder %v6376_v15, %v1888_v59  ;;  %vm2059_vm1 = vcmp.eq.s32.totalorder %v6377_v25, %v1888_v59  ;;  %v6397_v25 = vld [vmem:[#allocation47_spill] sm:$0xff] }
 0x549   : > { %v1904_v47 = vadd.s32 %v1903_v22, %v1901_v29  ;;  %v2092_v38 = vsel %vm2060_vm0, 1.0, %v5163_v18  ;;  %v2091_v55 = vsel %vm2059_vm1, 1.0, %v5174_v51  ;;  %v6382_v18 = vld [vmem:[#allocation39_spill] sm:$0xff]  ;;  %v1998_v29 = vcvt.f32.s32 %v5461_v34 }
 0x54a   : > { %v1916_v14 = vpop.xlane.xlu1 %1915  ;;  %2149 = vxpose.xlu1.b32.cont [5/16] %v2090_v5, 128  ;;  %2117 = vxpose.xlu0.b32.cont [5/16] %v2089_v28, 128  ;;  %v6383_v51 = vld [vmem:[#allocation75_spill] sm:$0xff]  ;;  %v6393_v28 = vld [vmem:[#allocation48_spill] sm:$0xff]  ;;  %v2030_v34 = vcvt.f32.s32 %v5471_v39  ;;  %v2046_v39 = vcvt.f32.s32 %v5476_v23 }
 0x54b   : > { %v1917_v4 = vcvt.f32.s32 %v1916_v14  ;;  %vm2062_vm3 = vcmp.eq.s32.totalorder %v6378_v52, %v1904_v47  ;;  %vm2061_vm4 = vcmp.eq.s32.totalorder %v6379_v56, %v1904_v47  ;;  %v6398_v47 = vld [vmem:[#allocation46_spill] sm:$0xff]  ;;  %v1999_v52 = vshll.u32 %v1998_v29, 16 }
 0x54c   : > { %v2094_v42 = vsel %vm2062_vm3, 1.0, %v6380_v60  ;;  %v2093_v7 = vsel %vm2061_vm4, 1.0, %v5187_v21 }
 0x54d   : > { %v1920_v46 = vadd.s32 %v1919_v40, %v1917_v4  ;;  %v6400_v40 = vld [vmem:[#allocation52_spill] sm:$0xff] }
 0x54e   : > { %2150 = vxpose.xlu1.b32.cont [6/16] %v2092_v38, 128  ;;  %2118 = vxpose.xlu0.b32.cont [6/16] %v2091_v55, 128  ;;  %v6399_v38 = vld [vmem:[#allocation24_spill] sm:$0xff] }
 0x54f   : > { %vm2064_vm5 = vcmp.eq.s32.totalorder %v6381_v8, %v1920_v46  ;;  %vm2063_vm6 = vcmp.eq.s32.totalorder %v6382_v18, %v1920_v46  ;;  %v2014_v46 = vcvt.f32.s32 %v5467_v45  ;;  %v6402_v18 = vld [vmem:[#allocation51_spill] sm:$0xff] }
 0x550   : > { %v2096_v48 = vsel %vm2064_vm5, 1.0, %v6383_v51  ;;  %v2095_v30 = vsel %vm2063_vm6, 1.0, %v6384_v61 }
 0x551   : > { %v2015_v19 = vshll.u32 %v2014_v46, 16 }
 0x552   : > { %2151 = vxpose.xlu1.b32.cont [7/16] %v2094_v42, 128  ;;  %2119 = vxpose.xlu0.b32.cont [7/16] %v2093_v7, 128  ;;  %v6401_v7 = vld [vmem:[#allocation50_spill] sm:$0xff] }
 0x553   : > { %v1932_v36 = vpop.xlane.xlu0 %1931 }
 0x554   : > { %v1933_v58 = vcvt.f32.s32 %v1932_v36 }
 0x556   : > { %v1936_v21 = vadd.s32 %v1935_v27, %v1933_v58  ;;  %2152 = vxpose.xlu1.b32.cont [8/16] %v2096_v48, 128  ;;  %2120 = vxpose.xlu0.b32.cont [8/16] %v2095_v30, 128  ;;  %v6403_v48 = vld [vmem:[#allocation23_spill] sm:$0xff]  ;;  %v2031_v27 = vshll.u32 %v2030_v34, 16  ;;  %v6405_v58 = vld [vmem:[#allocation53_spill] sm:$0xff] }
 0x557   : > { %v1948_v62 = vpop.xlane.xlu1 %1947 }
 0x558   : > { %v1949_v31 = vcvt.f32.s32 %v1948_v62  ;;  %vm2066_vm9 = vcmp.eq.s32.totalorder %v6385_v50, %v1936_v21  ;;  %vm2065_vm10 = vcmp.eq.s32.totalorder %v6386_v57, %v1936_v21  ;;  %v6406_v21 = vld [vmem:[#allocation56_spill] sm:$0xff]  ;;  %v6407_v62 = vld [vmem:[#allocation57_spill] sm:$0xff]  ;;  %v6408_v50 = vld [vmem:[#allocation26_spill] sm:$0xff]  ;;  %v2047_v57 = vshll.u32 %v2046_v39, 16 }
 0x559   : > { %v2098_v1 = vsel %vm2066_vm9, 1.0, %v6387_v53  ;;  %v2097_v0 = vsel %vm2065_vm10, 1.0, %v6388_v44  ;;  %v2182_v39 = vld [vmem:[%s3288_s13 + $0x28] sm:$0xff] }
 0x55a   : > { %v1952_v12 = vadd.s32 %v1951_v37, %v1949_v31  ;;  %v1964_v13 = vpop.xlane.xlu0 %1963  ;;  %2153 = vxpose.xlu1.b32.cont [9/16] %v2098_v1, 128  ;;  %2121 = vxpose.xlu0.b32.cont [9/16] %v2097_v0, 128  ;;  %v6409_v1 = vld [vmem:[#allocation55_spill] sm:$0xff]  ;;  %v6410_v0 = vld [vmem:[#allocation25_spill] sm:$0xff] }
 0x55b   : > { %v1965_v43 = vcvt.f32.s32 %v1964_v13  ;;  %v6411_v13 = vld [vmem:[#allocation58_spill] sm:$0xff] }
 0x55c   : > { %vm2068_vm12 = vcmp.eq.s32.totalorder %v6389_v10, %v1952_v12  ;;  %vm2067_vm13 = vcmp.eq.s32.totalorder %v6390_v41, %v1952_v12  ;;  %v2177_v41 = vld [vmem:[%s3288_s13] sm:$0xff] }
 0x55d   : > { %v1968_v24 = vadd.s32 %v1967_v20, %v1965_v43  ;;  %v2100_v49 = vsel %vm2068_vm12, 1.0, %v6391_v9  ;;  %v2099_v32 = vsel %vm2067_vm13, 1.0, %v6392_v2  ;;  %v6412_v20 = vld [vmem:[#allocation28_spill] sm:$0xff]  ;;  %v6414_v43 = vld [vmem:[#allocation30_spill] sm:$0xff]  ;;  %v2209_v9 = vmul.f32 2.0, %v2177_v41 }
 0x55e   : > { %v1980_v3 = vpop.xlane.xlu1 %1979  ;;  %2154 = vxpose.xlu1.b32.cont [10/16] %v2100_v49, 128  ;;  %2122 = vxpose.xlu0.b32.cont [10/16] %v2099_v32, 128  ;;  %v2178_v49 = vld [vmem:[%s3288_s13 + $0x8] sm:$0xff] }
 0x55f   : > { %v1981_v5 = vcvt.f32.s32 %v1980_v3  ;;  %vm2070_vm2 = vcmp.eq.s32.totalorder %v6393_v28, %v1968_v24  ;;  %vm2069_vm15 = vcmp.eq.s32.totalorder %v6394_v33, %v1968_v24  ;;  %v2193_v24 = vld [vmem:[%s3288_s13 + $0x80] sm:$0xff]  ;;  %v2194_v32 = vld [vmem:[%s3288_s13 + $0x88] sm:$0xff]  ;;  %v2210_v3 = vmul.f32 2.0, %v2178_v49 }
 0x560   : > { %v2102_v59 = vsel %vm2070_vm2, 1.0, %v6395_v6  ;;  %v2101_v22 = vsel %vm2069_vm15, 1.0, %v6396_v63  ;;  %v2225_v2 = vmul.f32 2.0, %v2193_v24  ;;  %v2226_v33 = vmul.f32 2.0, %v2194_v32  ;;  %v2195_v6 = vld [vmem:[%s3288_s13 + $0x90] sm:$0xff] }
 0x561   : > { %v1984_v15 = vadd.s32 %v1983_v11, %v1981_v5  ;;  %v2241_v11 = vsub.f32 1.0, %v2209_v9  ;;  %v2179_v5 = vld [vmem:[%s3288_s13 + $0x10] sm:$0xff]  ;;  %v2242_v63 = vsub.f32 1.0, %v2210_v3 }
 0x562   : > { %2155 = vxpose.xlu1.b32.cont [11/16] %v2102_v59, 128  ;;  %2123 = vxpose.xlu0.b32.cont [11/16] %v2101_v22, 128  ;;  %v2257_v28 = vsub.f32 1.0, %v2225_v2  ;;  %v2211_v22 = vmul.f32 2.0, %v2179_v5 }
 0x563   : > { %vm2072_vm14 = vcmp.eq.s32.totalorder %v6397_v25, %v1984_v15  ;;  %vm2071_vm11 = vcmp.eq.s32.totalorder %v6398_v47, %v1984_v15  ;;  %v2180_v25 = vld [vmem:[%s3288_s13 + $0x18] sm:$0xff] }
 0x564   : > { %v1996_v14 = vpop.xlane.xlu0 %1995  ;;  %v2104_v55 = vsel %vm2072_vm14, 1.0, %v6399_v38  ;;  %v2103_v4 = vsel %vm2071_vm11, 1.0, %v6400_v40  ;;  %v2227_v38 = vmul.f32 2.0, %v2195_v6  ;;  %v2212_v46 = vmul.f32 2.0, %v2180_v25 }
 0x565   : > { %v1997_v56 = vcvt.f32.s32 %v1996_v14  ;;  %v2258_v14 = vsub.f32 1.0, %v2226_v33 }
 0x566   : > { %2156 = vxpose.xlu1.b32.cont [12/16] %v2104_v55, 128  ;;  %2124 = vxpose.xlu0.b32.cont [12/16] %v2103_v4, 128  ;;  %v2196_v55 = vld [vmem:[%s3288_s13 + $0x98] sm:$0xff] }
 0x567   : > { %v2000_v60 = vadd.s32 %v1999_v52, %v1997_v56  ;;  %v2243_v56 = vsub.f32 1.0, %v2211_v22  ;;  %v2185_v22 = vld [vmem:[%s3288_s13 + $0x40] sm:$0xff] }
 0x569   : > { %v2012_v42 = vpop.xlane.xlu1 %2011  ;;  %vm2074_vm7 = vcmp.eq.s32.totalorder %v5308_v16, %v2000_v60  ;;  %vm2073_vm8 = vcmp.eq.s32.totalorder %v6401_v7, %v2000_v60 }
 0x56a   : > { %v2013_v8 = vcvt.f32.s32 %v2012_v42  ;;  %v2106_v51 = vsel %vm2074_vm7, 1.0, %v6402_v18  ;;  %v2105_v61 = vsel %vm2073_vm8, 1.0, %v6403_v48  ;;  %v2181_v42 = vld [vmem:[%s3288_s13 + $0x20] sm:$0xff] }
 0x56b   : > { %2157 = vxpose.xlu1.b32.cont [13/16] %v2106_v51, 128  ;;  %2125 = vxpose.xlu0.b32.cont [13/16] %v2105_v61, 128  ;;  %v2197_v18 = vld [vmem:[%s3288_s13 + $0xa0] sm:$0xff] }
 0x56c   : > { %v2016_v30 = vadd.s32 %v2015_v19, %v2013_v8  ;;  %v2028_v36 = vpop.xlane.xlu0 %2027  ;;  %v2259_v19 = vsub.f32 1.0, %v2227_v38  ;;  %v2228_v8 = vmul.f32 2.0, %v2196_v55 }
 0x56d   : > { %v2029_v45 = vcvt.f32.s32 %v2028_v36  ;;  %v2213_v36 = vmul.f32 2.0, %v2181_v42 }
 0x56e   : > { %vm2076_vm0 = vcmp.eq.s32.totalorder %v6404_v35, %v2016_v30  ;;  %vm2075_vm1 = vcmp.eq.s32.totalorder %v6405_v58, %v2016_v30  ;;  %v2244_v30 = vsub.f32 1.0, %v2212_v46  ;;  %v2260_v58 = vsub.f32 1.0, %v2228_v8 }
 0x56f   : > { %v2032_v16 = vadd.s32 %v2031_v27, %v2029_v45  ;;  %v2108_v17 = vsel %vm2076_vm0, 1.0, %v6406_v21  ;;  %v2107_v37 = vsel %vm2075_vm1, 1.0, %v6407_v62  ;;  %v2198_v21 = vld [vmem:[%s3288_s13 + $0xa8] sm:$0xff] }
 0x570   : > { %2158 = vxpose.xlu1.b32.cont [14/16] %v2108_v17, 128  ;;  %2126 = vxpose.xlu0.b32.cont [14/16] %v2107_v37, 128 }
 0x571   : > { %v2044_v31 = vpop.xlane.xlu1 %2043  ;;  %vm2078_vm3 = vcmp.eq.s32.totalorder %v5354_v54, %v2032_v16  ;;  %vm2077_vm4 = vcmp.eq.s32.totalorder %v6408_v50, %v2032_v16  ;;  %v6413_v54 = vld [vmem:[#allocation27_spill] sm:$0xff]  ;;  %v2229_v16 = vmul.f32 2.0, %v2197_v18  ;;  %v2214_v50 = vmul.f32 2.0, %v2182_v39 }
 0x572   : > { %v2045_v23 = vcvt.f32.s32 %v2044_v31  ;;  %v2110_v44 = vsel %vm2078_vm3, 1.0, %v6409_v1  ;;  %v2109_v12 = vsel %vm2077_vm4, 1.0, %v6410_v0  ;;  %v2245_v31 = vsub.f32 1.0, %v2213_v36 }
 0x573   : > { %v2230_v0 = vmul.f32 2.0, %v2198_v21 }
 0x574   : > { %v2048_v53 = vadd.s32 %v2047_v57, %v2045_v23  ;;  %2159 = vxpose.xlu1.b32.cont [15/16] %v2110_v44, 128  ;;  %2127 = vxpose.xlu0.b32.cont [15/16] %v2109_v12, 128  ;;  %v2261_v44 = vsub.f32 1.0, %v2229_v16  ;;  %v2199_v12 = vld [vmem:[%s3288_s13 + $0xb0] sm:$0xff] }
 0x575   : > { %v2231_v2 = vmul.f32 2.0, %v2199_v12 }
 0x576   : > { %vm2080_vm5 = vcmp.eq.s32.totalorder %v6411_v13, %v2048_v53  ;;  %vm2079_vm6 = vcmp.eq.s32.totalorder %v6412_v20, %v2048_v53  ;;  %v2183_v53 = vld [vmem:[%s3288_s13 + $0x30] sm:$0xff] }
 0x577   : > { %v2112_v26 = vsel %vm2080_vm5, 1.0, %v6413_v54  ;;  %v2111_v10 = vsel %vm2079_vm6, 1.0, %v6414_v43  ;;  %v2215_v43 = vmul.f32 2.0, %v2183_v53 }
 0x578   : > { %2160 = vxpose.xlu1.b32.end [16/16] %v2112_v26, 128  ;;  %2128 = vxpose.xlu0.b32.end [16/16] %v2111_v10, 128  ;;  %v2246_v26 = vsub.f32 1.0, %v2214_v50  ;;  %v2369_v50 = vld [vmem:[%s3281_s26] sm:$0xff] }
 0x5b8   : > { %v5566_v59 = vpop.trf.xlu0  ;;  %v5568_v29 = vpop.trf.xlu1 }
 0x5b9   : > { %v2273_v15 = vmul.f32 %v2241_v11, %v5566_v59  ;;  %v2289_v47 = vmul.f32 %v2257_v28, %v5568_v29  ;;  %v2247_v28 = vsub.f32 1.0, %v2215_v43 }
 0x5bb   : > { %v2305_v40 = vadd.f32 %v2273_v15, %v2177_v41  ;;  %v2321_v4 = vadd.f32 %v2289_v47, %v2193_v24  ;;  %v2184_v24 = vld [vmem:[%s3288_s13 + $0x38] sm:$0xff] }
 0x5bc   : > { %v5574_v52 = vpop.trf.xlu0  ;;  %v5576_v60 = vpop.trf.xlu1  ;;  %v2216_v33 = vmul.f32 2.0, %v2184_v24 }
 0x5bd   : > { %2337 = vst [vmem:[%s5579_s7] sm:$0xff] %v2305_v40  ;;  %v2274_v34 = vmul.f32 %v2242_v63, %v5574_v52  ;;  %2353 = vst [vmem:[%s5579_s7 + $0x80] sm:$0xff] %v2321_v4  ;;  %v2290_v7 = vmul.f32 %v2258_v14, %v5576_v60  ;;  %v2201_v14 = vld [vmem:[%s3288_s13 + $0xc0] sm:$0xff] }
 0x5be   : > { %v2248_v4 = vsub.f32 1.0, %v2216_v33  ;;  %v2233_v8 = vmul.f32 2.0, %v2201_v14  ;;  %v2374_v33 = vld [vmem:[%s3281_s26 + $0x28] sm:$0xff] }
 0x5bf   : > { %v2306_v51 = vadd.f32 %v2274_v34, %v2178_v49  ;;  %v2322_v48 = vadd.f32 %v2290_v7, %v2194_v32  ;;  %v2262_v49 = vsub.f32 1.0, %v2230_v0  ;;  %v2200_v32 = vld [vmem:[%s3288_s13 + $0xb8] sm:$0xff] }
 0x5c0   : > { %v5587_v61 = vpop.trf.xlu0  ;;  %v5589_v27 = vpop.trf.xlu1  ;;  %v2232_v47 = vmul.f32 2.0, %v2200_v32  ;;  %v2372_v0 = vld [vmem:[%s3281_s26 + $0x18] sm:$0xff] }
 0x5c1   : > { %2338 = vst [vmem:[%s5579_s7 + $0x8] sm:$0xff] %v2306_v51  ;;  %v2275_v45 = vmul.f32 %v2243_v56, %v5587_v61  ;;  %2354 = vst [vmem:[%s5579_s7 + $0x88] sm:$0xff] %v2322_v48  ;;  %v2291_v35 = vmul.f32 %v2259_v19, %v5589_v27  ;;  %v2217_v56 = vmul.f32 2.0, %v2185_v22 }
 0x5c2   : > { %v2264_v19 = vsub.f32 1.0, %v2232_v47 }
 0x5c3   : > { %v2307_v17 = vadd.f32 %v2275_v45, %v2179_v5  ;;  %v2323_v62 = vadd.f32 %v2291_v35, %v2195_v6  ;;  %v2249_v16 = vsub.f32 1.0, %v2217_v56 }
 0x5c4   : > { %v5597_v37 = vpop.trf.xlu0  ;;  %v5599_v57 = vpop.trf.xlu1 }
 0x5c5   : > { %2339 = vst [vmem:[%s5579_s7 + $0x10] sm:$0xff] %v2307_v17  ;;  %v2276_v23 = vmul.f32 %v2244_v30, %v5597_v37  ;;  %2355 = vst [vmem:[%s5579_s7 + $0x90] sm:$0xff] %v2323_v62  ;;  %v2292_v1 = vmul.f32 %v2260_v58, %v5599_v57  ;;  %v2370_v30 = vld [vmem:[%s3281_s26 + $0x8] sm:$0xff]  ;;  %v2265_v62 = vsub.f32 1.0, %v2233_v8 }
 0x5c7   : > { %v2308_v13 = vadd.f32 %v2276_v23, %v2180_v25  ;;  %v2324_v20 = vadd.f32 %v2292_v1, %v2196_v55  ;;  %v2263_v25 = vsub.f32 1.0, %v2231_v2  ;;  %v2371_v23 = vld [vmem:[%s3281_s26 + $0x10] sm:$0xff] }
 0x5c8   : > { %v5607_v54 = vpop.trf.xlu0  ;;  %v5609_v10 = vpop.trf.xlu1 }
 0x5c9   : > { %2340 = vst [vmem:[%s5579_s7 + $0x18] sm:$0xff] %v2308_v13  ;;  %v2277_v41 = vmul.f32 %v2245_v31, %v5607_v54  ;;  %2356 = vst [vmem:[%s5579_s7 + $0x98] sm:$0xff] %v2324_v20  ;;  %v2293_v9 = vmul.f32 %v2261_v44, %v5609_v10  ;;  %v5653_v31 = vld [vmem:[%s3288_s13 + $0xd0] sm:$0xff] }
 0x5cb   : > { %v2309_v3 = vadd.f32 %v2277_v41, %v2181_v42  ;;  %v2325_v11 = vadd.f32 %v2293_v9, %v2197_v18  ;;  %v5634_v42 = vld [vmem:[%s3288_s13 + $0x48] sm:$0xff]  ;;  %v2235_v41 = vmul.f32 2.0, %v5653_v31  ;;  %v2401_v9 = vmul.f32 %v2369_v50, %v5566_v59 }
 0x5cc   : > { %v5617_v5 = vpop.trf.xlu0  ;;  %v5619_v6 = vpop.trf.xlu1  ;;  %v2202_v18 = vld [vmem:[%s3288_s13 + $0xc8] sm:$0xff]  ;;  %v2218_v45 = vmul.f32 2.0, %v5634_v42 }
 0x5cd   : > { %2341 = vst [vmem:[%s5579_s7 + $0x20] sm:$0xff] %v2309_v3  ;;  %v2278_v63 = vmul.f32 %v2246_v26, %v5617_v5  ;;  %2357 = vst [vmem:[%s5579_s7 + $0xa0] sm:$0xff] %v2325_v11  ;;  %v2294_v15 = vmul.f32 %v2262_v49, %v5619_v6  ;;  %v2234_v35 = vmul.f32 2.0, %v2202_v18  ;;  %v5670_v49 = vld [vmem:[%s3288_s13 + $0x58] sm:$0xff]  ;;  %v2373_v3 = vld [vmem:[%s3281_s26 + $0x20] sm:$0xff]  ;;  %v2406_v8 = vmul.f32 %v2374_v33, %v5617_v5 }
 0x5ce   : > { %v2250_v13 = vsub.f32 1.0, %v2218_v45  ;;  %v2405_v56 = vmul.f32 %v2373_v3, %v5607_v54  ;;  %v2191_v3 = vld [vmem:[%s3288_s13 + $0x70] sm:$0xff] }
 0x5cf   : > { %v2310_v38 = vadd.f32 %v2278_v63, %v2182_v39  ;;  %v2326_v55 = vadd.f32 %v2294_v15, %v2198_v21  ;;  %v5648_v21 = vld [vmem:[%s3288_s13 + $0x50] sm:$0xff]  ;;  %v2266_v43 = vsub.f32 1.0, %v2234_v35 }
 0x5d0   : > { %v5627_v40 = vpop.trf.xlu0  ;;  %v5629_v46 = vpop.trf.xlu1  ;;  %v2219_v20 = vmul.f32 2.0, %v5648_v21 }
 0x5d1   : > { %2342 = vst [vmem:[%s5579_s7 + $0x28] sm:$0xff] %v2310_v38  ;;  %v2279_v34 = vmul.f32 %v2247_v28, %v5627_v40  ;;  %2358 = vst [vmem:[%s5579_s7 + $0xa8] sm:$0xff] %v2326_v55  ;;  %v2295_v7 = vmul.f32 %v2263_v25, %v5629_v46  ;;  %v2404_v28 = vmul.f32 %v2372_v0, %v5597_v37  ;;  %v2220_v25 = vmul.f32 2.0, %v5670_v49 }
 0x5d2   : > { %v2251_v15 = vsub.f32 1.0, %v2219_v20  ;;  %v2267_v38 = vsub.f32 1.0, %v2235_v41 }
 0x5d3   : > { %v2311_v51 = vadd.f32 %v2279_v34, %v2183_v53  ;;  %v2327_v48 = vadd.f32 %v2295_v7, %v2199_v12  ;;  %v2402_v53 = vmul.f32 %v2370_v30, %v5574_v52  ;;  %v2403_v52 = vmul.f32 %v2371_v23, %v5587_v61  ;;  %v5692_v34 = vld [vmem:[%s3288_s13 + $0xe0] sm:$0xff]  ;;  %v2375_v7 = vld [vmem:[%s3281_s26 + $0x30] sm:$0xff]  ;;  %v5710_v23 = vld [vmem:[%s3288_s13 + $0xe8] sm:$0xff] }
 0x5d4   : > { %v5640_v36 = vpop.trf.xlu0  ;;  %v5643_v39 = vpop.trf.xlu1  ;;  %v2252_v45 = vsub.f32 1.0, %v2220_v25  ;;  %v2407_v50 = vmul.f32 %v2375_v7, %v5627_v40 }
 0x5d5   : > { %2343 = vst [vmem:[%s5579_s7 + $0x30] sm:$0xff] %v2311_v51  ;;  %v2280_v58 = vmul.f32 %v2248_v4, %v5640_v36  ;;  %2359 = vst [vmem:[%s5579_s7 + $0xb0] sm:$0xff] %v2327_v48  ;;  %v2296_v17 = vmul.f32 %v2264_v19, %v5643_v39  ;;  %v2433_v11 = vadd.f32 %v2402_v53, %v2401_v9  ;;  %v2376_v48 = vld [vmem:[%s3281_s26 + $0x38] sm:$0xff]  ;;  %v2377_v53 = vld [vmem:[%s3281_s26 + $0x40] sm:$0xff] }
 0x5d7   : > { %v2312_v1 = vadd.f32 %v2280_v58, %v2184_v24  ;;  %v2328_v44 = vadd.f32 %v2296_v17, %v2200_v32  ;;  %v5675_v32 = vld [vmem:[%s3288_s13 + $0xd8] sm:$0xff]  ;;  %v2434_v4 = vadd.f32 %v2433_v11, %v2403_v52  ;;  %v2237_v17 = vmul.f32 2.0, %v5692_v34  ;;  %v2207_v11 = vld [vmem:[%s3288_s13 + $0xf0] sm:$0xff] }
 0x5d8   : > { %v5659_v12 = vpop.trf.xlu0  ;;  %v5662_v26 = vpop.trf.xlu1  ;;  %v2236_v55 = vmul.f32 2.0, %v5675_v32 }
 0x5d9   : > { %2344 = vst [vmem:[%s5579_s7 + $0x38] sm:$0xff] %v2312_v1  ;;  %v2281_v24 = vmul.f32 %v2249_v16, %v5659_v12  ;;  %2360 = vst [vmem:[%s5579_s7 + $0xb8] sm:$0xff] %v2328_v44  ;;  %v2297_v2 = vmul.f32 %v2265_v62, %v5662_v26  ;;  %v2435_v19 = vadd.f32 %v2434_v4, %v2404_v28  ;;  %v2269_v52 = vsub.f32 1.0, %v2237_v17  ;;  %v2379_v28 = vld [vmem:[%s3281_s26 + $0x50] sm:$0xff] }
 0x5da   : > { %v2268_v16 = vsub.f32 1.0, %v2236_v55  ;;  %v2408_v44 = vmul.f32 %v2376_v48, %v5640_v36  ;;  %v2409_v36 = vmul.f32 %v2377_v53, %v5659_v12  ;;  %v2380_v12 = vld [vmem:[%s3281_s26 + $0x58] sm:$0xff]  ;;  %v2223_v55 = vmul.f32 2.0, %v2191_v3 }
 0x5db   : > { %v2313_v59 = vadd.f32 %v2281_v24, %v2185_v22  ;;  %v2329_v61 = vadd.f32 %v2297_v2, %v2201_v14  ;;  %v5687_v22 = vld [vmem:[%s3288_s13 + $0x60] sm:$0xff]  ;;  %v2436_v62 = vadd.f32 %v2435_v19, %v2405_v56  ;;  %v2238_v24 = vmul.f32 2.0, %v5710_v23 }
 0x5dc   : > { %v2138_v63 = vpop.trf.xlu0  ;;  %v5681_v47 = vpop.trf.xlu1  ;;  %v2221_v35 = vmul.f32 2.0, %v5687_v22 }
 0x5dd   : > { %2345 = vst [vmem:[%s5579_s7 + $0x40] sm:$0xff] %v2313_v59  ;;  %v2282_v37 = vmul.f32 %v2250_v13, %v2138_v63  ;;  %2361 = vst [vmem:[%s5579_s7 + $0xc0] sm:$0xff] %v2329_v61  ;;  %v2298_v14 = vmul.f32 %v2266_v43, %v5681_v47  ;;  %v2437_v1 = vadd.f32 %v2436_v62, %v2406_v8  ;;  %v2378_v13 = vld [vmem:[%s3281_s26 + $0x48] sm:$0xff]  ;;  %v2270_v56 = vsub.f32 1.0, %v2238_v24  ;;  %v2381_v8 = vld [vmem:[%s3281_s26 + $0x60] sm:$0xff] }
 0x5de   : > { %v2253_v43 = vsub.f32 1.0, %v2221_v35  ;;  %v2410_v61 = vmul.f32 %v2378_v13, %v2138_v63  ;;  %v2192_v63 = vld [vmem:[%s3288_s13 + $0x78] sm:$0xff]  ;;  %v2382_v35 = vld [vmem:[%s3281_s26 + $0x68] sm:$0xff] }
 0x5df   : > { %v2314_v51 = vadd.f32 %v2282_v37, %v5634_v42  ;;  %v2330_v54 = vadd.f32 %v2298_v14, %v2202_v18  ;;  %v5705_v42 = vld [vmem:[%s3288_s13 + $0x68] sm:$0xff]  ;;  %v2438_v2 = vadd.f32 %v2437_v1, %v2407_v50  ;;  %v2239_v37 = vmul.f32 2.0, %v2207_v11 }
 0x5e0   : > { %v2139_v30 = vpop.trf.xlu0  ;;  %v5699_v58 = vpop.trf.xlu1  ;;  %v2222_v41 = vmul.f32 2.0, %v5705_v42  ;;  %v2224_v17 = vmul.f32 2.0, %v2192_v63 }
 0x5e1   : > { %2346 = vst [vmem:[%s5579_s7 + $0x48] sm:$0xff] %v2314_v51  ;;  %v2283_v5 = vmul.f32 %v2251_v15, %v2139_v30  ;;  %2362 = vst [vmem:[%s5579_s7 + $0xc8] sm:$0xff] %v2330_v54  ;;  %v2299_v18 = vmul.f32 %v2267_v38, %v5699_v58  ;;  %v2439_v59 = vadd.f32 %v2438_v2, %v2408_v44  ;;  %v2271_v50 = vsub.f32 1.0, %v2239_v37 }
 0x5e2   : > { %v2254_v38 = vsub.f32 1.0, %v2222_v41  ;;  %v2411_v7 = vmul.f32 %v2379_v28, %v2139_v30  ;;  %v2255_v30 = vsub.f32 1.0, %v2223_v55  ;;  %v2386_v55 = vld [vmem:[%s3281_s26 + $0x88] sm:$0xff] }
 0x5e3   : > { %v2315_v0 = vadd.f32 %v2283_v5, %v5648_v21  ;;  %v2331_v40 = vadd.f32 %v2299_v18, %v5653_v31  ;;  %v2440_v14 = vadd.f32 %v2439_v59, %v2409_v36  ;;  %v2385_v59 = vld [vmem:[%s3281_s26 + $0x80] sm:$0xff] }
 0x5e4   : > { %v2140_v20 = vpop.trf.xlu0  ;;  %v5718_v9 = vpop.trf.xlu1 }
 0x5e5   : > { %2347 = vst [vmem:[%s5579_s7 + $0x50] sm:$0xff] %v2315_v0  ;;  %v2284_v21 = vmul.f32 %v2252_v45, %v2140_v20  ;;  %2363 = vst [vmem:[%s5579_s7 + $0xd0] sm:$0xff] %v2331_v40  ;;  %v2300_v31 = vmul.f32 %v2268_v16, %v5718_v9  ;;  %v2441_v51 = vadd.f32 %v2440_v14, %v2410_v61  ;;  %v2387_v14 = vld [vmem:[%s3281_s26 + $0x90] sm:$0xff] }
 0x5e6   : > { %v2412_v54 = vmul.f32 %v2380_v12, %v2140_v20 }
 0x5e7   : > { %v2316_v33 = vadd.f32 %v2284_v21, %v5670_v49  ;;  %v2332_v15 = vadd.f32 %v2300_v31, %v5675_v32  ;;  %v2208_v32 = vld [vmem:[%s3288_s13 + $0xf8] sm:$0xff]  ;;  %v2442_v18 = vadd.f32 %v2441_v51, %v2411_v7  ;;  %v2418_v7 = vmul.f32 %v2386_v55, %v5576_v60  ;;  %v2391_v60 = vld [vmem:[%s3281_s26 + $0xb0] sm:$0xff] }
 0x5e8   : > { %v2141_v25 = vpop.trf.xlu0  ;;  %v5731_v4 = vpop.trf.xlu1  ;;  %v2240_v5 = vmul.f32 2.0, %v2208_v32 }
 0x5e9   : > { %2348 = vst [vmem:[%s5579_s7 + $0x58] sm:$0xff] %v2316_v33  ;;  %v2285_v19 = vmul.f32 %v2253_v43, %v2141_v25  ;;  %2364 = vst [vmem:[%s5579_s7 + $0xd8] sm:$0xff] %v2332_v15  ;;  %v2301_v49 = vmul.f32 %v2269_v52, %v5731_v4  ;;  %v2413_v53 = vmul.f32 %v2381_v8, %v2141_v25  ;;  %v2256_v43 = vsub.f32 1.0, %v2224_v17 }
 0x5ea   : > { %v2272_v52 = vsub.f32 1.0, %v2240_v5  ;;  %v2419_v8 = vmul.f32 %v2387_v14, %v5589_v27  ;;  %v2423_v27 = vmul.f32 %v2391_v60, %v5629_v46 }
 0x5eb   : > { %v2317_v48 = vadd.f32 %v2285_v19, %v5687_v22  ;;  %v2333_v45 = vadd.f32 %v2301_v49, %v5692_v34  ;;  %v2383_v22 = vld [vmem:[%s3281_s26 + $0x70] sm:$0xff]  ;;  %v2443_v34 = vadd.f32 %v2442_v18, %v2412_v54  ;;  %v2388_v49 = vld [vmem:[%s3281_s26 + $0x98] sm:$0xff]  ;;  %v2389_v54 = vld [vmem:[%s3281_s26 + $0xa0] sm:$0xff] }
 0x5ec   : > { %v2142_v16 = vpop.trf.xlu0  ;;  %v5742_v62 = vpop.trf.xlu1  ;;  %v2394_v18 = vld [vmem:[%s3281_s26 + $0xc8] sm:$0xff] }
 0x5ed   : > { %2349 = vst [vmem:[%s5579_s7 + $0x60] sm:$0xff] %v2317_v48  ;;  %v2286_v1 = vmul.f32 %v2254_v38, %v2142_v16  ;;  %2365 = vst [vmem:[%s5579_s7 + $0xe0] sm:$0xff] %v2333_v45  ;;  %v2302_v44 = vmul.f32 %v2270_v56, %v5742_v62  ;;  %v2414_v40 = vmul.f32 %v2382_v35, %v2142_v16  ;;  %v2390_v48 = vld [vmem:[%s3281_s26 + $0xa8] sm:$0xff] }
 0x5ee   : > { %v2444_v24 = vadd.f32 %v2443_v34, %v2413_v53  ;;  %v2417_v56 = vmul.f32 %v2385_v59, %v5568_v29  ;;  %v2420_v29 = vmul.f32 %v2388_v49, %v5599_v57  ;;  %v2422_v35 = vmul.f32 %v2390_v48, %v5619_v6 }
 0x5ef   : > { %v2318_v0 = vadd.f32 %v2286_v1, %v5705_v42  ;;  %v2334_v13 = vadd.f32 %v2302_v44, %v5710_v23  ;;  %v2384_v42 = vld [vmem:[%s3281_s26 + $0x78] sm:$0xff]  ;;  %v2395_v1 = vld [vmem:[%s3281_s26 + $0xd0] sm:$0xff]  ;;  %v2426_v6 = vmul.f32 %v2394_v18, %v5681_v47 }
 0x5f0   : > { %v2143_v20 = vpop.trf.xlu0  ;;  %v5750_v41 = vpop.trf.xlu1  ;;  %v2445_v31 = vadd.f32 %v2444_v24, %v2414_v40  ;;  %v2427_v46 = vmul.f32 %v2395_v1, %v5699_v58 }
 0x5f1   : > { %2350 = vst [vmem:[%s5579_s7 + $0x68] sm:$0xff] %v2318_v0  ;;  %v2287_v2 = vmul.f32 %v2255_v30, %v2143_v20  ;;  %v2415_v36 = vmul.f32 %v2383_v22, %v2143_v20  ;;  %2366 = vst [vmem:[%s5579_s7 + $0xe8] sm:$0xff] %v2334_v13  ;;  %v2303_v21 = vmul.f32 %v2271_v50, %v5750_v41  ;;  %v2392_v30 = vld [vmem:[%s3281_s26 + $0xb8] sm:$0xff]  ;;  %v2393_v50 = vld [vmem:[%s3281_s26 + $0xc0] sm:$0xff] }
 0x5f2   : > { %v2424_v57 = vmul.f32 %v2392_v30, %v5643_v39  ;;  %v2396_v22 = vld [vmem:[%s3281_s26 + $0xd8] sm:$0xff]  ;;  %v2397_v0 = vld [vmem:[%s3281_s26 + $0xe0] sm:$0xff]  ;;  %v2398_v13 = vld [vmem:[%s3281_s26 + $0xe8] sm:$0xff] }
 0x5f3   : > { %v2319_v28 = vadd.f32 %v2287_v2, %v2191_v3  ;;  %v2335_v23 = vadd.f32 %v2303_v21, %v2207_v11  ;;  %v2446_v15 = vadd.f32 %v2445_v31, %v2415_v36  ;;  %v2428_v39 = vmul.f32 %v2396_v22, %v5718_v9 }
 0x5f4   : > { %v2144_v61 = vpop.trf.xlu0  ;;  %v2176_v33 = vpop.trf.xlu1  ;;  %v2430_v24 = vmul.f32 %v2398_v13, %v5742_v62 }
 0x5f5   : > { %2351 = vst [vmem:[%s5579_s7 + $0x70] sm:$0xff] %v2319_v28  ;;  %v2288_v12 = vmul.f32 %v2256_v43, %v2144_v61  ;;  %v2416_v25 = vmul.f32 %v2384_v42, %v2144_v61  ;;  %2367 = vst [vmem:[%s5579_s7 + $0xf0] sm:$0xff] %v2335_v23  ;;  %v2304_v38 = vmul.f32 %v2272_v52, %v2176_v33  ;;  %v2399_v43 = vld [vmem:[%s3281_s26 + $0xf0] sm:$0xff]  ;;  %v2400_v52 = vld [vmem:[%s3281_s26 + $0xf8] sm:$0xff] }
 0x5f6   : > { %v2431_v58 = vmul.f32 %v2399_v43, %v5750_v41  ;;  %v2432_v36 = vmul.f32 %v2400_v52, %v2176_v33 }
 0x5f7   : > { %v2320_v3 = vadd.f32 %v2288_v12, %v2192_v63  ;;  %v2447_v37 = vadd.f32 %v2446_v15, %v2416_v25  ;;  %v2336_v11 = vadd.f32 %v2304_v38, %v2208_v32  ;;  %v2421_v32 = vmul.f32 %v2389_v54, %v5609_v10 }
 0x5f8   : > { %v2425_v10 = vmul.f32 %v2393_v50, %v5662_v26  ;;  %v2429_v26 = vmul.f32 %v2397_v0, %v5731_v4 }
 0x5f9   : > { %2352 = vst [vmem:[%s5579_s7 + $0x78] sm:$0xff] %v2320_v3  ;;  %v2448_v19 = vadd.f32 %v2447_v37, %v2417_v56  ;;  %2368 = vst [vmem:[%s5579_s7 + $0xf8] sm:$0xff] %v2336_v11 }
 0x5fb   : > { %v2449_v51 = vadd.f32 %v2448_v19, %v2418_v7 }
 0x5fd   : > { %v2450_v63 = vadd.f32 %v2449_v51, %v2419_v8 }
 0x5ff   : > { %v2451_v45 = vadd.f32 %v2450_v63, %v2420_v29 }
 0x601   : > { %v2452_v16 = vadd.f32 %v2451_v45, %v2421_v32 }
 0x603   : > { %v2453_v17 = vadd.f32 %v2452_v16, %v2422_v35 }
 0x605   : > { %v2454_v5 = vadd.f32 %v2453_v17, %v2423_v27 }
 0x607   : > { %v2455_v53 = vadd.f32 %v2454_v5, %v2424_v57 }
 0x609   : > { %v2456_v44 = vadd.f32 %v2455_v53, %v2425_v10 }
 0x60b   : > { %v2457_v34 = vadd.f32 %v2456_v44, %v2426_v6 }
 0x60d   : > { %v2458_v40 = vadd.f32 %v2457_v34, %v2427_v46 }
 0x60f   : > { %v2459_v20 = vadd.f32 %v2458_v40, %v2428_v39 }
 0x611   : > { %v2460_v47 = vadd.f32 %v2459_v20, %v2429_v26 }
 0x613   : > { %v2461_v2 = vadd.f32 %v2460_v47, %v2430_v24 }
 0x615   : > { %v2462_v21 = vadd.f32 %v2461_v2, %v2431_v58 }
 0x617   : > { %v2463_v42 = vadd.f32 %v2462_v21, %v2432_v36 }
 0x619   : > { %2464 = vadd.xlane.f32.xlu0 %v2463_v42 }
 0x61a   : > { %2910 = shalt.err (!%p2907_p3)
}
 0x61b   : > { %s2911_s11 = scalar_lea.hbm %s5797_s23, 4096  ;;  %s2915_s26 = scalar_lea.hbm %s5873_s5, 8192 }
 0x61c   : > { %p2912_p11 = scmp.ne.s32.totalorder %s5797_s23, %s2911_s11  ;;  %p2916_p7 = scmp.lt.s32.totalorder %s5797_s23, %s5873_s5 }
 0x61d   : > { %p2917_p1 = scmp.lt.s32.totalorder %s2915_s26, %s2911_s11 }
 0x61e   : > { %p2913_p4 = pnand %p2912_p11, %p6415_p10 }
 0x61f   : > { %p2918_p8 = por %p2917_p1, %p2916_p7 }
 0x620   : > { %p2914_p5 = pneg %p2913_p4 }
 0x622   : > { %p2919_p13 = pnand %p2918_p8, %p2914_p5 }
 0x624   : > { %2922 = shalt.err (!%p2919_p13)
}
 0x625   : > { %s3011_s17 = smov 128   ;;  %s3012_s15 = smov 256  }
 0x626   : > { %s3013_s20 = smov 8   ;;  %s2698_s7 = sshll.u32 %s3266_s28, 3 }
 0x627   : > { %2719 = dma.vmem_to_hbm [thread:$0]  (%p6415_p10), %s5800_s10, 4096, %s5797_s23, %s2476_s12, %s3011_s17, %s3012_s15, %s3013_s20  }
 0x628   : > { %s397_s18 = scalar_lea.vmem [#allocation11], %s2698_s7  ;;  %s2507_s12 = scalar_lea.hbm %s5874_s6, %s2701_s29 }
 0x629   : > { %s2509_s0 = sshll.u32 %s397_s18, 4  ;;  %s2481_s16 = scalar_lea.sflag [#allocation12], %s3266_s28  ;;  %s5826_s0 = int_to_ptr.vmem [resolvable:$true] %s2509_s0 }
 0x62a   : > { %s2923_s30 = scalar_lea.vmem %s5826_s0, 128  ;;  %s3014_s9 = smov [#allocation11]  }
 0x62b   : > { %p2924_p0 = scmp.ne.s32.totalorder %s5826_s0, %s2923_s30  ;;  %s2927_s11 = sshll.u32 %s3014_s9, 4  ;;  %s2928_s11 = int_to_ptr.vmem [resolvable:$false] %s2927_s11 }
 0x62c   : > { %s2929_s1 = scalar_lea.vmem %s2928_s11, 256  ;;  %p2930_p9 = scmp.lt.s32.totalorder %s5826_s0, %s2928_s11 }
 0x62d   : > { %p2925_p2 = pnand %p2924_p0, %p6415_p10  ;;  %p2931_p12 = scmp.lt.s32.totalorder %s2929_s1, %s2923_s30 }
 0x62f   : > { %p2926_p6 = pneg %p2925_p2  ;;  %p2932_p3 = por %p2931_p12, %p2930_p9 }
 0x631   : > { %p2933_p11 = pnand %p2932_p3, %p2926_p6 }
 0x6a2   : > { %v2465_v9 = vpop.xlane.xlu0 %2464 }
 0x6a3   : > { %v2466_v4 = vrot.slane %v2465_v9, 4 }
 0x6a5   : > { %v2467_v62 = vadd.f32 %v2466_v4, %v2465_v9 }
 0x6a7   : > { %v2468_v41 = vrot.slane %v2467_v62, 2 }
 0x6a9   : > { %v2469_v31 = vadd.f32 %v2468_v41, %v2467_v62 }
 0x6ab   : > { %v2470_v28 = vrot.slane %v2469_v31, 1 }
 0x6ad   : > { %v2471_v23 = vadd.f32 %v2470_v28, %v2469_v31 }
 0x6af   : > { %2709 = vpush %v2471_v23 }
 0x6e0   : > { %s2710_s27 = spop %2709 }
 0x6e1   : > { %v2473_v59 = vstv %s2710_s27 }
 0x6e2   : > { %2474 = vst [vmem:[%s397_s18] sm:$0xff] %v2473_v59 }
 0x6e3   : > { %2936 = shalt.err (!%p2933_p11)
}
 0x6e4   : > { %s2937_s25 = scalar_lea.hbm %s2507_s12, 128  ;;  %s2941_s14 = scalar_lea.hbm %s5874_s6, 256 }
 0x6e5   : > { %p2938_p4 = scmp.ne.s32.totalorder %s2507_s12, %s2937_s25  ;;  %p2942_p1 = scmp.lt.s32.totalorder %s2507_s12, %s5874_s6 }
 0x6e6   : > { %p2943_p8 = scmp.lt.s32.totalorder %s2941_s14, %s2937_s25 }
 0x6e7   : > { %p2939_p5 = pnand %p2938_p4, %p6415_p10 }
 0x6e8   : > { %p2944_p13 = por %p2943_p8, %p2942_p1 }
 0x6e9   : > { %p2940_p7 = pneg %p2939_p5 }
 0x6eb   : > { %p2945_p0 = pnand %p2944_p13, %p2940_p7 }
 0x6ed   : > { %2948 = shalt.err (!%p2945_p0)
}
 0x6ee   : > { %2720 = dma.vmem_to_hbm [thread:$0]  (%p6415_p10), %s5826_s0, 128, %s2507_s12, %s2481_s16  }
 0x6ef PF: > { %s6416_s19 = sld [smem:[#allocation21_spill]]  ;;  %s2521_s17 = sand.u32 1, %s2987_s21  }
 0x6f0   : > { %p6418_p6 = scmp.ge.s32.totalorder %s2999_s24, 2  ;;  %s2522_s15 = scalar_lea.sflag [#allocation4], %s2521_s17 }
 0x6f5   : > { %p6417_p2 = scmp.ne.s32.totalorder %s6416_s19, 0 }
 0x6f7   : > { %p2737_p9 = pnand %p6418_p6, %p6417_p2 }
 0x6f9   : > { %p2738_p12 = pneg %p2737_p9 }
 0x6fb   : > { %2978 = dma.done.wait (%p2738_p12), %s2522_s15, 4096  }
 0x6fc   : > { %2980 = vsyncadd (%p2738_p12), %s2522_s15, 4294963200  ;;  %s2531_s20 = scalar_lea.sflag [#allocation12], %s2521_s17 }
 0x6fd   : > { %2982 = dma.done.wait (%p2738_p12), %s2531_s20, 128  }
 0x6fe   : > { %2984 = vsyncadd (%p2738_p12), %s2531_s20, 4294967168  ;;  %s6419_s24 = sld [smem:[#allocation19_spill]]  ;;  %s6422_s21 = smov %s2991_s22 }
 0x6ff   : > { %s6420_s8 = sld [smem:[#allocation18_spill]] }
 0x700   : > { %s6421_s23 = sld [smem:[#allocation20_spill]] }
 0x704   : > { %p29_p10 = scmp.ge.s32.totalorder %s6419_s24, 4  }
 0x705   : > { %s6423_s22 = smov %s6420_s8 }
 0x706   :  { %31 = sbr.rel (!%p29_p10) target bundleno = 14 (0xe), region = 139 }
 0x70b   :  { %2536 = vsyncpa [#allocation3], 1 }
 0x70c   :  { %2538 = vsyncpa [#allocation3 + $0x1], 1 }
 0x70d   :  { %2539 = vsyncpa [#allocation6], 1 }
 0x70e   :  { %2541 = vsyncpa [#allocation6 + $0x1], 1 }
 0x70f   :  { %2542 = vsyncpa [#allocation9], 1 }
 0x710   :  { %2544 = vsyncpa [#allocation9 + $0x1], 1 }
 0x711   :  { %2545 = vsyncpa [#allocation4], 1 }
 0x712   :  { %2547 = vsyncpa [#allocation4 + $0x1], 1 }
 0x713   :  { %2548 = vsyncpa [#allocation12], 1 }
 0x714   :  { %2550 = vsyncpa [#allocation12 + $0x1], 1 }

</bundles_post_ra>
